<compile_context>
chip_gen: v7x
topology: tpu7x:2x2x1
jax: 0.10.0
libtpu: 0.0.40
codegen_flags: <defaults>
</compile_context>

<pallas_src>
import math

import jax
import jax.numpy as jnp
from jax.experimental import pallas as pl
from jax.experimental.pallas import tpu as pltpu

# ----------------------------- model dims (small) ---------------------------
FEATURE_DIM = 32           # image feature dim   (PyTorch default 768)
DET_DIM     = 8            # detections_feature_dim (default 20)
BERT_DIM    = 32           # bert_input / hidden_size
NUM_LAYERS  = 2            # num_hidden_layers
NUM_HEADS   = 4
HEAD_DIM    = BERT_DIM // NUM_HEADS
INTER_DIM   = 4 * BERT_DIM # intermediate_size
HIDDEN_DIM  = 16           # classifier hidden_dim
NUM_CLASSES = 4
MAX_POS     = 16
LANE        = 128          # TPU lane width; slab / output padding target

BN_EPS      = 1e-5
BERT_LN_EPS = 1e-12
CLS_LN_EPS  = 1e-5


# ----------------------------- in-kernel math --------------------------------

def _erf(x):
    # Abramowitz & Stegun 7.1.26 rational approximation, |err| < 1.5e-7.
    # Guarantees a Mosaic lowering while matching PyTorch's exact-erf GELU
    # to well below f32 noise.
    p = 0.3275911
    a1, a2, a3, a4, a5 = (0.254829592, -0.284496736, 1.421413741,
                          -1.453152027, 1.061405429)
    sign = jnp.where(x >= 0.0, 1.0, -1.0)
    ax = jnp.abs(x)
    t = 1.0 / (1.0 + p * ax)
    poly = ((((a5 * t + a4) * t + a3) * t + a2) * t + a1) * t
    return sign * (1.0 - poly * jnp.exp(-ax * ax))


def _gelu(x):
    return 0.5 * x * (1.0 + _erf(x * (1.0 / math.sqrt(2.0))))


# ============================ param slab layout ===============================

def _param_layout(m):
    """Static row layout of the single packed (R, 128) parameter slab."""
    hm = NUM_HEADS * m
    order = []

    def add(name, rows, cols):
        assert cols <= LANE, (name, cols)
        order.append((name, rows, cols))

    # front end
    add("img_bn_g", 1, FEATURE_DIM); add("img_bn_b", 1, FEATURE_DIM)
    add("det_bn_g", 1, DET_DIM);     add("det_bn_b", 1, DET_DIM)
    add("proj_w_img", FEATURE_DIM, BERT_DIM)
    add("proj_w_det", DET_DIM, BERT_DIM)           # det_proj ∘ proj (folded)
    add("proj_b", 1, BERT_DIM)                     # folded bias
    add("pos_tok", m, BERT_DIM)                    # pos + token_type(0) emb
    add("emb_ln_g", 1, BERT_DIM); add("emb_ln_b", 1, BERT_DIM)
    add("struct_bias", hm, hm)                     # (head,batch) block-diag bias
    # encoder layers
    for l in range(NUM_LAYERS):
        add(f"w_qkv{l}", BERT_DIM, 3 * BERT_DIM)
        add(f"b_qkv{l}", 1, 3 * BERT_DIM)
        add(f"wo{l}", BERT_DIM, BERT_DIM)
        add(f"ao_b{l}", 1, BERT_DIM)
        add(f"ln1_g{l}", 1, BERT_DIM); add(f"ln1_b{l}", 1, BERT_DIM)
        add(f"i_w{l}", BERT_DIM, INTER_DIM); add(f"i_b{l}", 1, INTER_DIM)
        add(f"o_w{l}", INTER_DIM, BERT_DIM); add(f"o_b{l}", 1, BERT_DIM)
        add(f"ln2_g{l}", 1, BERT_DIM); add(f"ln2_b{l}", 1, BERT_DIM)
    # classifier (Linear0 ∘ Linear1 folded)
    add("cls01_w", BERT_DIM, HIDDEN_DIM); add("cls01_b", 1, HIDDEN_DIM)
    add("cls_ln1_g", 1, HIDDEN_DIM);      add("cls_ln1_b", 1, HIDDEN_DIM)
    add("cls2_w", HIDDEN_DIM, HIDDEN_DIM // 2); add("cls2_b", 1, HIDDEN_DIM // 2)
    add("cls_ln2_g", 1, HIDDEN_DIM // 2); add("cls_ln2_b", 1, HIDDEN_DIM // 2)
    add("cls3_w", HIDDEN_DIM // 2, LANE)  # zero-padded -> lane-dense output
    add("cls3_b", 1, LANE)

    offsets, off = {}, 0
    for name, rows, cols in order:
        offsets[name] = (off, rows, cols)
        off += rows
    return order, offsets, off


# =============================== fused kernel ================================

def _make_kernel(m, offsets):
    """Entire BookBERT2 forward on (M, ·) activations; single invocation."""
    H, D, Dh = NUM_HEADS, BERT_DIM, HEAD_DIM
    scale = 1.0 / math.sqrt(HEAD_DIM)
    neg = float(jnp.finfo(jnp.float32).min)

    def kernel(img_ref, det_ref, mask_ref, p_ref, out_ref):
        # Lazy slab access: load each parameter slice at first use (short live
        # ranges; no 60-value register-file blowout).
        def get(name):
            off, rows, cols = offsets[name]
            blk = p_ref[pl.ds(off, rows), :]          # (rows, 128) lane-dense load
            return blk if cols == LANE else blk[:, :cols]

        def mm(a, b):
            return jnp.dot(a, b, preferred_element_type=jnp.float32)

        def bn(x, g, b):
            # Training-mode BatchNorm1d: per-channel batch mean / biased var.
            mu = jnp.mean(x, axis=0, keepdims=True)
            var = jnp.mean((x - mu) ** 2, axis=0, keepdims=True)
            return (x - mu) * jax.lax.rsqrt(var + BN_EPS) * g + b

        def ln(x, g, b, eps):
            mu = jnp.mean(x, axis=-1, keepdims=True)
            var = jnp.mean((x - mu) ** 2, axis=-1, keepdims=True)
            return (x - mu) * jax.lax.rsqrt(var + eps) * g + b

        # ---- front end: BN -> (folded) projections -> embeddings + LN ----
        img_n = bn(img_ref[...], get("img_bn_g"), get("img_bn_b"))
        det_n = bn(det_ref[...], get("det_bn_g"), get("det_bn_b"))
        # concat([img_n, det_proj(det_n)]) @ proj_w folded into two matmuls,
        # with det_proj ∘ proj_det pre-multiplied at pack time.
        x = mm(img_n, get("proj_w_img")) + mm(det_n, get("proj_w_det")) + get("proj_b")
        x = ln(x + get("pos_tok"), get("emb_ln_g"), get("emb_ln_b"), BERT_LN_EPS)
        # TODO(synk): dropout layers (embeddings / attention / classifier) are
        # identity here (inference behaviour); no deterministic equivalent.

        # ---- attention bias, built once and reused by every layer ----
        # struct_bias is the static (head, batch) block-diagonal structure;
        # the per-call key mask is applied here (HF-style finfo.min masking).
        mask_hm = jnp.concatenate([mask_ref[...]] * H, axis=1)     # (1, H*M)
        bias = jnp.where(mask_hm > 0.5, get("struct_bias"), neg)   # (H*M, H*M)
        # TODO(synk): rows with ALL keys masked degenerate to a uniform
        # softmax, same as the HF reference.

        # ---- encoder layers (heads batched like batches) ----
        for l in range(NUM_LAYERS):
            # one fused QKV matmul for all heads: (M, D) @ (D, 3D)
            qkv = mm(x, get(f"w_qkv{l}")) + get(f"b_qkv{l}")        # (M, 3D)
            # stack heads along the row axis -> (H*M, Dh)
            Qh = jnp.concatenate(
                [qkv[:, h * Dh:(h + 1) * Dh] for h in range(H)], axis=0)
            Kh = jnp.concatenate(
                [qkv[:, D + h * Dh:D + (h + 1) * Dh] for h in range(H)], axis=0)
            Vh = jnp.concatenate(
                [qkv[:, 2 * D + h * Dh:2 * D + (h + 1) * Dh] for h in range(H)],
                axis=0)
            # one (H*M, H*M) score matmul + ONE softmax for all (batch, head)
            s = jax.lax.dot_general(Qh, Kh, (((1,), (1,)), ((), ())),
                                    preferred_element_type=jnp.float32)
            s = s * scale + bias
            s = s - jnp.max(s, axis=-1, keepdims=True)
            p = jnp.exp(s)
            p = p / jnp.sum(p, axis=-1, keepdims=True)              # exact divide
            ctx = mm(p, Vh)                                         # (H*M, Dh)
            # un-stack heads back to lanes -> (M, D), then one output matmul
            ctx_w = jnp.concatenate(
                [ctx[h * m:(h + 1) * m, :] for h in range(H)], axis=1)
            attn = mm(ctx_w, get(f"wo{l}")) + get(f"ao_b{l}")
            a = ln(attn + x, get(f"ln1_g{l}"), get(f"ln1_b{l}"), BERT_LN_EPS)
            inter = _gelu(mm(a, get(f"i_w{l}")) + get(f"i_b{l}"))   # (M, 4D)
            x = ln(mm(inter, get(f"o_w{l}")) + get(f"o_b{l}") + a,
                   get(f"ln2_g{l}"), get(f"ln2_b{l}"), BERT_LN_EPS)

        # ---- classifier head (Linear0 ∘ Linear1 folded at pack time) ----
        h1 = mm(x, get("cls01_w")) + get("cls01_b")                 # (M, 16)
        h1 = _gelu(ln(h1, get("cls_ln1_g"), get("cls_ln1_b"), CLS_LN_EPS))
        h2 = _gelu(ln(mm(h1, get("cls2_w")) + get("cls2_b"),
                      get("cls_ln2_g"), get("cls_ln2_b"), CLS_LN_EPS))
        # zero-padded (M, 128) lane-dense store; real logits in columns [:4]
        out_ref[...] = mm(h2, get("cls3_w")) + get("cls3_b")

    return kernel


# ============================ one-time packing ================================

def pack_params(params, batch, seq):
    """One-time packing of all parameters into a single (R, 128) f32 slab.

    All folding / stacking / bias construction happens here (NOT in the
    per-call path).  Exactly-linear compositions are folded:
      * detection_projection ∘ projection[det half]
      * classifier Linear0 ∘ Linear1
    """
    f32 = jnp.float32
    m = batch * seq
    hm = NUM_HEADS * m
    vals = {}

    vals["img_bn_g"], vals["img_bn_b"] = params["img_bn_g"], params["img_bn_b"]
    vals["det_bn_g"], vals["det_bn_b"] = params["det_bn_g"], params["det_bn_b"]

    proj_w = jnp.asarray(params["proj_w"], f32)          # (2*Df, D)
    pw_img, pw_det = proj_w[:FEATURE_DIM], proj_w[FEATURE_DIM:]
    vals["proj_w_img"] = pw_img
    vals["proj_w_det"] = jnp.asarray(params["det_proj_w"], f32) @ pw_det
    vals["proj_b"] = (jnp.asarray(params["det_proj_b"], f32) @ pw_det
                      + jnp.asarray(params["proj_b"], f32))

    pos = params["pos_emb"][:seq] + params["tok_emb"][0][None, :]
    vals["pos_tok"] = jnp.tile(pos, (batch, 1))          # (m, D)
    vals["emb_ln_g"], vals["emb_ln_b"] = params["emb_ln_g"], params["emb_ln_b"]

    # static (head, batch) block-diagonal structure of the attention bias
    idx = jnp.arange(hm)
    grp = (idx // m) * batch + (idx % m) // seq          # unique (head, batch) id
    allowed = grp[:, None] == grp[None, :]
    vals["struct_bias"] = jnp.where(allowed, 0.0, jnp.finfo(f32).min).astype(f32)

    for l, lp in enumerate(params["layers"]):
        vals[f"w_qkv{l}"] = jnp.concatenate([lp["q_w"], lp["k_w"], lp["v_w"]], axis=1)
        vals[f"b_qkv{l}"] = jnp.concatenate([lp["q_b"], lp["k_b"], lp["v_b"]], axis=0)
        vals[f"wo{l}"], vals[f"ao_b{l}"] = lp["ao_w"], lp["ao_b"]
        vals[f"ln1_g{l}"], vals[f"ln1_b{l}"] = lp["ln1_g"], lp["ln1_b"]
        vals[f"i_w{l}"], vals[f"i_b{l}"] = lp["i_w"], lp["i_b"]
        vals[f"o_w{l}"], vals[f"o_b{l}"] = lp["o_w"], lp["o_b"]
        vals[f"ln2_g{l}"], vals[f"ln2_b{l}"] = lp["ln2_g"], lp["ln2_b"]

    cls1_w = jnp.asarray(params["cls1_w"], f32)
    vals["cls01_w"] = jnp.asarray(params["cls0_w"], f32) @ cls1_w
    vals["cls01_b"] = (jnp.asarray(params["cls0_b"], f32) @ cls1_w
                       + jnp.asarray(params["cls1_b"], f32))
    vals["cls_ln1_g"], vals["cls_ln1_b"] = params["cls_ln1_g"], params["cls_ln1_b"]
    vals["cls2_w"], vals["cls2_b"] = params["cls2_w"], params["cls2_b"]
    vals["cls_ln2_g"], vals["cls_ln2_b"] = params["cls_ln2_g"], params["cls_ln2_b"]
    # final layer zero-padded to 128 lanes so the kernel store is lane-dense
    w3 = jnp.zeros((HIDDEN_DIM // 2, LANE), f32).at[:, :NUM_CLASSES].set(
        jnp.asarray(params["cls3_w"], f32))
    b3 = jnp.zeros((LANE,), f32).at[:NUM_CLASSES].set(
        jnp.asarray(params["cls3_b"], f32))
    vals["cls3_w"], vals["cls3_b"] = w3, b3

    order, _, total_rows = _param_layout(m)
    blocks = []
    for name, rows, cols in order:
        a = jnp.asarray(vals[name], f32).reshape(rows, cols)
        blocks.append(jnp.pad(a, ((0, 0), (0, LANE - cols))))
    slab = jnp.concatenate(blocks, axis=0)
    assert slab.shape == (total_rows, LANE), slab.shape
    return slab


# =============================== model wiring ================================

def forward(param_slab, features, attention_mask, detection_features):
    """Per-call path: 3 reshapes + one grid-less pallas_call + one slice."""
    batch, seq, d_det = detection_features.shape
    m = batch * seq
    f32 = jnp.float32

    _, offsets, _ = _param_layout(m)            # static (trace-time) layout
    kernel = _make_kernel(m, offsets)

    img2d = features.reshape(m, -1).astype(f32)
    det2d = detection_features.reshape(m, d_det).astype(f32)
    mask2d = attention_mask.astype(f32).reshape(1, m)

    out = pl.pallas_call(
        kernel,
        out_shape=jax.ShapeDtypeStruct((m, LANE), f32),
        compiler_params=pltpu.CompilerParams(vmem_limit_bytes=8 * 1024 * 1024),
    )(img2d, det2d, mask2d, param_slab)
    return out[:, :NUM_CLASSES].reshape(batch, seq, NUM_CLASSES)


# ============================== parameter init ===============================

def init_params(key):
    keys = iter(jax.random.split(key, 128))

    def rnd(shape, scale=0.02):
        return jax.random.normal(next(keys), shape, jnp.float32) * scale

    p = {}
    # batch norms (weight=1, bias=0 like PyTorch default)
    # TODO(synk): training-mode batch statistics are used (as in the module's
    # default train() forward); eval-mode running stats are not modelled.
    p["det_bn_g"] = jnp.ones((DET_DIM,), jnp.float32)
    p["det_bn_b"] = jnp.zeros((DET_DIM,), jnp.float32)
    p["img_bn_g"] = jnp.ones((FEATURE_DIM,), jnp.float32)
    p["img_bn_b"] = jnp.zeros((FEATURE_DIM,), jnp.float32)
    # projections (weights stored (in, out))
    p["det_proj_w"] = rnd((DET_DIM, FEATURE_DIM));     p["det_proj_b"] = rnd((FEATURE_DIM,))
    p["proj_w"] = rnd((2 * FEATURE_DIM, BERT_DIM));    p["proj_b"] = rnd((BERT_DIM,))
    # BERT embeddings
    p["pos_emb"] = rnd((MAX_POS, BERT_DIM))
    p["tok_emb"] = rnd((2, BERT_DIM))
    p["emb_ln_g"] = jnp.ones((BERT_DIM,), jnp.float32)
    p["emb_ln_b"] = jnp.zeros((BERT_DIM,), jnp.float32)
    # encoder layers
    layers = []
    for _ in range(NUM_LAYERS):
        lp = {
            "q_w": rnd((BERT_DIM, BERT_DIM)),  "q_b": rnd((BERT_DIM,)),
            "k_w": rnd((BERT_DIM, BERT_DIM)),  "k_b": rnd((BERT_DIM,)),
            "v_w": rnd((BERT_DIM, BERT_DIM)),  "v_b": rnd((BERT_DIM,)),
            "ao_w": rnd((BERT_DIM, BERT_DIM)), "ao_b": rnd((BERT_DIM,)),
            "ln1_g": jnp.ones((BERT_DIM,), jnp.float32),
            "ln1_b": jnp.zeros((BERT_DIM,), jnp.float32),
            "i_w": rnd((BERT_DIM, INTER_DIM)), "i_b": rnd((INTER_DIM,)),
            "o_w": rnd((INTER_DIM, BERT_DIM)), "o_b": rnd((BERT_DIM,)),
            "ln2_g": jnp.ones((BERT_DIM,), jnp.float32),
            "ln2_b": jnp.zeros((BERT_DIM,), jnp.float32),
        }
        layers.append(lp)
    p["layers"] = layers
    # classifier
    c0 = (BERT_DIM + HIDDEN_DIM) // 2
    c2 = HIDDEN_DIM // 2
    p["cls0_w"] = rnd((BERT_DIM, c0));   p["cls0_b"] = rnd((c0,))
    p["cls1_w"] = rnd((c0, HIDDEN_DIM)); p["cls1_b"] = rnd((HIDDEN_DIM,))
    p["cls_ln1_g"] = jnp.ones((HIDDEN_DIM,), jnp.float32)
    p["cls_ln1_b"] = jnp.zeros((HIDDEN_DIM,), jnp.float32)
    p["cls2_w"] = rnd((HIDDEN_DIM, c2)); p["cls2_b"] = rnd((c2,))
    p["cls_ln2_g"] = jnp.ones((c2,), jnp.float32)
    p["cls_ln2_b"] = jnp.zeros((c2,), jnp.float32)
    p["cls3_w"] = rnd((c2, NUM_CLASSES)); p["cls3_b"] = rnd((NUM_CLASSES,))
    return p


# ==================================== main ===================================

if __name__ == "__main__":
    key = jax.random.PRNGKey(0)
    k_params, k_feat, k_det = jax.random.split(key, 3)

    B, S = 2, 8
    params = init_params(k_params)
    param_slab = pack_params(params, B, S)     # one-time packing (off the hot path)

    features = jax.random.normal(k_feat, (B, S, FEATURE_DIM), jnp.float32)
    detection_features = jax.random.normal(k_det, (B, S, DET_DIM), jnp.float32)
    attention_mask = jnp.ones((B, S), jnp.float32).at[1, 6:].set(0.0)

    fwd = jax.jit(forward)
    logits = jax.block_until_ready(
        fwd(param_slab, features, attention_mask, detection_features))

    assert logits.shape == (B, S, NUM_CLASSES), logits.shape
    assert bool(jnp.all(jnp.isfinite(logits)))
    print("KERNEL_OK")
</pallas_src>

<mosaic_0001>
module attributes {stable_mosaic.version = 11 : i64} {
  func.func @kernel(%arg0: memref<16x32xf32, #tpu.memory_space<vmem>>, %arg1: memref<16x8xf32, #tpu.memory_space<vmem>>, %arg2: memref<1x16xf32, #tpu.memory_space<vmem>>, %arg3: memref<654x128xf32, #tpu.memory_space<vmem>>, %arg4: memref<16x128xf32, #tpu.memory_space<vmem>>) attributes {dimension_semantics = [], scalar_prefetch = 0 : i64, scratch_operands = 0 : i64, tpu.core_type = #tpu.core_type<tc>} {
    %c0 = arith.constant 0 : index
    %c0_0 = arith.constant 0 : index
    %0 = vector.load %arg0[%c0, %c0_0] : memref<16x32xf32, #tpu.memory_space<vmem>>, vector<16x32xf32>
    %c0_1 = arith.constant 0 : index
    %c0_2 = arith.constant 0 : index
    %1 = vector.load %arg3[%c0_1, %c0_2] : memref<654x128xf32, #tpu.memory_space<vmem>>, vector<1x128xf32>
    %2 = vector.extract_strided_slice %1 {offsets = [0, 0], sizes = [1, 32], strides = [1, 1]} : vector<1x128xf32> to vector<1x32xf32>
    %c1 = arith.constant 1 : index
    %c0_3 = arith.constant 0 : index
    %3 = vector.load %arg3[%c1, %c0_3] : memref<654x128xf32, #tpu.memory_space<vmem>>, vector<1x128xf32>
    %4 = vector.extract_strided_slice %3 {offsets = [0, 0], sizes = [1, 32], strides = [1, 1]} : vector<1x128xf32> to vector<1x32xf32>
    %cst = arith.constant dense<0.000000e+00> : vector<32xf32>
    %5 = vector.multi_reduction <add>, %0, %cst [0] : vector<16x32xf32> to vector<32xf32>
    %6 = vector.shape_cast %5 : vector<32xf32> to vector<1x32xf32>
    %cst_4 = arith.constant 1.600000e+01 : f32
    %7 = vector.broadcast %cst_4 : f32 to vector<1x32xf32>
    %8 = arith.divf %6, %7 : vector<1x32xf32>
    %9 = vector.broadcast %8 : vector<1x32xf32> to vector<16x32xf32>
    %10 = arith.subf %0, %9 : vector<16x32xf32>
    %11 = arith.mulf %10, %10 : vector<16x32xf32>
    %cst_5 = arith.constant dense<0.000000e+00> : vector<32xf32>
    %12 = vector.multi_reduction <add>, %11, %cst_5 [0] : vector<16x32xf32> to vector<32xf32>
    %13 = vector.shape_cast %12 : vector<32xf32> to vector<1x32xf32>
    %cst_6 = arith.constant 1.600000e+01 : f32
    %14 = vector.broadcast %cst_6 : f32 to vector<1x32xf32>
    %15 = arith.divf %13, %14 : vector<1x32xf32>
    %16 = vector.broadcast %8 : vector<1x32xf32> to vector<16x32xf32>
    %17 = arith.subf %0, %16 : vector<16x32xf32>
    %cst_7 = arith.constant 9.99999974E-6 : f32
    %18 = vector.broadcast %cst_7 : f32 to vector<1x32xf32>
    %19 = arith.addf %15, %18 : vector<1x32xf32>
    %20 = math.rsqrt %19 : vector<1x32xf32>
    %21 = vector.broadcast %20 : vector<1x32xf32> to vector<16x32xf32>
    %22 = arith.mulf %17, %21 : vector<16x32xf32>
    %23 = vector.broadcast %2 : vector<1x32xf32> to vector<16x32xf32>
    %24 = arith.mulf %22, %23 : vector<16x32xf32>
    %25 = vector.broadcast %4 : vector<1x32xf32> to vector<16x32xf32>
    %26 = arith.addf %24, %25 : vector<16x32xf32>
    %c0_8 = arith.constant 0 : index
    %c0_9 = arith.constant 0 : index
    %27 = vector.load %arg1[%c0_8, %c0_9] : memref<16x8xf32, #tpu.memory_space<vmem>>, vector<16x8xf32>
    %c2 = arith.constant 2 : index
    %c0_10 = arith.constant 0 : index
    %28 = vector.load %arg3[%c2, %c0_10] : memref<654x128xf32, #tpu.memory_space<vmem>>, vector<1x128xf32>
    %29 = vector.extract_strided_slice %28 {offsets = [0, 0], sizes = [1, 8], strides = [1, 1]} : vector<1x128xf32> to vector<1x8xf32>
    %c3 = arith.constant 3 : index
    %c0_11 = arith.constant 0 : index
    %30 = vector.load %arg3[%c3, %c0_11] : memref<654x128xf32, #tpu.memory_space<vmem>>, vector<1x128xf32>
    %31 = vector.extract_strided_slice %30 {offsets = [0, 0], sizes = [1, 8], strides = [1, 1]} : vector<1x128xf32> to vector<1x8xf32>
    %cst_12 = arith.constant dense<0.000000e+00> : vector<8xf32>
    %32 = vector.multi_reduction <add>, %27, %cst_12 [0] : vector<16x8xf32> to vector<8xf32>
    %33 = vector.shape_cast %32 : vector<8xf32> to vector<1x8xf32>
    %cst_13 = arith.constant 1.600000e+01 : f32
    %34 = vector.broadcast %cst_13 : f32 to vector<1x8xf32>
    %35 = arith.divf %33, %34 : vector<1x8xf32>
    %36 = vector.broadcast %35 : vector<1x8xf32> to vector<16x8xf32>
    %37 = arith.subf %27, %36 : vector<16x8xf32>
    %38 = arith.mulf %37, %37 : vector<16x8xf32>
    %cst_14 = arith.constant dense<0.000000e+00> : vector<8xf32>
    %39 = vector.multi_reduction <add>, %38, %cst_14 [0] : vector<16x8xf32> to vector<8xf32>
    %40 = vector.shape_cast %39 : vector<8xf32> to vector<1x8xf32>
    %cst_15 = arith.constant 1.600000e+01 : f32
    %41 = vector.broadcast %cst_15 : f32 to vector<1x8xf32>
    %42 = arith.divf %40, %41 : vector<1x8xf32>
    %43 = vector.broadcast %35 : vector<1x8xf32> to vector<16x8xf32>
    %44 = arith.subf %27, %43 : vector<16x8xf32>
    %cst_16 = arith.constant 9.99999974E-6 : f32
    %45 = vector.broadcast %cst_16 : f32 to vector<1x8xf32>
    %46 = arith.addf %42, %45 : vector<1x8xf32>
    %47 = math.rsqrt %46 : vector<1x8xf32>
    %48 = vector.broadcast %47 : vector<1x8xf32> to vector<16x8xf32>
    %49 = arith.mulf %44, %48 : vector<16x8xf32>
    %50 = vector.broadcast %29 : vector<1x8xf32> to vector<16x8xf32>
    %51 = arith.mulf %49, %50 : vector<16x8xf32>
    %52 = vector.broadcast %31 : vector<1x8xf32> to vector<16x8xf32>
    %53 = arith.addf %51, %52 : vector<16x8xf32>
    %c4 = arith.constant 4 : index
    %c0_17 = arith.constant 0 : index
    %54 = vector.load %arg3[%c4, %c0_17] : memref<654x128xf32, #tpu.memory_space<vmem>>, vector<32x128xf32>
    %55 = vector.extract_strided_slice %54 {offsets = [0, 0], sizes = [32, 32], strides = [1, 1]} : vector<32x128xf32> to vector<32x32xf32>
    %cst_18 = arith.constant dense<0.000000e+00> : vector<16x32xf32>
    %56 = tpu.matmul %26, %55, %cst_18 {dimension_numbers = #tpu.dot_dimension_numbers<[1], [0], [0], [1], [0, 0, 1, 1], [], []>} : vector<16x32xf32>, vector<32x32xf32>, vector<16x32xf32> -> vector<16x32xf32>
    %c36 = arith.constant 36 : index
    %c0_19 = arith.constant 0 : index
    %57 = vector.load %arg3[%c36, %c0_19] : memref<654x128xf32, #tpu.memory_space<vmem>>, vector<8x128xf32>
    %58 = vector.extract_strided_slice %57 {offsets = [0, 0], sizes = [8, 32], strides = [1, 1]} : vector<8x128xf32> to vector<8x32xf32>
    %cst_20 = arith.constant dense<0.000000e+00> : vector<16x32xf32>
    %59 = tpu.matmul %53, %58, %cst_20 {dimension_numbers = #tpu.dot_dimension_numbers<[1], [0], [0], [1], [0, 0, 1, 1], [], []>} : vector<16x8xf32>, vector<8x32xf32>, vector<16x32xf32> -> vector<16x32xf32>
    %60 = arith.addf %56, %59 : vector<16x32xf32>
    %c44 = arith.constant 44 : index
    %c0_21 = arith.constant 0 : index
    %61 = vector.load %arg3[%c44, %c0_21] : memref<654x128xf32, #tpu.memory_space<vmem>>, vector<1x128xf32>
    %62 = vector.extract_strided_slice %61 {offsets = [0, 0], sizes = [1, 32], strides = [1, 1]} : vector<1x128xf32> to vector<1x32xf32>
    %63 = vector.broadcast %62 : vector<1x32xf32> to vector<16x32xf32>
    %64 = arith.addf %60, %63 : vector<16x32xf32>
    %c45 = arith.constant 45 : index
    %c0_22 = arith.constant 0 : index
    %65 = vector.load %arg3[%c45, %c0_22] : memref<654x128xf32, #tpu.memory_space<vmem>>, vector<16x128xf32>
    %66 = vector.extract_strided_slice %65 {offsets = [0, 0], sizes = [16, 32], strides = [1, 1]} : vector<16x128xf32> to vector<16x32xf32>
    %67 = arith.addf %64, %66 : vector<16x32xf32>
    %c61 = arith.constant 61 : index
    %c0_23 = arith.constant 0 : index
    %68 = vector.load %arg3[%c61, %c0_23] : memref<654x128xf32, #tpu.memory_space<vmem>>, vector<1x128xf32>
    %69 = vector.extract_strided_slice %68 {offsets = [0, 0], sizes = [1, 32], strides = [1, 1]} : vector<1x128xf32> to vector<1x32xf32>
    %c62 = arith.constant 62 : index
    %c0_24 = arith.constant 0 : index
    %70 = vector.load %arg3[%c62, %c0_24] : memref<654x128xf32, #tpu.memory_space<vmem>>, vector<1x128xf32>
    %71 = vector.extract_strided_slice %70 {offsets = [0, 0], sizes = [1, 32], strides = [1, 1]} : vector<1x128xf32> to vector<1x32xf32>
    %cst_25 = arith.constant dense<0.000000e+00> : vector<16xf32>
    %72 = vector.multi_reduction <add>, %67, %cst_25 [1] : vector<16x32xf32> to vector<16xf32>
    %73 = vector.shape_cast %72 : vector<16xf32> to vector<16x1xf32>
    %cst_26 = arith.constant 3.200000e+01 : f32
    %74 = vector.broadcast %cst_26 : f32 to vector<16x1xf32>
    %75 = arith.divf %73, %74 : vector<16x1xf32>
    %76 = vector.broadcast %75 : vector<16x1xf32> to vector<16x32xf32>
    %77 = arith.subf %67, %76 : vector<16x32xf32>
    %78 = arith.mulf %77, %77 : vector<16x32xf32>
    %cst_27 = arith.constant dense<0.000000e+00> : vector<16xf32>
    %79 = vector.multi_reduction <add>, %78, %cst_27 [1] : vector<16x32xf32> to vector<16xf32>
    %80 = vector.shape_cast %79 : vector<16xf32> to vector<16x1xf32>
    %cst_28 = arith.constant 3.200000e+01 : f32
    %81 = vector.broadcast %cst_28 : f32 to vector<16x1xf32>
    %82 = arith.divf %80, %81 : vector<16x1xf32>
    %83 = vector.broadcast %75 : vector<16x1xf32> to vector<16x32xf32>
    %84 = arith.subf %67, %83 : vector<16x32xf32>
    %cst_29 = arith.constant 9.99999996E-13 : f32
    %85 = vector.broadcast %cst_29 : f32 to vector<16x1xf32>
    %86 = arith.addf %82, %85 : vector<16x1xf32>
    %87 = math.rsqrt %86 : vector<16x1xf32>
    %88 = vector.broadcast %87 : vector<16x1xf32> to vector<16x32xf32>
    %89 = arith.mulf %84, %88 : vector<16x32xf32>
    %90 = vector.broadcast %69 : vector<1x32xf32> to vector<16x32xf32>
    %91 = arith.mulf %89, %90 : vector<16x32xf32>
    %92 = vector.broadcast %71 : vector<1x32xf32> to vector<16x32xf32>
    %93 = arith.addf %91, %92 : vector<16x32xf32>
    %c0_30 = arith.constant 0 : index
    %c0_31 = arith.constant 0 : index
    %94 = vector.load %arg2[%c0_30, %c0_31] : memref<1x16xf32, #tpu.memory_space<vmem>>, vector<1x16xf32>
    %95 = tpu.concatenate %94, %94, %94, %94 in 1 : vector<1x16xf32>, vector<1x16xf32>, vector<1x16xf32>, vector<1x16xf32> -> vector<1x64xf32>
    %cst_32 = arith.constant 5.000000e-01 : f32
    %96 = vector.broadcast %cst_32 : f32 to vector<1x64xf32>
    %97 = arith.cmpf ogt, %95, %96 : vector<1x64xf32>
    %c63 = arith.constant 63 : index
    %c0_33 = arith.constant 0 : index
    %98 = vector.load %arg3[%c63, %c0_33] : memref<654x128xf32, #tpu.memory_space<vmem>>, vector<64x128xf32>
    %99 = vector.extract_strided_slice %98 {offsets = [0, 0], sizes = [64, 64], strides = [1, 1]} : vector<64x128xf32> to vector<64x64xf32>
    %cst_34 = arith.constant -3.40282347E+38 : f32
    %100 = vector.shape_cast %97 : vector<1x64xi1> to vector<1x64xi1>
    %101 = vector.broadcast %100 : vector<1x64xi1> to vector<64x64xi1>
    %102 = vector.broadcast %cst_34 : f32 to vector<64x64xf32>
    %103 = arith.select %101, %99, %102 : vector<64x64xi1>, vector<64x64xf32>
    %c127 = arith.constant 127 : index
    %c0_35 = arith.constant 0 : index
    %104 = vector.load %arg3[%c127, %c0_35] : memref<654x128xf32, #tpu.memory_space<vmem>>, vector<32x128xf32>
    %105 = vector.extract_strided_slice %104 {offsets = [0, 0], sizes = [32, 96], strides = [1, 1]} : vector<32x128xf32> to vector<32x96xf32>
    %cst_36 = arith.constant dense<0.000000e+00> : vector<16x96xf32>
    %106 = tpu.matmul %93, %105, %cst_36 {dimension_numbers = #tpu.dot_dimension_numbers<[1], [0], [0], [1], [0, 0, 1, 1], [], []>} : vector<16x32xf32>, vector<32x96xf32>, vector<16x96xf32> -> vector<16x96xf32>
    %c159 = arith.constant 159 : index
    %c0_37 = arith.constant 0 : index
    %107 = vector.load %arg3[%c159, %c0_37] : memref<654x128xf32, #tpu.memory_space<vmem>>, vector<1x128xf32>
    %108 = vector.extract_strided_slice %107 {offsets = [0, 0], sizes = [1, 96], strides = [1, 1]} : vector<1x128xf32> to vector<1x96xf32>
    %109 = vector.broadcast %108 : vector<1x96xf32> to vector<16x96xf32>
    %110 = arith.addf %106, %109 : vector<16x96xf32>
    %111 = vector.extract_strided_slice %110 {offsets = [0, 0], sizes = [16, 8], strides = [1, 1]} : vector<16x96xf32> to vector<16x8xf32>
    %112 = vector.extract_strided_slice %110 {offsets = [0, 8], sizes = [16, 8], strides = [1, 1]} : vector<16x96xf32> to vector<16x8xf32>
    %113 = vector.extract_strided_slice %110 {offsets = [0, 16], sizes = [16, 8], strides = [1, 1]} : vector<16x96xf32> to vector<16x8xf32>
    %114 = vector.extract_strided_slice %110 {offsets = [0, 24], sizes = [16, 8], strides = [1, 1]} : vector<16x96xf32> to vector<16x8xf32>
    %115 = tpu.concatenate %111, %112, %113, %114 in 0 : vector<16x8xf32>, vector<16x8xf32>, vector<16x8xf32>, vector<16x8xf32> -> vector<64x8xf32>
    %116 = vector.extract_strided_slice %110 {offsets = [0, 32], sizes = [16, 8], strides = [1, 1]} : vector<16x96xf32> to vector<16x8xf32>
    %117 = vector.extract_strided_slice %110 {offsets = [0, 40], sizes = [16, 8], strides = [1, 1]} : vector<16x96xf32> to vector<16x8xf32>
    %118 = vector.extract_strided_slice %110 {offsets = [0, 48], sizes = [16, 8], strides = [1, 1]} : vector<16x96xf32> to vector<16x8xf32>
    %119 = vector.extract_strided_slice %110 {offsets = [0, 56], sizes = [16, 8], strides = [1, 1]} : vector<16x96xf32> to vector<16x8xf32>
    %120 = tpu.concatenate %116, %117, %118, %119 in 0 : vector<16x8xf32>, vector<16x8xf32>, vector<16x8xf32>, vector<16x8xf32> -> vector<64x8xf32>
    %121 = vector.extract_strided_slice %110 {offsets = [0, 64], sizes = [16, 8], strides = [1, 1]} : vector<16x96xf32> to vector<16x8xf32>
    %122 = vector.extract_strided_slice %110 {offsets = [0, 72], sizes = [16, 8], strides = [1, 1]} : vector<16x96xf32> to vector<16x8xf32>
    %123 = vector.extract_strided_slice %110 {offsets = [0, 80], sizes = [16, 8], strides = [1, 1]} : vector<16x96xf32> to vector<16x8xf32>
    %124 = vector.extract_strided_slice %110 {offsets = [0, 88], sizes = [16, 8], strides = [1, 1]} : vector<16x96xf32> to vector<16x8xf32>
    %125 = tpu.concatenate %121, %122, %123, %124 in 0 : vector<16x8xf32>, vector<16x8xf32>, vector<16x8xf32>, vector<16x8xf32> -> vector<64x8xf32>
    %cst_38 = arith.constant dense<0.000000e+00> : vector<64x64xf32>
    %126 = tpu.matmul %115, %120, %cst_38 {dimension_numbers = #tpu.dot_dimension_numbers<[1], [1], [0], [0], [0, 0, 1, 0], [], []>} : vector<64x8xf32>, vector<64x8xf32>, vector<64x64xf32> -> vector<64x64xf32>
    %cst_39 = arith.constant 0.353553385 : f32
    %127 = vector.broadcast %cst_39 : f32 to vector<64x64xf32>
    %128 = arith.mulf %126, %127 : vector<64x64xf32>
    %129 = arith.addf %128, %103 : vector<64x64xf32>
    %cst_40 = arith.constant dense<0xFF800000> : vector<64xf32>
    %130 = vector.multi_reduction <maximumf>, %129, %cst_40 [1] : vector<64x64xf32> to vector<64xf32>
    %131 = vector.shape_cast %130 : vector<64xf32> to vector<64x1xf32>
    %132 = vector.broadcast %131 : vector<64x1xf32> to vector<64x64xf32>
    %133 = arith.subf %129, %132 : vector<64x64xf32>
    %134 = math.exp %133 : vector<64x64xf32>
    %cst_41 = arith.constant dense<0.000000e+00> : vector<64xf32>
    %135 = vector.multi_reduction <add>, %134, %cst_41 [1] : vector<64x64xf32> to vector<64xf32>
    %136 = vector.shape_cast %135 : vector<64xf32> to vector<64x1xf32>
    %137 = vector.broadcast %136 : vector<64x1xf32> to vector<64x64xf32>
    %138 = arith.divf %134, %137 : vector<64x64xf32>
    %cst_42 = arith.constant dense<0.000000e+00> : vector<64x8xf32>
    %139 = tpu.matmul %138, %125, %cst_42 {dimension_numbers = #tpu.dot_dimension_numbers<[1], [0], [0], [1], [0, 0, 1, 1], [], []>} : vector<64x64xf32>, vector<64x8xf32>, vector<64x8xf32> -> vector<64x8xf32>
    %140 = vector.extract_strided_slice %139 {offsets = [0, 0], sizes = [16, 8], strides = [1, 1]} : vector<64x8xf32> to vector<16x8xf32>
    %141 = vector.extract_strided_slice %139 {offsets = [16, 0], sizes = [16, 8], strides = [1, 1]} : vector<64x8xf32> to vector<16x8xf32>
    %142 = vector.extract_strided_slice %139 {offsets = [32, 0], sizes = [16, 8], strides = [1, 1]} : vector<64x8xf32> to vector<16x8xf32>
    %143 = vector.extract_strided_slice %139 {offsets = [48, 0], sizes = [16, 8], strides = [1, 1]} : vector<64x8xf32> to vector<16x8xf32>
    %144 = tpu.concatenate %140, %141, %142, %143 in 1 : vector<16x8xf32>, vector<16x8xf32>, vector<16x8xf32>, vector<16x8xf32> -> vector<16x32xf32>
    %c160 = arith.constant 160 : index
    %c0_43 = arith.constant 0 : index
    %145 = vector.load %arg3[%c160, %c0_43] : memref<654x128xf32, #tpu.memory_space<vmem>>, vector<32x128xf32>
    %146 = vector.extract_strided_slice %145 {offsets = [0, 0], sizes = [32, 32], strides = [1, 1]} : vector<32x128xf32> to vector<32x32xf32>
    %cst_44 = arith.constant dense<0.000000e+00> : vector<16x32xf32>
    %147 = tpu.matmul %144, %146, %cst_44 {dimension_numbers = #tpu.dot_dimension_numbers<[1], [0], [0], [1], [0, 0, 1, 1], [], []>} : vector<16x32xf32>, vector<32x32xf32>, vector<16x32xf32> -> vector<16x32xf32>
    %c192 = arith.constant 192 : index
    %c0_45 = arith.constant 0 : index
    %148 = vector.load %arg3[%c192, %c0_45] : memref<654x128xf32, #tpu.memory_space<vmem>>, vector<1x128xf32>
    %149 = vector.extract_strided_slice %148 {offsets = [0, 0], sizes = [1, 32], strides = [1, 1]} : vector<1x128xf32> to vector<1x32xf32>
    %150 = vector.broadcast %149 : vector<1x32xf32> to vector<16x32xf32>
    %151 = arith.addf %147, %150 : vector<16x32xf32>
    %152 = arith.addf %151, %93 : vector<16x32xf32>
    %c193 = arith.constant 193 : index
    %c0_46 = arith.constant 0 : index
    %153 = vector.load %arg3[%c193, %c0_46] : memref<654x128xf32, #tpu.memory_space<vmem>>, vector<1x128xf32>
    %154 = vector.extract_strided_slice %153 {offsets = [0, 0], sizes = [1, 32], strides = [1, 1]} : vector<1x128xf32> to vector<1x32xf32>
    %c194 = arith.constant 194 : index
    %c0_47 = arith.constant 0 : index
    %155 = vector.load %arg3[%c194, %c0_47] : memref<654x128xf32, #tpu.memory_space<vmem>>, vector<1x128xf32>
    %156 = vector.extract_strided_slice %155 {offsets = [0, 0], sizes = [1, 32], strides = [1, 1]} : vector<1x128xf32> to vector<1x32xf32>
    %cst_48 = arith.constant dense<0.000000e+00> : vector<16xf32>
    %157 = vector.multi_reduction <add>, %152, %cst_48 [1] : vector<16x32xf32> to vector<16xf32>
    %158 = vector.shape_cast %157 : vector<16xf32> to vector<16x1xf32>
    %cst_49 = arith.constant 3.200000e+01 : f32
    %159 = vector.broadcast %cst_49 : f32 to vector<16x1xf32>
    %160 = arith.divf %158, %159 : vector<16x1xf32>
    %161 = vector.broadcast %160 : vector<16x1xf32> to vector<16x32xf32>
    %162 = arith.subf %152, %161 : vector<16x32xf32>
    %163 = arith.mulf %162, %162 : vector<16x32xf32>
    %cst_50 = arith.constant dense<0.000000e+00> : vector<16xf32>
    %164 = vector.multi_reduction <add>, %163, %cst_50 [1] : vector<16x32xf32> to vector<16xf32>
    %165 = vector.shape_cast %164 : vector<16xf32> to vector<16x1xf32>
    %cst_51 = arith.constant 3.200000e+01 : f32
    %166 = vector.broadcast %cst_51 : f32 to vector<16x1xf32>
    %167 = arith.divf %165, %166 : vector<16x1xf32>
    %168 = vector.broadcast %160 : vector<16x1xf32> to vector<16x32xf32>
    %169 = arith.subf %152, %168 : vector<16x32xf32>
    %cst_52 = arith.constant 9.99999996E-13 : f32
    %170 = vector.broadcast %cst_52 : f32 to vector<16x1xf32>
    %171 = arith.addf %167, %170 : vector<16x1xf32>
    %172 = math.rsqrt %171 : vector<16x1xf32>
    %173 = vector.broadcast %172 : vector<16x1xf32> to vector<16x32xf32>
    %174 = arith.mulf %169, %173 : vector<16x32xf32>
    %175 = vector.broadcast %154 : vector<1x32xf32> to vector<16x32xf32>
    %176 = arith.mulf %174, %175 : vector<16x32xf32>
    %177 = vector.broadcast %156 : vector<1x32xf32> to vector<16x32xf32>
    %178 = arith.addf %176, %177 : vector<16x32xf32>
    %c195 = arith.constant 195 : index
    %c0_53 = arith.constant 0 : index
    %179 = vector.load %arg3[%c195, %c0_53] : memref<654x128xf32, #tpu.memory_space<vmem>>, vector<32x128xf32>
    %cst_54 = arith.constant dense<0.000000e+00> : vector<16x128xf32>
    %180 = tpu.matmul %178, %179, %cst_54 {dimension_numbers = #tpu.dot_dimension_numbers<[1], [0], [0], [1], [0, 0, 1, 1], [], []>} : vector<16x32xf32>, vector<32x128xf32>, vector<16x128xf32> -> vector<16x128xf32>
    %c227 = arith.constant 227 : index
    %c0_55 = arith.constant 0 : index
    %181 = vector.load %arg3[%c227, %c0_55] : memref<654x128xf32, #tpu.memory_space<vmem>>, vector<1x128xf32>
    %182 = vector.broadcast %181 : vector<1x128xf32> to vector<16x128xf32>
    %183 = arith.addf %180, %182 : vector<16x128xf32>
    %cst_56 = arith.constant 5.000000e-01 : f32
    %184 = vector.broadcast %cst_56 : f32 to vector<16x128xf32>
    %185 = arith.mulf %184, %183 : vector<16x128xf32>
    %cst_57 = arith.constant 0.707106769 : f32
    %186 = vector.broadcast %cst_57 : f32 to vector<16x128xf32>
    %187 = arith.mulf %183, %186 : vector<16x128xf32>
    %cst_58 = arith.constant 0.000000e+00 : f32
    %188 = vector.broadcast %cst_58 : f32 to vector<16x128xf32>
    %189 = arith.cmpf oge, %187, %188 : vector<16x128xf32>
    %cst_59 = arith.constant 1.000000e+00 : f32
    %cst_60 = arith.constant -1.000000e+00 : f32
    %190 = vector.broadcast %cst_59 : f32 to vector<16x128xf32>
    %191 = vector.broadcast %cst_60 : f32 to vector<16x128xf32>
    %192 = arith.select %189, %190, %191 : vector<16x128xi1>, vector<16x128xf32>
    %193 = math.absf %187 : vector<16x128xf32>
    %cst_61 = arith.constant 0.327591091 : f32
    %194 = vector.broadcast %cst_61 : f32 to vector<16x128xf32>
    %195 = arith.mulf %194, %193 : vector<16x128xf32>
    %cst_62 = arith.constant 1.000000e+00 : f32
    %196 = vector.broadcast %cst_62 : f32 to vector<16x128xf32>
    %197 = arith.addf %196, %195 : vector<16x128xf32>
    %cst_63 = arith.constant 1.000000e+00 : f32
    %198 = vector.broadcast %cst_63 : f32 to vector<16x128xf32>
    %199 = arith.divf %198, %197 : vector<16x128xf32>
    %cst_64 = arith.constant 1.06140542 : f32
    %200 = vector.broadcast %cst_64 : f32 to vector<16x128xf32>
    %201 = arith.mulf %200, %199 : vector<16x128xf32>
    %cst_65 = arith.constant -1.45315206 : f32
    %202 = vector.broadcast %cst_65 : f32 to vector<16x128xf32>
    %203 = arith.addf %201, %202 : vector<16x128xf32>
    %204 = arith.mulf %203, %199 : vector<16x128xf32>
    %cst_66 = arith.constant 1.42141378 : f32
    %205 = vector.broadcast %cst_66 : f32 to vector<16x128xf32>
    %206 = arith.addf %204, %205 : vector<16x128xf32>
    %207 = arith.mulf %206, %199 : vector<16x128xf32>
    %cst_67 = arith.constant -0.284496725 : f32
    %208 = vector.broadcast %cst_67 : f32 to vector<16x128xf32>
    %209 = arith.addf %207, %208 : vector<16x128xf32>
    %210 = arith.mulf %209, %199 : vector<16x128xf32>
    %cst_68 = arith.constant 0.254829586 : f32
    %211 = vector.broadcast %cst_68 : f32 to vector<16x128xf32>
    %212 = arith.addf %210, %211 : vector<16x128xf32>
    %213 = arith.mulf %212, %199 : vector<16x128xf32>
    %cst_69 = arith.constant 0.000000e+00 : f32
    %214 = vector.broadcast %cst_69 : f32 to vector<16x128xf32>
    %215 = arith.subf %214, %193 : vector<16x128xf32>
    %216 = arith.mulf %215, %193 : vector<16x128xf32>
    %217 = math.exp %216 : vector<16x128xf32>
    %218 = arith.mulf %213, %217 : vector<16x128xf32>
    %cst_70 = arith.constant 1.000000e+00 : f32
    %219 = vector.broadcast %cst_70 : f32 to vector<16x128xf32>
    %220 = arith.subf %219, %218 : vector<16x128xf32>
    %221 = arith.mulf %192, %220 : vector<16x128xf32>
    %cst_71 = arith.constant 1.000000e+00 : f32
    %222 = vector.broadcast %cst_71 : f32 to vector<16x128xf32>
    %223 = arith.addf %222, %221 : vector<16x128xf32>
    %224 = arith.mulf %185, %223 : vector<16x128xf32>
    %c228 = arith.constant 228 : index
    %c0_72 = arith.constant 0 : index
    %225 = vector.load %arg3[%c228, %c0_72] : memref<654x128xf32, #tpu.memory_space<vmem>>, vector<128x128xf32>
    %226 = vector.extract_strided_slice %225 {offsets = [0, 0], sizes = [128, 32], strides = [1, 1]} : vector<128x128xf32> to vector<128x32xf32>
    %cst_73 = arith.constant dense<0.000000e+00> : vector<16x32xf32>
    %227 = tpu.matmul %224, %226, %cst_73 {dimension_numbers = #tpu.dot_dimension_numbers<[1], [0], [0], [1], [0, 0, 1, 1], [], []>} : vector<16x128xf32>, vector<128x32xf32>, vector<16x32xf32> -> vector<16x32xf32>
    %c356 = arith.constant 356 : index
    %c0_74 = arith.constant 0 : index
    %228 = vector.load %arg3[%c356, %c0_74] : memref<654x128xf32, #tpu.memory_space<vmem>>, vector<1x128xf32>
    %229 = vector.extract_strided_slice %228 {offsets = [0, 0], sizes = [1, 32], strides = [1, 1]} : vector<1x128xf32> to vector<1x32xf32>
    %230 = vector.broadcast %229 : vector<1x32xf32> to vector<16x32xf32>
    %231 = arith.addf %227, %230 : vector<16x32xf32>
    %232 = arith.addf %231, %178 : vector<16x32xf32>
    %c357 = arith.constant 357 : index
    %c0_75 = arith.constant 0 : index
    %233 = vector.load %arg3[%c357, %c0_75] : memref<654x128xf32, #tpu.memory_space<vmem>>, vector<1x128xf32>
    %234 = vector.extract_strided_slice %233 {offsets = [0, 0], sizes = [1, 32], strides = [1, 1]} : vector<1x128xf32> to vector<1x32xf32>
    %c358 = arith.constant 358 : index
    %c0_76 = arith.constant 0 : index
    %235 = vector.load %arg3[%c358, %c0_76] : memref<654x128xf32, #tpu.memory_space<vmem>>, vector<1x128xf32>
    %236 = vector.extract_strided_slice %235 {offsets = [0, 0], sizes = [1, 32], strides = [1, 1]} : vector<1x128xf32> to vector<1x32xf32>
    %cst_77 = arith.constant dense<0.000000e+00> : vector<16xf32>
    %237 = vector.multi_reduction <add>, %232, %cst_77 [1] : vector<16x32xf32> to vector<16xf32>
    %238 = vector.shape_cast %237 : vector<16xf32> to vector<16x1xf32>
    %cst_78 = arith.constant 3.200000e+01 : f32
    %239 = vector.broadcast %cst_78 : f32 to vector<16x1xf32>
    %240 = arith.divf %238, %239 : vector<16x1xf32>
    %241 = vector.broadcast %240 : vector<16x1xf32> to vector<16x32xf32>
    %242 = arith.subf %232, %241 : vector<16x32xf32>
    %243 = arith.mulf %242, %242 : vector<16x32xf32>
    %cst_79 = arith.constant dense<0.000000e+00> : vector<16xf32>
    %244 = vector.multi_reduction <add>, %243, %cst_79 [1] : vector<16x32xf32> to vector<16xf32>
    %245 = vector.shape_cast %244 : vector<16xf32> to vector<16x1xf32>
    %cst_80 = arith.constant 3.200000e+01 : f32
    %246 = vector.broadcast %cst_80 : f32 to vector<16x1xf32>
    %247 = arith.divf %245, %246 : vector<16x1xf32>
    %248 = vector.broadcast %240 : vector<16x1xf32> to vector<16x32xf32>
    %249 = arith.subf %232, %248 : vector<16x32xf32>
    %cst_81 = arith.constant 9.99999996E-13 : f32
    %250 = vector.broadcast %cst_81 : f32 to vector<16x1xf32>
    %251 = arith.addf %247, %250 : vector<16x1xf32>
    %252 = math.rsqrt %251 : vector<16x1xf32>
    %253 = vector.broadcast %252 : vector<16x1xf32> to vector<16x32xf32>
    %254 = arith.mulf %249, %253 : vector<16x32xf32>
    %255 = vector.broadcast %234 : vector<1x32xf32> to vector<16x32xf32>
    %256 = arith.mulf %254, %255 : vector<16x32xf32>
    %257 = vector.broadcast %236 : vector<1x32xf32> to vector<16x32xf32>
    %258 = arith.addf %256, %257 : vector<16x32xf32>
    %c359 = arith.constant 359 : index
    %c0_82 = arith.constant 0 : index
    %259 = vector.load %arg3[%c359, %c0_82] : memref<654x128xf32, #tpu.memory_space<vmem>>, vector<32x128xf32>
    %260 = vector.extract_strided_slice %259 {offsets = [0, 0], sizes = [32, 96], strides = [1, 1]} : vector<32x128xf32> to vector<32x96xf32>
    %cst_83 = arith.constant dense<0.000000e+00> : vector<16x96xf32>
    %261 = tpu.matmul %258, %260, %cst_83 {dimension_numbers = #tpu.dot_dimension_numbers<[1], [0], [0], [1], [0, 0, 1, 1], [], []>} : vector<16x32xf32>, vector<32x96xf32>, vector<16x96xf32> -> vector<16x96xf32>
    %c391 = arith.constant 391 : index
    %c0_84 = arith.constant 0 : index
    %262 = vector.load %arg3[%c391, %c0_84] : memref<654x128xf32, #tpu.memory_space<vmem>>, vector<1x128xf32>
    %263 = vector.extract_strided_slice %262 {offsets = [0, 0], sizes = [1, 96], strides = [1, 1]} : vector<1x128xf32> to vector<1x96xf32>
    %264 = vector.broadcast %263 : vector<1x96xf32> to vector<16x96xf32>
    %265 = arith.addf %261, %264 : vector<16x96xf32>
    %266 = vector.extract_strided_slice %265 {offsets = [0, 0], sizes = [16, 8], strides = [1, 1]} : vector<16x96xf32> to vector<16x8xf32>
    %267 = vector.extract_strided_slice %265 {offsets = [0, 8], sizes = [16, 8], strides = [1, 1]} : vector<16x96xf32> to vector<16x8xf32>
    %268 = vector.extract_strided_slice %265 {offsets = [0, 16], sizes = [16, 8], strides = [1, 1]} : vector<16x96xf32> to vector<16x8xf32>
    %269 = vector.extract_strided_slice %265 {offsets = [0, 24], sizes = [16, 8], strides = [1, 1]} : vector<16x96xf32> to vector<16x8xf32>
    %270 = tpu.concatenate %266, %267, %268, %269 in 0 : vector<16x8xf32>, vector<16x8xf32>, vector<16x8xf32>, vector<16x8xf32> -> vector<64x8xf32>
    %271 = vector.extract_strided_slice %265 {offsets = [0, 32], sizes = [16, 8], strides = [1, 1]} : vector<16x96xf32> to vector<16x8xf32>
    %272 = vector.extract_strided_slice %265 {offsets = [0, 40], sizes = [16, 8], strides = [1, 1]} : vector<16x96xf32> to vector<16x8xf32>
    %273 = vector.extract_strided_slice %265 {offsets = [0, 48], sizes = [16, 8], strides = [1, 1]} : vector<16x96xf32> to vector<16x8xf32>
    %274 = vector.extract_strided_slice %265 {offsets = [0, 56], sizes = [16, 8], strides = [1, 1]} : vector<16x96xf32> to vector<16x8xf32>
    %275 = tpu.concatenate %271, %272, %273, %274 in 0 : vector<16x8xf32>, vector<16x8xf32>, vector<16x8xf32>, vector<16x8xf32> -> vector<64x8xf32>
    %276 = vector.extract_strided_slice %265 {offsets = [0, 64], sizes = [16, 8], strides = [1, 1]} : vector<16x96xf32> to vector<16x8xf32>
    %277 = vector.extract_strided_slice %265 {offsets = [0, 72], sizes = [16, 8], strides = [1, 1]} : vector<16x96xf32> to vector<16x8xf32>
    %278 = vector.extract_strided_slice %265 {offsets = [0, 80], sizes = [16, 8], strides = [1, 1]} : vector<16x96xf32> to vector<16x8xf32>
    %279 = vector.extract_strided_slice %265 {offsets = [0, 88], sizes = [16, 8], strides = [1, 1]} : vector<16x96xf32> to vector<16x8xf32>
    %280 = tpu.concatenate %276, %277, %278, %279 in 0 : vector<16x8xf32>, vector<16x8xf32>, vector<16x8xf32>, vector<16x8xf32> -> vector<64x8xf32>
    %cst_85 = arith.constant dense<0.000000e+00> : vector<64x64xf32>
    %281 = tpu.matmul %270, %275, %cst_85 {dimension_numbers = #tpu.dot_dimension_numbers<[1], [1], [0], [0], [0, 0, 1, 0], [], []>} : vector<64x8xf32>, vector<64x8xf32>, vector<64x64xf32> -> vector<64x64xf32>
    %cst_86 = arith.constant 0.353553385 : f32
    %282 = vector.broadcast %cst_86 : f32 to vector<64x64xf32>
    %283 = arith.mulf %281, %282 : vector<64x64xf32>
    %284 = arith.addf %283, %103 : vector<64x64xf32>
    %cst_87 = arith.constant dense<0xFF800000> : vector<64xf32>
    %285 = vector.multi_reduction <maximumf>, %284, %cst_87 [1] : vector<64x64xf32> to vector<64xf32>
    %286 = vector.shape_cast %285 : vector<64xf32> to vector<64x1xf32>
    %287 = vector.broadcast %286 : vector<64x1xf32> to vector<64x64xf32>
    %288 = arith.subf %284, %287 : vector<64x64xf32>
    %289 = math.exp %288 : vector<64x64xf32>
    %cst_88 = arith.constant dense<0.000000e+00> : vector<64xf32>
    %290 = vector.multi_reduction <add>, %289, %cst_88 [1] : vector<64x64xf32> to vector<64xf32>
    %291 = vector.shape_cast %290 : vector<64xf32> to vector<64x1xf32>
    %292 = vector.broadcast %291 : vector<64x1xf32> to vector<64x64xf32>
    %293 = arith.divf %289, %292 : vector<64x64xf32>
    %cst_89 = arith.constant dense<0.000000e+00> : vector<64x8xf32>
    %294 = tpu.matmul %293, %280, %cst_89 {dimension_numbers = #tpu.dot_dimension_numbers<[1], [0], [0], [1], [0, 0, 1, 1], [], []>} : vector<64x64xf32>, vector<64x8xf32>, vector<64x8xf32> -> vector<64x8xf32>
    %295 = vector.extract_strided_slice %294 {offsets = [0, 0], sizes = [16, 8], strides = [1, 1]} : vector<64x8xf32> to vector<16x8xf32>
    %296 = vector.extract_strided_slice %294 {offsets = [16, 0], sizes = [16, 8], strides = [1, 1]} : vector<64x8xf32> to vector<16x8xf32>
    %297 = vector.extract_strided_slice %294 {offsets = [32, 0], sizes = [16, 8], strides = [1, 1]} : vector<64x8xf32> to vector<16x8xf32>
    %298 = vector.extract_strided_slice %294 {offsets = [48, 0], sizes = [16, 8], strides = [1, 1]} : vector<64x8xf32> to vector<16x8xf32>
    %299 = tpu.concatenate %295, %296, %297, %298 in 1 : vector<16x8xf32>, vector<16x8xf32>, vector<16x8xf32>, vector<16x8xf32> -> vector<16x32xf32>
    %c392 = arith.constant 392 : index
    %c0_90 = arith.constant 0 : index
    %300 = vector.load %arg3[%c392, %c0_90] : memref<654x128xf32, #tpu.memory_space<vmem>>, vector<32x128xf32>
    %301 = vector.extract_strided_slice %300 {offsets = [0, 0], sizes = [32, 32], strides = [1, 1]} : vector<32x128xf32> to vector<32x32xf32>
    %cst_91 = arith.constant dense<0.000000e+00> : vector<16x32xf32>
    %302 = tpu.matmul %299, %301, %cst_91 {dimension_numbers = #tpu.dot_dimension_numbers<[1], [0], [0], [1], [0, 0, 1, 1], [], []>} : vector<16x32xf32>, vector<32x32xf32>, vector<16x32xf32> -> vector<16x32xf32>
    %c424 = arith.constant 424 : index
    %c0_92 = arith.constant 0 : index
    %303 = vector.load %arg3[%c424, %c0_92] : memref<654x128xf32, #tpu.memory_space<vmem>>, vector<1x128xf32>
    %304 = vector.extract_strided_slice %303 {offsets = [0, 0], sizes = [1, 32], strides = [1, 1]} : vector<1x128xf32> to vector<1x32xf32>
    %305 = vector.broadcast %304 : vector<1x32xf32> to vector<16x32xf32>
    %306 = arith.addf %302, %305 : vector<16x32xf32>
    %307 = arith.addf %306, %258 : vector<16x32xf32>
    %c425 = arith.constant 425 : index
    %c0_93 = arith.constant 0 : index
    %308 = vector.load %arg3[%c425, %c0_93] : memref<654x128xf32, #tpu.memory_space<vmem>>, vector<1x128xf32>
    %309 = vector.extract_strided_slice %308 {offsets = [0, 0], sizes = [1, 32], strides = [1, 1]} : vector<1x128xf32> to vector<1x32xf32>
    %c426 = arith.constant 426 : index
    %c0_94 = arith.constant 0 : index
    %310 = vector.load %arg3[%c426, %c0_94] : memref<654x128xf32, #tpu.memory_space<vmem>>, vector<1x128xf32>
    %311 = vector.extract_strided_slice %310 {offsets = [0, 0], sizes = [1, 32], strides = [1, 1]} : vector<1x128xf32> to vector<1x32xf32>
    %cst_95 = arith.constant dense<0.000000e+00> : vector<16xf32>
    %312 = vector.multi_reduction <add>, %307, %cst_95 [1] : vector<16x32xf32> to vector<16xf32>
    %313 = vector.shape_cast %312 : vector<16xf32> to vector<16x1xf32>
    %cst_96 = arith.constant 3.200000e+01 : f32
    %314 = vector.broadcast %cst_96 : f32 to vector<16x1xf32>
    %315 = arith.divf %313, %314 : vector<16x1xf32>
    %316 = vector.broadcast %315 : vector<16x1xf32> to vector<16x32xf32>
    %317 = arith.subf %307, %316 : vector<16x32xf32>
    %318 = arith.mulf %317, %317 : vector<16x32xf32>
    %cst_97 = arith.constant dense<0.000000e+00> : vector<16xf32>
    %319 = vector.multi_reduction <add>, %318, %cst_97 [1] : vector<16x32xf32> to vector<16xf32>
    %320 = vector.shape_cast %319 : vector<16xf32> to vector<16x1xf32>
    %cst_98 = arith.constant 3.200000e+01 : f32
    %321 = vector.broadcast %cst_98 : f32 to vector<16x1xf32>
    %322 = arith.divf %320, %321 : vector<16x1xf32>
    %323 = vector.broadcast %315 : vector<16x1xf32> to vector<16x32xf32>
    %324 = arith.subf %307, %323 : vector<16x32xf32>
    %cst_99 = arith.constant 9.99999996E-13 : f32
    %325 = vector.broadcast %cst_99 : f32 to vector<16x1xf32>
    %326 = arith.addf %322, %325 : vector<16x1xf32>
    %327 = math.rsqrt %326 : vector<16x1xf32>
    %328 = vector.broadcast %327 : vector<16x1xf32> to vector<16x32xf32>
    %329 = arith.mulf %324, %328 : vector<16x32xf32>
    %330 = vector.broadcast %309 : vector<1x32xf32> to vector<16x32xf32>
    %331 = arith.mulf %329, %330 : vector<16x32xf32>
    %332 = vector.broadcast %311 : vector<1x32xf32> to vector<16x32xf32>
    %333 = arith.addf %331, %332 : vector<16x32xf32>
    %c427 = arith.constant 427 : index
    %c0_100 = arith.constant 0 : index
    %334 = vector.load %arg3[%c427, %c0_100] : memref<654x128xf32, #tpu.memory_space<vmem>>, vector<32x128xf32>
    %cst_101 = arith.constant dense<0.000000e+00> : vector<16x128xf32>
    %335 = tpu.matmul %333, %334, %cst_101 {dimension_numbers = #tpu.dot_dimension_numbers<[1], [0], [0], [1], [0, 0, 1, 1], [], []>} : vector<16x32xf32>, vector<32x128xf32>, vector<16x128xf32> -> vector<16x128xf32>
    %c459 = arith.constant 459 : index
    %c0_102 = arith.constant 0 : index
    %336 = vector.load %arg3[%c459, %c0_102] : memref<654x128xf32, #tpu.memory_space<vmem>>, vector<1x128xf32>
    %337 = vector.broadcast %336 : vector<1x128xf32> to vector<16x128xf32>
    %338 = arith.addf %335, %337 : vector<16x128xf32>
    %cst_103 = arith.constant 5.000000e-01 : f32
    %339 = vector.broadcast %cst_103 : f32 to vector<16x128xf32>
    %340 = arith.mulf %339, %338 : vector<16x128xf32>
    %cst_104 = arith.constant 0.707106769 : f32
    %341 = vector.broadcast %cst_104 : f32 to vector<16x128xf32>
    %342 = arith.mulf %338, %341 : vector<16x128xf32>
    %cst_105 = arith.constant 0.000000e+00 : f32
    %343 = vector.broadcast %cst_105 : f32 to vector<16x128xf32>
    %344 = arith.cmpf oge, %342, %343 : vector<16x128xf32>
    %cst_106 = arith.constant 1.000000e+00 : f32
    %cst_107 = arith.constant -1.000000e+00 : f32
    %345 = vector.broadcast %cst_106 : f32 to vector<16x128xf32>
    %346 = vector.broadcast %cst_107 : f32 to vector<16x128xf32>
    %347 = arith.select %344, %345, %346 : vector<16x128xi1>, vector<16x128xf32>
    %348 = math.absf %342 : vector<16x128xf32>
    %cst_108 = arith.constant 0.327591091 : f32
    %349 = vector.broadcast %cst_108 : f32 to vector<16x128xf32>
    %350 = arith.mulf %349, %348 : vector<16x128xf32>
    %cst_109 = arith.constant 1.000000e+00 : f32
    %351 = vector.broadcast %cst_109 : f32 to vector<16x128xf32>
    %352 = arith.addf %351, %350 : vector<16x128xf32>
    %cst_110 = arith.constant 1.000000e+00 : f32
    %353 = vector.broadcast %cst_110 : f32 to vector<16x128xf32>
    %354 = arith.divf %353, %352 : vector<16x128xf32>
    %cst_111 = arith.constant 1.06140542 : f32
    %355 = vector.broadcast %cst_111 : f32 to vector<16x128xf32>
    %356 = arith.mulf %355, %354 : vector<16x128xf32>
    %cst_112 = arith.constant -1.45315206 : f32
    %357 = vector.broadcast %cst_112 : f32 to vector<16x128xf32>
    %358 = arith.addf %356, %357 : vector<16x128xf32>
    %359 = arith.mulf %358, %354 : vector<16x128xf32>
    %cst_113 = arith.constant 1.42141378 : f32
    %360 = vector.broadcast %cst_113 : f32 to vector<16x128xf32>
    %361 = arith.addf %359, %360 : vector<16x128xf32>
    %362 = arith.mulf %361, %354 : vector<16x128xf32>
    %cst_114 = arith.constant -0.284496725 : f32
    %363 = vector.broadcast %cst_114 : f32 to vector<16x128xf32>
    %364 = arith.addf %362, %363 : vector<16x128xf32>
    %365 = arith.mulf %364, %354 : vector<16x128xf32>
    %cst_115 = arith.constant 0.254829586 : f32
    %366 = vector.broadcast %cst_115 : f32 to vector<16x128xf32>
    %367 = arith.addf %365, %366 : vector<16x128xf32>
    %368 = arith.mulf %367, %354 : vector<16x128xf32>
    %cst_116 = arith.constant 0.000000e+00 : f32
    %369 = vector.broadcast %cst_116 : f32 to vector<16x128xf32>
    %370 = arith.subf %369, %348 : vector<16x128xf32>
    %371 = arith.mulf %370, %348 : vector<16x128xf32>
    %372 = math.exp %371 : vector<16x128xf32>
    %373 = arith.mulf %368, %372 : vector<16x128xf32>
    %cst_117 = arith.constant 1.000000e+00 : f32
    %374 = vector.broadcast %cst_117 : f32 to vector<16x128xf32>
    %375 = arith.subf %374, %373 : vector<16x128xf32>
    %376 = arith.mulf %347, %375 : vector<16x128xf32>
    %cst_118 = arith.constant 1.000000e+00 : f32
    %377 = vector.broadcast %cst_118 : f32 to vector<16x128xf32>
    %378 = arith.addf %377, %376 : vector<16x128xf32>
    %379 = arith.mulf %340, %378 : vector<16x128xf32>
    %c460 = arith.constant 460 : index
    %c0_119 = arith.constant 0 : index
    %380 = vector.load %arg3[%c460, %c0_119] : memref<654x128xf32, #tpu.memory_space<vmem>>, vector<128x128xf32>
    %381 = vector.extract_strided_slice %380 {offsets = [0, 0], sizes = [128, 32], strides = [1, 1]} : vector<128x128xf32> to vector<128x32xf32>
    %cst_120 = arith.constant dense<0.000000e+00> : vector<16x32xf32>
    %382 = tpu.matmul %379, %381, %cst_120 {dimension_numbers = #tpu.dot_dimension_numbers<[1], [0], [0], [1], [0, 0, 1, 1], [], []>} : vector<16x128xf32>, vector<128x32xf32>, vector<16x32xf32> -> vector<16x32xf32>
    %c588 = arith.constant 588 : index
    %c0_121 = arith.constant 0 : index
    %383 = vector.load %arg3[%c588, %c0_121] : memref<654x128xf32, #tpu.memory_space<vmem>>, vector<1x128xf32>
    %384 = vector.extract_strided_slice %383 {offsets = [0, 0], sizes = [1, 32], strides = [1, 1]} : vector<1x128xf32> to vector<1x32xf32>
    %385 = vector.broadcast %384 : vector<1x32xf32> to vector<16x32xf32>
    %386 = arith.addf %382, %385 : vector<16x32xf32>
    %387 = arith.addf %386, %333 : vector<16x32xf32>
    %c589 = arith.constant 589 : index
    %c0_122 = arith.constant 0 : index
    %388 = vector.load %arg3[%c589, %c0_122] : memref<654x128xf32, #tpu.memory_space<vmem>>, vector<1x128xf32>
    %389 = vector.extract_strided_slice %388 {offsets = [0, 0], sizes = [1, 32], strides = [1, 1]} : vector<1x128xf32> to vector<1x32xf32>
    %c590 = arith.constant 590 : index
    %c0_123 = arith.constant 0 : index
    %390 = vector.load %arg3[%c590, %c0_123] : memref<654x128xf32, #tpu.memory_space<vmem>>, vector<1x128xf32>
    %391 = vector.extract_strided_slice %390 {offsets = [0, 0], sizes = [1, 32], strides = [1, 1]} : vector<1x128xf32> to vector<1x32xf32>
    %cst_124 = arith.constant dense<0.000000e+00> : vector<16xf32>
    %392 = vector.multi_reduction <add>, %387, %cst_124 [1] : vector<16x32xf32> to vector<16xf32>
    %393 = vector.shape_cast %392 : vector<16xf32> to vector<16x1xf32>
    %cst_125 = arith.constant 3.200000e+01 : f32
    %394 = vector.broadcast %cst_125 : f32 to vector<16x1xf32>
    %395 = arith.divf %393, %394 : vector<16x1xf32>
    %396 = vector.broadcast %395 : vector<16x1xf32> to vector<16x32xf32>
    %397 = arith.subf %387, %396 : vector<16x32xf32>
    %398 = arith.mulf %397, %397 : vector<16x32xf32>
    %cst_126 = arith.constant dense<0.000000e+00> : vector<16xf32>
    %399 = vector.multi_reduction <add>, %398, %cst_126 [1] : vector<16x32xf32> to vector<16xf32>
    %400 = vector.shape_cast %399 : vector<16xf32> to vector<16x1xf32>
    %cst_127 = arith.constant 3.200000e+01 : f32
    %401 = vector.broadcast %cst_127 : f32 to vector<16x1xf32>
    %402 = arith.divf %400, %401 : vector<16x1xf32>
    %403 = vector.broadcast %395 : vector<16x1xf32> to vector<16x32xf32>
    %404 = arith.subf %387, %403 : vector<16x32xf32>
    %cst_128 = arith.constant 9.99999996E-13 : f32
    %405 = vector.broadcast %cst_128 : f32 to vector<16x1xf32>
    %406 = arith.addf %402, %405 : vector<16x1xf32>
    %407 = math.rsqrt %406 : vector<16x1xf32>
    %408 = vector.broadcast %407 : vector<16x1xf32> to vector<16x32xf32>
    %409 = arith.mulf %404, %408 : vector<16x32xf32>
    %410 = vector.broadcast %389 : vector<1x32xf32> to vector<16x32xf32>
    %411 = arith.mulf %409, %410 : vector<16x32xf32>
    %412 = vector.broadcast %391 : vector<1x32xf32> to vector<16x32xf32>
    %413 = arith.addf %411, %412 : vector<16x32xf32>
    %c591 = arith.constant 591 : index
    %c0_129 = arith.constant 0 : index
    %414 = vector.load %arg3[%c591, %c0_129] : memref<654x128xf32, #tpu.memory_space<vmem>>, vector<32x128xf32>
    %415 = vector.extract_strided_slice %414 {offsets = [0, 0], sizes = [32, 16], strides = [1, 1]} : vector<32x128xf32> to vector<32x16xf32>
    %cst_130 = arith.constant dense<0.000000e+00> : vector<16x16xf32>
    %416 = tpu.matmul %413, %415, %cst_130 {dimension_numbers = #tpu.dot_dimension_numbers<[1], [0], [0], [1], [0, 0, 1, 1], [], []>} : vector<16x32xf32>, vector<32x16xf32>, vector<16x16xf32> -> vector<16x16xf32>
    %c623 = arith.constant 623 : index
    %c0_131 = arith.constant 0 : index
    %417 = vector.load %arg3[%c623, %c0_131] : memref<654x128xf32, #tpu.memory_space<vmem>>, vector<1x128xf32>
    %418 = vector.extract_strided_slice %417 {offsets = [0, 0], sizes = [1, 16], strides = [1, 1]} : vector<1x128xf32> to vector<1x16xf32>
    %419 = vector.broadcast %418 : vector<1x16xf32> to vector<16x16xf32>
    %420 = arith.addf %416, %419 : vector<16x16xf32>
    %c624 = arith.constant 624 : index
    %c0_132 = arith.constant 0 : index
    %421 = vector.load %arg3[%c624, %c0_132] : memref<654x128xf32, #tpu.memory_space<vmem>>, vector<1x128xf32>
    %422 = vector.extract_strided_slice %421 {offsets = [0, 0], sizes = [1, 16], strides = [1, 1]} : vector<1x128xf32> to vector<1x16xf32>
    %c625 = arith.constant 625 : index
    %c0_133 = arith.constant 0 : index
    %423 = vector.load %arg3[%c625, %c0_133] : memref<654x128xf32, #tpu.memory_space<vmem>>, vector<1x128xf32>
    %424 = vector.extract_strided_slice %423 {offsets = [0, 0], sizes = [1, 16], strides = [1, 1]} : vector<1x128xf32> to vector<1x16xf32>
    %cst_134 = arith.constant dense<0.000000e+00> : vector<16xf32>
    %425 = vector.multi_reduction <add>, %420, %cst_134 [1] : vector<16x16xf32> to vector<16xf32>
    %426 = vector.shape_cast %425 : vector<16xf32> to vector<16x1xf32>
    %cst_135 = arith.constant 1.600000e+01 : f32
    %427 = vector.broadcast %cst_135 : f32 to vector<16x1xf32>
    %428 = arith.divf %426, %427 : vector<16x1xf32>
    %429 = vector.broadcast %428 : vector<16x1xf32> to vector<16x16xf32>
    %430 = arith.subf %420, %429 : vector<16x16xf32>
    %431 = arith.mulf %430, %430 : vector<16x16xf32>
    %cst_136 = arith.constant dense<0.000000e+00> : vector<16xf32>
    %432 = vector.multi_reduction <add>, %431, %cst_136 [1] : vector<16x16xf32> to vector<16xf32>
    %433 = vector.shape_cast %432 : vector<16xf32> to vector<16x1xf32>
    %cst_137 = arith.constant 1.600000e+01 : f32
    %434 = vector.broadcast %cst_137 : f32 to vector<16x1xf32>
    %435 = arith.divf %433, %434 : vector<16x1xf32>
    %436 = vector.broadcast %428 : vector<16x1xf32> to vector<16x16xf32>
    %437 = arith.subf %420, %436 : vector<16x16xf32>
    %cst_138 = arith.constant 9.99999974E-6 : f32
    %438 = vector.broadcast %cst_138 : f32 to vector<16x1xf32>
    %439 = arith.addf %435, %438 : vector<16x1xf32>
    %440 = math.rsqrt %439 : vector<16x1xf32>
    %441 = vector.broadcast %440 : vector<16x1xf32> to vector<16x16xf32>
    %442 = arith.mulf %437, %441 : vector<16x16xf32>
    %443 = vector.broadcast %422 : vector<1x16xf32> to vector<16x16xf32>
    %444 = arith.mulf %442, %443 : vector<16x16xf32>
    %445 = vector.broadcast %424 : vector<1x16xf32> to vector<16x16xf32>
    %446 = arith.addf %444, %445 : vector<16x16xf32>
    %cst_139 = arith.constant 5.000000e-01 : f32
    %447 = vector.broadcast %cst_139 : f32 to vector<16x16xf32>
    %448 = arith.mulf %447, %446 : vector<16x16xf32>
    %cst_140 = arith.constant 0.707106769 : f32
    %449 = vector.broadcast %cst_140 : f32 to vector<16x16xf32>
    %450 = arith.mulf %446, %449 : vector<16x16xf32>
    %cst_141 = arith.constant 0.000000e+00 : f32
    %451 = vector.broadcast %cst_141 : f32 to vector<16x16xf32>
    %452 = arith.cmpf oge, %450, %451 : vector<16x16xf32>
    %cst_142 = arith.constant 1.000000e+00 : f32
    %cst_143 = arith.constant -1.000000e+00 : f32
    %453 = vector.broadcast %cst_142 : f32 to vector<16x16xf32>
    %454 = vector.broadcast %cst_143 : f32 to vector<16x16xf32>
    %455 = arith.select %452, %453, %454 : vector<16x16xi1>, vector<16x16xf32>
    %456 = math.absf %450 : vector<16x16xf32>
    %cst_144 = arith.constant 0.327591091 : f32
    %457 = vector.broadcast %cst_144 : f32 to vector<16x16xf32>
    %458 = arith.mulf %457, %456 : vector<16x16xf32>
    %cst_145 = arith.constant 1.000000e+00 : f32
    %459 = vector.broadcast %cst_145 : f32 to vector<16x16xf32>
    %460 = arith.addf %459, %458 : vector<16x16xf32>
    %cst_146 = arith.constant 1.000000e+00 : f32
    %461 = vector.broadcast %cst_146 : f32 to vector<16x16xf32>
    %462 = arith.divf %461, %460 : vector<16x16xf32>
    %cst_147 = arith.constant 1.06140542 : f32
    %463 = vector.broadcast %cst_147 : f32 to vector<16x16xf32>
    %464 = arith.mulf %463, %462 : vector<16x16xf32>
    %cst_148 = arith.constant -1.45315206 : f32
    %465 = vector.broadcast %cst_148 : f32 to vector<16x16xf32>
    %466 = arith.addf %464, %465 : vector<16x16xf32>
    %467 = arith.mulf %466, %462 : vector<16x16xf32>
    %cst_149 = arith.constant 1.42141378 : f32
    %468 = vector.broadcast %cst_149 : f32 to vector<16x16xf32>
    %469 = arith.addf %467, %468 : vector<16x16xf32>
    %470 = arith.mulf %469, %462 : vector<16x16xf32>
    %cst_150 = arith.constant -0.284496725 : f32
    %471 = vector.broadcast %cst_150 : f32 to vector<16x16xf32>
    %472 = arith.addf %470, %471 : vector<16x16xf32>
    %473 = arith.mulf %472, %462 : vector<16x16xf32>
    %cst_151 = arith.constant 0.254829586 : f32
    %474 = vector.broadcast %cst_151 : f32 to vector<16x16xf32>
    %475 = arith.addf %473, %474 : vector<16x16xf32>
    %476 = arith.mulf %475, %462 : vector<16x16xf32>
    %cst_152 = arith.constant 0.000000e+00 : f32
    %477 = vector.broadcast %cst_152 : f32 to vector<16x16xf32>
    %478 = arith.subf %477, %456 : vector<16x16xf32>
    %479 = arith.mulf %478, %456 : vector<16x16xf32>
    %480 = math.exp %479 : vector<16x16xf32>
    %481 = arith.mulf %476, %480 : vector<16x16xf32>
    %cst_153 = arith.constant 1.000000e+00 : f32
    %482 = vector.broadcast %cst_153 : f32 to vector<16x16xf32>
    %483 = arith.subf %482, %481 : vector<16x16xf32>
    %484 = arith.mulf %455, %483 : vector<16x16xf32>
    %cst_154 = arith.constant 1.000000e+00 : f32
    %485 = vector.broadcast %cst_154 : f32 to vector<16x16xf32>
    %486 = arith.addf %485, %484 : vector<16x16xf32>
    %487 = arith.mulf %448, %486 : vector<16x16xf32>
    %c626 = arith.constant 626 : index
    %c0_155 = arith.constant 0 : index
    %488 = vector.load %arg3[%c626, %c0_155] : memref<654x128xf32, #tpu.memory_space<vmem>>, vector<16x128xf32>
    %489 = vector.extract_strided_slice %488 {offsets = [0, 0], sizes = [16, 8], strides = [1, 1]} : vector<16x128xf32> to vector<16x8xf32>
    %cst_156 = arith.constant dense<0.000000e+00> : vector<16x8xf32>
    %490 = tpu.matmul %487, %489, %cst_156 {dimension_numbers = #tpu.dot_dimension_numbers<[1], [0], [0], [1], [0, 0, 1, 1], [], []>} : vector<16x16xf32>, vector<16x8xf32>, vector<16x8xf32> -> vector<16x8xf32>
    %c642 = arith.constant 642 : index
    %c0_157 = arith.constant 0 : index
    %491 = vector.load %arg3[%c642, %c0_157] : memref<654x128xf32, #tpu.memory_space<vmem>>, vector<1x128xf32>
    %492 = vector.extract_strided_slice %491 {offsets = [0, 0], sizes = [1, 8], strides = [1, 1]} : vector<1x128xf32> to vector<1x8xf32>
    %493 = vector.broadcast %492 : vector<1x8xf32> to vector<16x8xf32>
    %494 = arith.addf %490, %493 : vector<16x8xf32>
    %c643 = arith.constant 643 : index
    %c0_158 = arith.constant 0 : index
    %495 = vector.load %arg3[%c643, %c0_158] : memref<654x128xf32, #tpu.memory_space<vmem>>, vector<1x128xf32>
    %496 = vector.extract_strided_slice %495 {offsets = [0, 0], sizes = [1, 8], strides = [1, 1]} : vector<1x128xf32> to vector<1x8xf32>
    %c644 = arith.constant 644 : index
    %c0_159 = arith.constant 0 : index
    %497 = vector.load %arg3[%c644, %c0_159] : memref<654x128xf32, #tpu.memory_space<vmem>>, vector<1x128xf32>
    %498 = vector.extract_strided_slice %497 {offsets = [0, 0], sizes = [1, 8], strides = [1, 1]} : vector<1x128xf32> to vector<1x8xf32>
    %cst_160 = arith.constant dense<0.000000e+00> : vector<16xf32>
    %499 = vector.multi_reduction <add>, %494, %cst_160 [1] : vector<16x8xf32> to vector<16xf32>
    %500 = vector.shape_cast %499 : vector<16xf32> to vector<16x1xf32>
    %cst_161 = arith.constant 8.000000e+00 : f32
    %501 = vector.broadcast %cst_161 : f32 to vector<16x1xf32>
    %502 = arith.divf %500, %501 : vector<16x1xf32>
    %503 = vector.broadcast %502 : vector<16x1xf32> to vector<16x8xf32>
    %504 = arith.subf %494, %503 : vector<16x8xf32>
    %505 = arith.mulf %504, %504 : vector<16x8xf32>
    %cst_162 = arith.constant dense<0.000000e+00> : vector<16xf32>
    %506 = vector.multi_reduction <add>, %505, %cst_162 [1] : vector<16x8xf32> to vector<16xf32>
    %507 = vector.shape_cast %506 : vector<16xf32> to vector<16x1xf32>
    %cst_163 = arith.constant 8.000000e+00 : f32
    %508 = vector.broadcast %cst_163 : f32 to vector<16x1xf32>
    %509 = arith.divf %507, %508 : vector<16x1xf32>
    %510 = vector.broadcast %502 : vector<16x1xf32> to vector<16x8xf32>
    %511 = arith.subf %494, %510 : vector<16x8xf32>
    %cst_164 = arith.constant 9.99999974E-6 : f32
    %512 = vector.broadcast %cst_164 : f32 to vector<16x1xf32>
    %513 = arith.addf %509, %512 : vector<16x1xf32>
    %514 = math.rsqrt %513 : vector<16x1xf32>
    %515 = vector.broadcast %514 : vector<16x1xf32> to vector<16x8xf32>
    %516 = arith.mulf %511, %515 : vector<16x8xf32>
    %517 = vector.broadcast %496 : vector<1x8xf32> to vector<16x8xf32>
    %518 = arith.mulf %516, %517 : vector<16x8xf32>
    %519 = vector.broadcast %498 : vector<1x8xf32> to vector<16x8xf32>
    %520 = arith.addf %518, %519 : vector<16x8xf32>
    %cst_165 = arith.constant 5.000000e-01 : f32
    %521 = vector.broadcast %cst_165 : f32 to vector<16x8xf32>
    %522 = arith.mulf %521, %520 : vector<16x8xf32>
    %cst_166 = arith.constant 0.707106769 : f32
    %523 = vector.broadcast %cst_166 : f32 to vector<16x8xf32>
    %524 = arith.mulf %520, %523 : vector<16x8xf32>
    %cst_167 = arith.constant 0.000000e+00 : f32
    %525 = vector.broadcast %cst_167 : f32 to vector<16x8xf32>
    %526 = arith.cmpf oge, %524, %525 : vector<16x8xf32>
    %cst_168 = arith.constant 1.000000e+00 : f32
    %cst_169 = arith.constant -1.000000e+00 : f32
    %527 = vector.broadcast %cst_168 : f32 to vector<16x8xf32>
    %528 = vector.broadcast %cst_169 : f32 to vector<16x8xf32>
    %529 = arith.select %526, %527, %528 : vector<16x8xi1>, vector<16x8xf32>
    %530 = math.absf %524 : vector<16x8xf32>
    %cst_170 = arith.constant 0.327591091 : f32
    %531 = vector.broadcast %cst_170 : f32 to vector<16x8xf32>
    %532 = arith.mulf %531, %530 : vector<16x8xf32>
    %cst_171 = arith.constant 1.000000e+00 : f32
    %533 = vector.broadcast %cst_171 : f32 to vector<16x8xf32>
    %534 = arith.addf %533, %532 : vector<16x8xf32>
    %cst_172 = arith.constant 1.000000e+00 : f32
    %535 = vector.broadcast %cst_172 : f32 to vector<16x8xf32>
    %536 = arith.divf %535, %534 : vector<16x8xf32>
    %cst_173 = arith.constant 1.06140542 : f32
    %537 = vector.broadcast %cst_173 : f32 to vector<16x8xf32>
    %538 = arith.mulf %537, %536 : vector<16x8xf32>
    %cst_174 = arith.constant -1.45315206 : f32
    %539 = vector.broadcast %cst_174 : f32 to vector<16x8xf32>
    %540 = arith.addf %538, %539 : vector<16x8xf32>
    %541 = arith.mulf %540, %536 : vector<16x8xf32>
    %cst_175 = arith.constant 1.42141378 : f32
    %542 = vector.broadcast %cst_175 : f32 to vector<16x8xf32>
    %543 = arith.addf %541, %542 : vector<16x8xf32>
    %544 = arith.mulf %543, %536 : vector<16x8xf32>
    %cst_176 = arith.constant -0.284496725 : f32
    %545 = vector.broadcast %cst_176 : f32 to vector<16x8xf32>
    %546 = arith.addf %544, %545 : vector<16x8xf32>
    %547 = arith.mulf %546, %536 : vector<16x8xf32>
    %cst_177 = arith.constant 0.254829586 : f32
    %548 = vector.broadcast %cst_177 : f32 to vector<16x8xf32>
    %549 = arith.addf %547, %548 : vector<16x8xf32>
    %550 = arith.mulf %549, %536 : vector<16x8xf32>
    %cst_178 = arith.constant 0.000000e+00 : f32
    %551 = vector.broadcast %cst_178 : f32 to vector<16x8xf32>
    %552 = arith.subf %551, %530 : vector<16x8xf32>
    %553 = arith.mulf %552, %530 : vector<16x8xf32>
    %554 = math.exp %553 : vector<16x8xf32>
    %555 = arith.mulf %550, %554 : vector<16x8xf32>
    %cst_179 = arith.constant 1.000000e+00 : f32
    %556 = vector.broadcast %cst_179 : f32 to vector<16x8xf32>
    %557 = arith.subf %556, %555 : vector<16x8xf32>
    %558 = arith.mulf %529, %557 : vector<16x8xf32>
    %cst_180 = arith.constant 1.000000e+00 : f32
    %559 = vector.broadcast %cst_180 : f32 to vector<16x8xf32>
    %560 = arith.addf %559, %558 : vector<16x8xf32>
    %561 = arith.mulf %522, %560 : vector<16x8xf32>
    %c645 = arith.constant 645 : index
    %c0_181 = arith.constant 0 : index
    %562 = vector.load %arg3[%c645, %c0_181] : memref<654x128xf32, #tpu.memory_space<vmem>>, vector<8x128xf32>
    %cst_182 = arith.constant dense<0.000000e+00> : vector<16x128xf32>
    %563 = tpu.matmul %561, %562, %cst_182 {dimension_numbers = #tpu.dot_dimension_numbers<[1], [0], [0], [1], [0, 0, 1, 1], [], []>} : vector<16x8xf32>, vector<8x128xf32>, vector<16x128xf32> -> vector<16x128xf32>
    %c653 = arith.constant 653 : index
    %c0_183 = arith.constant 0 : index
    %564 = vector.load %arg3[%c653, %c0_183] : memref<654x128xf32, #tpu.memory_space<vmem>>, vector<1x128xf32>
    %565 = vector.broadcast %564 : vector<1x128xf32> to vector<16x128xf32>
    %566 = arith.addf %563, %565 : vector<16x128xf32>
    %c0_184 = arith.constant 0 : index
    %c0_185 = arith.constant 0 : index
    %567 = vector.load %arg4[%c0_184, %c0_185] : memref<16x128xf32, #tpu.memory_space<vmem>>, vector<16x128xf32>
    tpu.vector_store %arg4[%c0_184, %c0_185], %566 {strides = array<i32>} : memref<16x128xf32, #tpu.memory_space<vmem>>, vector<16x128xf32>,
    return
  }
}

</mosaic_0001>

<bundles_post_ra>
// kernel: forward.1
= control target key start
LH: loop header
LB: loop body
LE: loop exit
PB: predicated region body
PF: predicated region fallthrough
CT: control target
= control target key end

     0   :  { %9 = vsyncpa [#allocation3], 0  ;;  %s4275_s0 = inlined_call_operand.hbm [shape: f32[16,32], index: 0, kind: input, shape index: {}]   ;;  %s4276_s1 = inlined_call_operand.vmem [shape: f32[16,8], index: 1, kind: input, shape index: {}]   ;;  %s4277_s2 = inlined_call_operand.vmem [shape: f32[1,16], index: 2, kind: input, shape index: {}]   ;;  %s4278_s3 = inlined_call_operand.hbm [shape: f32[654,128], index: 3, kind: input, shape index: {}]   ;;  %s4279_s4 = inlined_call_operand.vmem [shape: f32[16,128], index: 4, kind: output, shape index: {}]  }
   0x1   :  { %10 = vsyncpa [#allocation5], 0  ;;  %s3808_s15 = smov [#allocation2]   ;;  %s3760_s19 = scalar_lea.hbm %s4275_s0, 256 }
   0x2   :  { %s16_s16 = sshll.u32 %s3808_s15, 4  ;;  %p3761_p0 = scmp.ne.s32.totalorder %s4275_s0, %s3760_s19  ;;  %s17_s16 = int_to_ptr.vmem [resolvable:$true] %s16_s16 }
   0x3   :  { %p3764_p1 = scmp.lt.u32.totalorder %s3760_s19, %s4275_s0 }
   0x5   :  { %p3766_p2 = pnand %p3764_p1, %p3761_p0 }
   0x7   :  { %3769 = shalt.err (!%p3766_p2)
}
   0x8   :  { %s3770_s24 = scalar_lea.vmem %s17_s16, 256  ;;  %p3775_p4 = scmp.lt.s32.totalorder %s17_s16, %s17_s16 }
   0x9   :  { %p3771_p3 = scmp.ne.s32.totalorder %s17_s16, %s3770_s24  ;;  %p3776_p5 = scmp.lt.s32.totalorder %s3770_s24, %s3770_s24 }
   0xb   :  { %p3777_p6 = por %p3776_p5, %p3775_p4 }
   0xd   :  { %p3778_p7 = pnand %p3777_p6, %p3771_p3 }
   0xf   :  { %3781 = shalt.err (!%p3778_p7)
}
  0x10   :  { %s3809_s25 = smov 128   ;;  %s3810_s26 = smov 8  }
  0x11   :  { %22 = dma.hbm_to_vmem [thread:$0]  %s4275_s0, 256, %s17_s16, [#allocation3], %s3809_s25, %s3809_s25, %s3810_s26  }
  0x12   :  { %s3811_s29 = smov [#allocation4]   ;;  %s3782_s7 = scalar_lea.hbm %s4278_s3, 10496 }
  0x13   :  { %s32_s30 = sshll.u32 %s3811_s29, 4  ;;  %p3783_p8 = scmp.ne.s32.totalorder %s4278_s3, %s3782_s7  ;;  %s33_s30 = int_to_ptr.vmem [resolvable:$true] %s32_s30 }
  0x14   :  { %p3786_p9 = scmp.lt.u32.totalorder %s3782_s7, %s4278_s3 }
  0x16   :  { %p3788_p10 = pnand %p3786_p9, %p3783_p8 }
  0x18   :  { %3791 = shalt.err (!%p3788_p10)
}
  0x19   :  { %s3792_s12 = scalar_lea.vmem %s33_s30, 10496  ;;  %p3797_p12 = scmp.lt.s32.totalorder %s33_s30, %s33_s30 }
  0x1a   :  { %p3793_p11 = scmp.ne.s32.totalorder %s33_s30, %s3792_s12  ;;  %p3798_p13 = scmp.lt.s32.totalorder %s3792_s12, %s3792_s12 }
  0x1c   :  { %p3799_p0 = por %p3798_p13, %p3797_p12 }
  0x1e   :  { %p3800_p1 = pnand %p3799_p0, %p3793_p11 }
  0x20   :  { %3803 = shalt.err (!%p3800_p1)
}
  0x21   :  { %38 = dma.hbm_to_vmem [thread:$0]  %s4278_s3, 10496, %s33_s30, [#allocation5], %s3809_s25, %s3809_s25, %s3810_s26  }
  0x22   :  { %3804 = dma.done.wait [#allocation3], 256  }
  0x23   :  { %3805 = vsyncadd [#allocation3], 4294967040 }
  0x24   :  { %3806 = dma.done.wait [#allocation5], 10496  }
  0x25   :  { %3807 = vsyncadd [#allocation5], 4294956800  ;;  %vm95_vm0 = vcmask 64512   ;;  %v140_v0 = vld [vmem:[#allocation4 + $0x24] sm:$0xff]  ;;  %v91_v1 = vld [vmem:[%s4276_s1] sm:$0xff]  ;;  %vm49_vm1 = vcmask 261120  }
  0x26   :  { %v92_v2 = vld [vmem:[%s4276_s1 + $0x8] sm:$0xff]  ;;  %3036 = vmatprep.subr.mxu0 %v140_v0  ;;  %v96_v3 = vsel %vm95_vm0, %v91_v1, 0.0  ;;  %v136_v6 = vld [vmem:[#allocation4 + $0x4] sm:$0xff]  ;;  %v137_v7 = vld [vmem:[#allocation4 + $0xc] sm:$0xff]  ;;  %s3812_s1 = smov 120   ;;  %s3813_s3 = smov 112  }
  0x27   :  { %v97_v4 = vsel %vm95_vm0, %v92_v2, 0.0  ;;  %3037 = vmatpush3.msra.mxu0 %v140_v0  ;;  %v3882_v8 = vpack.c.bf16 %v137_v7, %v136_v6  ;;  %v45_v9 = vld [vmem:[#allocation2] sm:$0xff]  ;;  %v46_v10 = vld [vmem:[#allocation2 + $0x8] sm:$0xff]  ;;  %v2780_v59 = vld [vmem:[#allocation4 + $0x2] ss:$0 sm:$0xff]  ;;  %s3814_s18 = smov 104  }
  0x28   :  { %v98_v5 = vadd.f32 %v97_v4, %v96_v3  ;;  %v50_v12 = vsel %vm49_vm1, %v45_v9, 0.0  ;;  %v51_v13 = vsel %vm49_vm1, %v46_v10, 0.0  ;;  %v2781_v62 = vld [vmem:[#allocation4 + $0x3] ss:$0 sm:$0xff]  ;;  %v2778_v4 = vld [vmem:[#allocation4] ss:$0 sm:$0xff]  ;;  %vm3935_vm2 = vmpackc.low %vm95_vm0, %vm95_vm0 }
  0x29   :  { %3324 = vmatprep.subr.bf16.mxu0 %v3882_v8  ;;  %v52_v15 = vadd.f32 %v51_v13, %v50_v12  ;;  %s3815_s19 = smov 96   ;;  %s3816_s22 = smov 16   ;;  %vm370_vm3 = vcmask 130048   ;;  %vm373_vm4 = vcmask 392192   ;;  %vm671_vm7 = vcmask 523264  }
  0x2a   :  { %v99_v11 = vrot.slane %v98_v5, 4  ;;  %s3817_s23 = smov 32   ;;  %s3818_s24 = smov 48   ;;  %vm941_vm8 = vcmask 195584  }
  0x2b   :  { %v53_v17 = vrot.slane %v52_v15, 4  ;;  %s3821_s25 = smov 24  }
  0x2c   :  { %v100_v14 = vadd.f32 %v99_v11, %v98_v5  ;;  %v2779_v11 = vld [vmem:[#allocation4 + $0x1] ss:$0 sm:$0xff] }
  0x2d   :  { %v54_v19 = vadd.f32 %v53_v17, %v52_v15 }
  0x2e   :  { %v101_v16 = vrot.slane %v100_v14, 2 }
  0x2f   :  { %v55_v21 = vrot.slane %v54_v19, 2 }
  0x30   :  { %v102_v18 = vadd.f32 %v101_v16, %v100_v14  ;;  %v2786_v16 = vld [vmem:[#allocation4 + $0x2c] ss:$0 sm:$0xff] }
  0x31   :  { %v56_v23 = vadd.f32 %v55_v21, %v54_v19  ;;  %v310_v19 = vld [vmem:[#allocation4 + $0x2d] sm:$0xff] }
  0x32   :  { %v103_v20 = vrot.slane %v102_v18, 1 }
  0x33   :  { %v57_v25 = vrot.slane %v56_v23, 1 }
  0x34   :  { %v104_v22 = vadd.f32 %v103_v20, %v102_v18 }
  0x35   :  { %v58_v28 = vadd.f32 %v57_v25, %v56_v23 }
  0x36   :  { %v105_v24 = vmul.f32 0.0625, %v104_v22  ;;  %v311_v22 = vld [vmem:[#allocation4 + $0x35] sm:$0xff] }
  0x37   :  { %v60_v31 = vmul.f32 0.0625, %v58_v28 }
  0x38   :  { %v106_v26 = vsub.f32 %v91_v1, %v105_v24  ;;  %v107_v27 = vsub.f32 %v92_v2, %v105_v24  ;;  %v138_v1 = vld [vmem:[#allocation4 + $0x14] sm:$0xff]  ;;  %v139_v2 = vld [vmem:[#allocation4 + $0x1c] sm:$0xff] }
  0x39   :  { %v61_v34 = vsub.f32 %v45_v9, %v60_v31  ;;  %v62_v35 = vsub.f32 %v46_v10, %v60_v31  ;;  %v3327_v10 = vpack.c.bf16 %v139_v2, %v138_v1 }
  0x3a   :  { %v108_v29 = vmul.f32 %v106_v26, %v106_v26  ;;  %v109_v30 = vmul.f32 %v107_v27, %v107_v27 }
  0x3b   :  { %v63_v37 = vmul.f32 %v61_v34, %v61_v34  ;;  %v64_v38 = vmul.f32 %v62_v35, %v62_v35 }
  0x3c   :  { %v110_v32 = vsel %vm95_vm0, %v108_v29, 0.0  ;;  %v111_v33 = vsel %vm95_vm0, %v109_v30, 0.0 }
  0x3d   :  { %v112_v36 = vadd.f32 %v111_v33, %v110_v32  ;;  %v65_v40 = vsel %vm49_vm1, %v63_v37, 0.0  ;;  %v66_v41 = vsel %vm49_vm1, %v64_v38, 0.0  ;;  %v399_v37 = vld [vmem:[#allocation4 + $0x87] sm:$0xff]  ;;  %v400_v38 = vld [vmem:[#allocation4 + $0x8f] sm:$0xff] }
  0x3e   :  { %v67_v43 = vadd.f32 %v66_v41, %v65_v40  ;;  %v401_v40 = vld [vmem:[#allocation4 + $0x97] sm:$0xff] }
  0x3f   :  { %v113_v39 = vrot.slane %v112_v36, 4  ;;  %v3335_v41 = vpack.c.bf16 %v401_v40, %v400_v38  ;;  %v377_v40 = vld [vmem:[#allocation4 + $0x47] sm:$0xff] }
  0x40   :  { %v68_v45 = vrot.slane %v67_v43, 4 }
  0x41   :  { %v114_v42 = vadd.f32 %v113_v39, %v112_v36  ;;  %v398_v36 = vld [vmem:[#allocation4 + $0x7f] sm:$0xff] }
  0x42   :  { %v69_v47 = vadd.f32 %v68_v45, %v67_v43  ;;  %v3331_v39 = vpack.c.bf16 %v399_v37, %v398_v36  ;;  %v3819_v37 = vmov 0  }
  0x43   :  { %v115_v44 = vrot.slane %v114_v42, 2 }
  0x44   :  { %v70_v49 = vrot.slane %v69_v47, 2 }
  0x45   :  { %v116_v46 = vadd.f32 %v115_v44, %v114_v42 }
  0x46   :  { %v71_v51 = vadd.f32 %v70_v49, %v69_v47  ;;  %v2787_v49 = vld [vmem:[#allocation4 + $0x3d] ss:$0 sm:$0xff] }
  0x47   :  { %v117_v48 = vrot.slane %v116_v46, 1 }
  0x48   :  { %v72_v53 = vrot.slane %v71_v51, 1 }
  0x49   :  { %v118_v50 = vadd.f32 %v117_v48, %v116_v46 }
  0x4a   :  { %v73_v55 = vadd.f32 %v72_v53, %v71_v51  ;;  %v2788_v51 = vld [vmem:[#allocation4 + $0x3e] ss:$0 sm:$0xff] }
  0x4b   :  { %v119_v52 = vmul.f32 0.0625, %v118_v50 }
  0x4c   :  { %v74_v56 = vmul.f32 0.0625, %v73_v55 }
  0x4d   :  { %v120_v54 = vadd.f32 1e-05, %v119_v52 }
  0x4e   :  { %v75_v57 = vadd.f32 1e-05, %v74_v56 }
  0x4f   :  { %3632 = vrsqrt.f32 %v120_v54 }
  0x50   :  { %3634 = vrsqrt.f32 %v75_v57 }
  0x59   :  { %v3633_v58 = vpop.eup %3632 }
  0x5a   :  { %v122_v60 = vmul.f32 %v3633_v58, %v106_v26  ;;  %v123_v61 = vmul.f32 %v3633_v58, %v107_v27  ;;  %v3635_v3 = vpop.eup %3634  ;;  %v2789_v58 = vld [vmem:[#allocation4 + $0x9f] ss:$0 sm:$0xff] }
  0x5b   :  { %v77_v7 = vmul.f32 %v3635_v3, %v61_v34  ;;  %v78_v9 = vmul.f32 %v3635_v3, %v62_v35 }
  0x5c   :  { %v128_v63 = vmul.f32 %v2780_v59, %v122_v60  ;;  %v129_v0 = vmul.f32 %v2780_v59, %v123_v61 }
  0x5d   :  { %v83_v12 = vmul.f32 %v2778_v4, %v77_v7  ;;  %v84_v13 = vmul.f32 %v2778_v4, %v78_v9 }
  0x5e   :  { %v134_v5 = vadd.f32 %v2781_v62, %v128_v63  ;;  %v135_v6 = vadd.f32 %v2781_v62, %v129_v0 }
  0x5f   :  { %v89_v14 = vadd.f32 %v2779_v11, %v83_v12  ;;  %v90_v15 = vadd.f32 %v2779_v11, %v84_v13 }
  0x60   :  { %3038 = vmatprep.mubr.msk.f32.mxu0 %vm95_vm0, %v134_v5 }
  0x61   :  { %3039 = vmatmul.mubr.msk.f32.vlgmr.msra.gmra.mrb[0].mxu0 %vm95_vm0, %v135_v6 }
  0x62   :  { %3326 = vmatpush3.bf16.msra.mxu0 %v3882_v8  ;;  %3049 = vmatprep.mubr.msk.f32.mxu0 %vm49_vm1, %v89_v14 }
  0x63   :  { %3328 = vmatprep.subr.bf16.mxu0 %v3327_v10 }
  0x66   :  { %3330 = vmatpush3.bf16.msra.mxu0 %v3327_v10 }
  0x67   :  { %3332 = vmatprep.subr.bf16.mxu0 %v3331_v39 }
  0x69   :  { %3050 = vmatmul.mubr.msk.f32.vlgmr.msra.gmra.mrb[0].mxu0 %vm49_vm1, %v90_v15  ;;  %v357_v15 = vlaneseq }
  0x6a   :  { %3334 = vmatpush3.bf16.msra.mxu0 %v3331_v39 }
  0x6b   :  { %3336 = vmatprep.subr.bf16.mxu0 %v3335_v41 }
  0x6e   :  { %3338 = vmatpush3.bf16.msra.mxu0 %v3335_v41 }
 0x13c   :  { %v3051_v17 = vpop.f32.mrb[0].mxu0 }
 0x13d   :  { %v294_v18 = vpop.f32.mrb[1].mxu0  ;;  %v309_v20 = vadd.f32 %v3051_v17, %v2786_v16  ;;  %v355_v17 = vld [vmem:[%s4277_s2] sm:$0x1]  ;;  %s3820_s2 = smov 64  }
 0x13e   :  { %v308_v21 = vadd.f32 %v2786_v16, %v294_v18  ;;  %v358_v16 = vshrl.u32 %v357_v15, 7 }
 0x13f   :  { %v313_v25 = vadd.f32 %v311_v22, %v309_v20 }
 0x140   :  { %v312_v23 = vadd.f32 %v310_v19, %v308_v21  ;;  %v359_v18 = vsub.s32 0, %v358_v16  ;;  %v382_v16 = vld [vmem:[#allocation4 + $0x6f] sm:$0xff] }
 0x141   :  { %v319_v8 = vsel %vm49_vm1, %v313_v25, 0.0 }
 0x142   :  { %v316_v24 = vsel %vm49_vm1, %v312_v23, 0.0  ;;  %v360_v19 = vrot.slane %v355_v17, %v359_v18 }
 0x143   :  { %317 = vadd.xlane.f32.xlu0 %v316_v24 }
 0x147   :  { %320 = vadd.xlane.f32.xlu0 %v319_v8 }
 0x1d0   :  { %v318_v26 = vpop.xlane.xlu0 %317 }
 0x1d1   :  { %v323_v27 = vmul.f32 0.03125, %v318_v26 }
 0x1d3   :  { %v325_v28 = vsub.f32 %v312_v23, %v323_v27 }
 0x1d4   :  { %v321_v29 = vpop.xlane.xlu0 %320 }
 0x1d5   :  { %v324_v30 = vmul.f32 0.03125, %v321_v29  ;;  %v327_v31 = vmul.f32 %v325_v28, %v325_v28 }
 0x1d7   :  { %v326_v32 = vsub.f32 %v313_v25, %v324_v30  ;;  %v329_v33 = vsel %vm49_vm1, %v327_v31, 0.0 }
 0x1d8   :  { %330 = vadd.xlane.f32.xlu1 %v329_v33 }
 0x1d9   :  { %v328_v34 = vmul.f32 %v326_v32, %v326_v32 }
 0x1db   :  { %v332_v35 = vsel %vm49_vm1, %v328_v34, 0.0 }
 0x1dc   :  { %333 = vadd.xlane.f32.xlu1 %v332_v35 }
 0x265   :  { %v331_v42 = vpop.xlane.xlu1 %330 }
 0x266   :  { %v335_v43 = vmul.f32 0.03125, %v331_v42 }
 0x268   :  { %v337_v44 = vadd.f32 1e-12, %v335_v43  ;;  %v376_v43 = vld [vmem:[#allocation4 + $0x3f] sm:$0xff] }
 0x269   :  { %v334_v45 = vpop.xlane.xlu1 %333 }
 0x26a   :  { %3636 = vrsqrt.f32 %v337_v44  ;;  %v336_v46 = vmul.f32 0.03125, %v334_v45 }
 0x26c   :  { %v338_v47 = vadd.f32 1e-12, %v336_v46 }
 0x26e   :  { %3638 = vrsqrt.f32 %v338_v47 }
 0x274   :  { %v3637_v48 = vpop.eup %3636 }
 0x275   :  { %v341_v50 = vmul.f32 %v3637_v48, %v325_v28 }
 0x277   :  { %v347_v52 = vmul.f32 %v2787_v49, %v341_v50 }
 0x278   :  { %v3639_v53 = vpop.eup %3638 }
 0x279   :  { %v342_v54 = vmul.f32 %v3639_v53, %v326_v32  ;;  %v3900_v55 = vadd.f32 %v2788_v51, %v347_v52 }
 0x27b   :  { %v348_v56 = vmul.f32 %v2787_v49, %v342_v54  ;;  %3060 = vmatprep.mubr.msk.f32.mxu0 %vm49_vm1, %v3900_v55 }
 0x27d   :  { %v3904_v57 = vadd.f32 %v2788_v51, %v348_v56  ;;  %v378_v51 = vld [vmem:[#allocation4 + $0x4f] sm:$0xff]  ;;  %v379_v56 = vld [vmem:[#allocation4 + $0x57] sm:$0xff] }
 0x27f   :  { %3061 = vmatmul.mubr.msk.f32.vlgmr.msra.gmra.mrb[2].mxu0 %vm49_vm1, %v3904_v57 }
 0x352   :  { %v3062_v59 = vpop.f32.mrb[2].mxu0 }
 0x353   :  { %v3908_v60 = vadd.f32 %v3062_v59, %v2789_v58  ;;  %v479_v61 = vpop.f32.mrb[3].mxu0 }
 0x354   :  { %v480_v62 = vadd.f32 %v2789_v58, %v479_v61 }
 0x355   :  { %492 = vrot.lane.b32.xlu1 %v3908_v60, %s3812_s1 }
 0x356   :  { %490 = vrot.lane.b32.xlu0 %v480_v62, %s3812_s1  ;;  %3079 = vmatprep.mubr.msk.f32.mxu1 %vm95_vm0, %v480_v62  ;;  %v3917_v63 = vpack.i.bf16 %v3908_v60, %v480_v62 }
 0x359   :  { %494 = vrot.lane.b32.xlu1 %v480_v62, %s3813_s3 }
 0x35a   :  { %498 = vrot.lane.b32.xlu0 %v480_v62, %s3814_s18 }
 0x35d   :  { %496 = vrot.lane.b32.xlu1 %v3908_v60, %s3813_s3 }
 0x35e   :  { %3553 = vrot.lane.b32.xlu0 %v3917_v63, %s3815_s19 }
 0x361   :  { %500 = vrot.lane.b32.xlu1 %v3908_v60, %s3814_s18 }
 0x3c7   :  { %v493_v0 = vpop.permute.xlu1 %492 }
 0x3c8   :  { %v491_v1 = vpop.permute.xlu0 %490 }
 0x3c9   :  { %v3925_v2 = vpack.i.bf16 %v493_v0, %v491_v1 }
 0x3cb   :  { %v495_v3 = vpop.permute.xlu1 %494  ;;  %3558 = vrot.lane.b32.xlu1 %v3925_v2, %s3815_s19 }
 0x3cc   :  { %v499_v4 = vpop.permute.xlu0 %498 }
 0x3cf   :  { %v497_v5 = vpop.permute.xlu1 %496 }
 0x3d0   :  { %v3929_v6 = vpack.i.bf16 %v497_v5, %v495_v3  ;;  %v3554_v7 = vpop.permute.xlu0 %3553 }
 0x3d1   :  { %v3556_v9 = vunpack.i.h.bf16 %v3554_v7  ;;  %v3555_v10 = vunpack.i.l.bf16 %v3554_v7 }
 0x3d2   :  { %3563 = vrot.lane.b32.xlu0 %v3929_v6, %s3815_s19 }
 0x3d3   :  { %v501_v12 = vpop.permute.xlu1 %500  ;;  %v3339_v13 = vpack.c.bf16 %v3556_v9, %v3555_v10  ;;  %v381_v10 = vld [vmem:[#allocation4 + $0x67] sm:$0xff] }
 0x3d4   :  { %v3939_v14 = vpack.i.bf16 %v501_v12, %v499_v4 }
 0x3d5   :  { %3341 = vmatprep.subr.msk.bf16.mxu1 %vm3935_vm2, %v3339_v13 }
 0x3d6   :  { %3568 = vrot.lane.b32.xlu1 %v3939_v14, %s3815_s19  ;;  %3344 = vmatpush3.bf16.xpose.msk.msra.mxu1 %vm3935_vm2, %v3339_v13 }
 0x3d7   :  { %361 = vrot.lane.b32.xlu0 %v360_v19, %s3816_s22 }
 0x3da   :  { %364 = vrot.lane.b32.xlu1 %v360_v19, %s3817_s23 }
 0x3db   :  { %367 = vrot.lane.b32.xlu0 %v360_v19, %s3818_s24 }
 0x43d   :  { %v3559_v20 = vpop.permute.xlu1 %3558 }
 0x43e   :  { %v3561_v21 = vunpack.i.h.bf16 %v3559_v20  ;;  %v3560_v22 = vunpack.i.l.bf16 %v3559_v20 }
 0x440   :  { %v3345_v23 = vpack.c.bf16 %v3561_v21, %v3560_v22 }
 0x442   :  { %3347 = vmatprep.subr.msk.bf16.mxu1 %vm3935_vm2, %v3345_v23 }
 0x443   :  { %3350 = vmatpush3.bf16.xpose.msk.msra.mxu1 %vm3935_vm2, %v3345_v23 }
 0x444   :  { %v3564_v24 = vpop.permute.xlu0 %3563 }
 0x445   :  { %v3566_v25 = vunpack.i.h.bf16 %v3564_v24  ;;  %v3565_v8 = vunpack.i.l.bf16 %v3564_v24  ;;  %v383_v24 = vld [vmem:[#allocation4 + $0x77] sm:$0xff] }
 0x447   :  { %v3351_v26 = vpack.c.bf16 %v3566_v25, %v3565_v8 }
 0x448   :  { %v3569_v27 = vpop.permute.xlu1 %3568 }
 0x449   :  { %v3571_v28 = vunpack.i.h.bf16 %v3569_v27  ;;  %v3570_v29 = vunpack.i.l.bf16 %v3569_v27  ;;  %3353 = vmatprep.subr.msk.bf16.mxu1 %vm3935_vm2, %v3351_v26  ;;  %v362_v31 = vpop.permute.xlu0 %361 }
 0x44a   :  { %v371_v32 = vsel %vm370_vm3, %v355_v17, %v362_v31 }
 0x44b   :  { %v3357_v30 = vpack.c.bf16 %v3571_v28, %v3570_v29  ;;  %3356 = vmatpush3.bf16.xpose.msk.msra.mxu1 %vm3935_vm2, %v3351_v26 }
 0x44c   :  { %v365_v33 = vpop.permute.xlu1 %364 }
 0x44d   :  { %3359 = vmatprep.subr.msk.bf16.mxu1 %vm3935_vm2, %v3357_v30  ;;  %v372_v34 = vsel %vm49_vm1, %v371_v32, %v365_v33  ;;  %v368_v35 = vpop.permute.xlu0 %367 }
 0x44e   :  { %v374_v36 = vsel %vm373_vm4, %v372_v34, %v368_v35 }
 0x44f   :  { %vm375_vm5 = vcmp.gt.f32.partialorder %v374_v36, 0.5 }
 0x450   :  { %v384_v38 = vsel %vm375_vm5, 1, %v3819_v37 }
 0x451   :  { %v388_v39 = vrot.slane %v384_v38, %v359_v18 }
 0x453   :  { %3362 = vmatpush3.bf16.xpose.msk.msra.mxu1 %vm3935_vm2, %v3357_v30  ;;  %vm389_vm6 = vcmp.eq.s32.totalorder %v388_v39, 1 }
 0x454   :  { %v3974_v42 = vsel %vm389_vm6, %v377_v40, -3.4028235e+38  ;;  %v3978_v48 = vsel %vm389_vm6, %v376_v43, -3.4028235e+38  ;;  %v3998_v19 = vsel %vm389_vm6, %v381_v10, -3.4028235e+38 }
 0x455   :  { %v4003_v25 = vsel %vm389_vm6, %v382_v16, -3.4028235e+38  ;;  %v4007_v26 = vsel %vm389_vm6, %v383_v24, -3.4028235e+38 }
 0x45a   :  { %3080 = vmatmul.mubr.msk.f32.vlgmr.msra.gmra.mrb[0].mxu1 %vm95_vm0, %v3908_v60  ;;  %v3984_v60 = vsel %vm389_vm6, %v378_v51, -3.4028235e+38 }
 0x45b   :  { %3082 = vmatprep.mubr.msk.f32.mxu1 %vm95_vm0, %v491_v1  ;;  %v380_v1 = vld [vmem:[#allocation4 + $0x5f] sm:$0xff] }
 0x45e   :  { %3083 = vmatmul.mubr.msk.f32.gmra.mrb[2].mxu1 %vm95_vm0, %v493_v0  ;;  %v3988_v0 = vsel %vm389_vm6, %v379_v56, -3.4028235e+38 }
 0x45f   :  { %3085 = vmatprep.mubr.msk.f32.mxu1 %vm95_vm0, %v495_v3 }
 0x462   :  { %3086 = vmatmul.mubr.msk.f32.gmra.mrb[4].mxu1 %vm95_vm0, %v497_v5 }
 0x463   :  { %3088 = vmatprep.mubr.msk.f32.mxu1 %vm95_vm0, %v499_v4 }
 0x466   :  { %3089 = vmatmul.mubr.msk.f32.gmra.mrb[6].mxu1 %vm95_vm0, %v501_v12  ;;  %v3993_v12 = vsel %vm389_vm6, %v380_v1, -3.4028235e+38 }
 0x52d   :  { %v3081_v41 = vpop.f32.mrb[0].mxu1 }
 0x52e   :  { %v656_v44 = vmul.f32 0.35355338, %v3081_v41  ;;  %v616_v45 = vpop.f32.mrb[1].mxu1 }
 0x52f   :  { %v655_v46 = vmul.f32 0.35355338, %v616_v45 }
 0x530   :  { %v664_v47 = vadd.f32 %v656_v44, %v3974_v42 }
 0x531   :  { %v3084_v49 = vpop.f32.mrb[2].mxu1  ;;  %v663_v50 = vadd.f32 %v655_v46, %v3978_v48 }
 0x532   :  { %v658_v52 = vmul.f32 0.35355338, %v3084_v49  ;;  %v626_v53 = vpop.f32.mrb[3].mxu1  ;;  %v675_v54 = vsel %vm671_vm7, %v664_v47, -inf }
 0x533   :  { %v657_v58 = vmul.f32 0.35355338, %v626_v53  ;;  %676 = vmax.xlane.f32.xlu0 %v675_v54  ;;  %v672_v59 = vsel %vm671_vm7, %v663_v50, -inf }
 0x534   :  { %673 = vmax.xlane.f32.xlu1 %v672_v59  ;;  %v666_v4 = vadd.f32 %v658_v52, %v3988_v0 }
 0x535   :  { %v3087_v61 = vpop.f32.mrb[4].mxu1  ;;  %v665_v62 = vadd.f32 %v657_v58, %v3984_v60 }
 0x536   :  { %v636_v3 = vpop.f32.mrb[5].mxu1  ;;  %v660_v5 = vmul.f32 0.35355338, %v3087_v61  ;;  %v681_v18 = vsel %vm671_vm7, %v666_v4, -inf }
 0x537   :  { %v659_v7 = vmul.f32 0.35355338, %v636_v3  ;;  %v678_v9 = vsel %vm671_vm7, %v665_v62, -inf }
 0x538   :  { %679 = vmax.xlane.f32.xlu0 %v678_v9  ;;  %v668_v23 = vadd.f32 %v660_v5, %v3998_v19 }
 0x539   :  { %v3090_v13 = vpop.f32.mrb[6].mxu1  ;;  %v667_v15 = vadd.f32 %v659_v7, %v3993_v12 }
 0x53a   :  { %v646_v17 = vpop.f32.mrb[7].mxu1  ;;  %v662_v20 = vmul.f32 0.35355338, %v3090_v13  ;;  %v687_v27 = vsel %vm671_vm7, %v668_v23, -inf }
 0x53b   :  { %v661_v21 = vmul.f32 0.35355338, %v646_v17  ;;  %v684_v22 = vsel %vm671_vm7, %v667_v15, -inf }
 0x53c   :  { %682 = vmax.xlane.f32.xlu0 %v681_v18  ;;  %685 = vmax.xlane.f32.xlu1 %v684_v22  ;;  %v670_v29 = vadd.f32 %v662_v20, %v4007_v26 }
 0x53d   :  { %v669_v8 = vadd.f32 %v661_v21, %v4003_v25 }
 0x53e   :  { %v693_v30 = vsel %vm671_vm7, %v670_v29, -inf }
 0x53f   :  { %v690_v28 = vsel %vm671_vm7, %v669_v8, -inf }
 0x540   :  { %688 = vmax.xlane.f32.xlu0 %v687_v27  ;;  %691 = vmax.xlane.f32.xlu1 %v690_v28 }
 0x544   :  { %694 = vmax.xlane.f32.xlu0 %v693_v30 }
 0x551   :  { %3573 = vrot.lane.b32.xlu1 %v3917_v63, %s3820_s2 }
 0x5c0   :  { %v677_v31 = vpop.xlane.xlu0 %676 }
 0x5c1   :  { %v697_v32 = vsub.f32 %v664_v47, %v677_v31  ;;  %v674_v33 = vpop.xlane.xlu1 %673 }
 0x5c2   :  { %v696_v34 = vsub.f32 %v663_v50, %v674_v33 }
 0x5c3   :  { %v706_v35 = vmul.f32 1.442695, %v697_v32 }
 0x5c4   :  { %v704_v36 = vmul.f32 1.442695, %v696_v34 }
 0x5c5   :  { %3640 = vpow2.f32 %v706_v35  ;;  %v680_v37 = vpop.xlane.xlu0 %679 }
 0x5c6   :  { %3642 = vpow2.f32 %v704_v36  ;;  %v698_v38 = vsub.f32 %v665_v62, %v680_v37 }
 0x5c8   :  { %v708_v39 = vmul.f32 1.442695, %v698_v38 }
 0x5c9   :  { %v683_v40 = vpop.xlane.xlu0 %682  ;;  %v686_v41 = vpop.xlane.xlu1 %685 }
 0x5ca   :  { %3644 = vpow2.f32 %v708_v39  ;;  %v699_v43 = vsub.f32 %v666_v4, %v683_v40  ;;  %v700_v44 = vsub.f32 %v667_v15, %v686_v41 }
 0x5cc   :  { %v710_v45 = vmul.f32 1.442695, %v699_v43  ;;  %v712_v46 = vmul.f32 1.442695, %v700_v44 }
 0x5cd   :  { %v689_v49 = vpop.xlane.xlu0 %688  ;;  %v692_v63 = vpop.xlane.xlu1 %691 }
 0x5ce   :  { %3646 = vpow2.f32 %v710_v45  ;;  %v701_v47 = vsub.f32 %v668_v23, %v689_v49  ;;  %v702_v53 = vsub.f32 %v669_v8, %v692_v63 }
 0x5cf   :  { %v4015_v51 = vpop.eup %3640  ;;  %3648 = vpow2.f32 %v712_v46 }
 0x5d0   :  { %v3643_v50 = vpop.eup %3642  ;;  %v714_v52 = vmul.f32 1.442695, %v701_v47  ;;  %v723_v54 = vsel %vm671_vm7, %v4015_v51, 0.0  ;;  %v716_v4 = vmul.f32 1.442695, %v702_v53 }
 0x5d1   :  { %724 = vadd.xlane.f32.xlu0 %v723_v54  ;;  %v695_v56 = vpop.xlane.xlu0 %694  ;;  %v3574_v58 = vpop.permute.xlu1 %3573  ;;  %v720_v59 = vsel %vm671_vm7, %v3643_v50, 0.0 }
 0x5d2   :  { %3650 = vpow2.f32 %v714_v52  ;;  %v703_v61 = vsub.f32 %v670_v29, %v695_v56  ;;  %v3576_v62 = vunpack.i.h.bf16 %v3574_v58  ;;  %v3575_v1 = vunpack.i.l.bf16 %v3574_v58  ;;  %721 = vadd.xlane.f32.xlu1 %v720_v59 }
 0x5d4   :  { %v4020_v3 = vpop.eup %3644  ;;  %v718_v5 = vmul.f32 1.442695, %v703_v61  ;;  %v3363_v7 = vpack.c.bf16 %v3576_v62, %v3575_v1  ;;  %v944_v62 = vld [vmem:[#allocation4 + $0xa0] sm:$0xff]  ;;  %v945_v1 = vld [vmem:[#allocation4 + $0xa8] sm:$0xff] }
 0x5d5   :  { %v726_v9 = vsel %vm671_vm7, %v4020_v3, 0.0 }
 0x5d6   :  { %3652 = vpow2.f32 %v718_v5  ;;  %727 = vadd.xlane.f32.xlu1 %v726_v9  ;;  %3364 = vmatprep.subr.bf16.mxu0 %v3363_v7  ;;  %v947_v5 = vld [vmem:[#allocation4 + $0xb8] sm:$0xff] }
 0x5d7   :  { %3366 = vmatpush3.bf16.msra.mxu0 %v3363_v7  ;;  %3654 = vpow2.f32 %v716_v4  ;;  %v946_v4 = vld [vmem:[#allocation4 + $0xb0] sm:$0xff] }
 0x5d8   :  { %v4024_v10 = vpop.eup %3646  ;;  %v3383_v7 = vpack.c.bf16 %v947_v5, %v946_v4  ;;  %v2819_v4 = vld [vmem:[#allocation4 + $0xc1] ss:$0 sm:$0xff] }
 0x5d9   :  { %v4026_v13 = vpop.eup %3648  ;;  %v729_v15 = vsel %vm671_vm7, %v4024_v10, 0.0 }
 0x5da   :  { %730 = vadd.xlane.f32.xlu0 %v729_v15  ;;  %v732_v16 = vsel %vm671_vm7, %v4026_v13, 0.0 }
 0x5db   :  { %733 = vadd.xlane.f32.xlu1 %v732_v16 }
 0x5dc   :  { %v4032_v17 = vpop.eup %3650 }
 0x5dd   :  { %v735_v18 = vsel %vm671_vm7, %v4032_v17, 0.0 }
 0x5de   :  { %736 = vadd.xlane.f32.xlu0 %v735_v18 }
 0x5e0   :  { %v4036_v20 = vpop.eup %3652 }
 0x5e1   :  { %v741_v21 = vsel %vm671_vm7, %v4036_v20, 0.0  ;;  %v3655_v22 = vpop.eup %3654 }
 0x5e2   :  { %742 = vadd.xlane.f32.xlu0 %v741_v21  ;;  %v738_v23 = vsel %vm671_vm7, %v3655_v22, 0.0 }
 0x5e6   :  { %739 = vadd.xlane.f32.xlu0 %v738_v23 }
 0x5ec   :  { %3583 = vrot.lane.b32.xlu1 %v3929_v6, %s3820_s2 }
 0x5f0   :  { %3588 = vrot.lane.b32.xlu1 %v3939_v14, %s3820_s2 }
 0x5fc   :  { %3578 = vrot.lane.b32.xlu0 %v3925_v2, %s3820_s2 }
 0x65e   :  { %v725_v8 = vpop.xlane.xlu0 %724 }
 0x65f   :  { %v722_v24 = vpop.xlane.xlu1 %721 }
 0x660   :  { %3656 = vrcp.f32 %v722_v24 }
 0x661   :  { %3658 = vrcp.f32 %v725_v8 }
 0x663   :  { %v728_v27 = vpop.xlane.xlu1 %727 }
 0x664   :  { %3660 = vrcp.f32 %v728_v27 }
 0x667   :  { %v731_v28 = vpop.xlane.xlu0 %730 }
 0x668   :  { %v734_v32 = vpop.xlane.xlu1 %733  ;;  %3662 = vrcp.f32 %v731_v28 }
 0x669   :  { %3664 = vrcp.f32 %v734_v32 }
 0x66a   :  { %v3657_v29 = vpop.eup %3656 }
 0x66b   :  { %v737_v30 = vpop.xlane.xlu0 %736  ;;  %v745_v31 = vmul.f32 %v3657_v29, %v3643_v50  ;;  %v3659_v45 = vpop.eup %3658 }
 0x66c   :  { %v3584_v34 = vpop.permute.xlu1 %3583  ;;  %3666 = vrcp.f32 %v737_v30  ;;  %v747_v49 = vmul.f32 %v3659_v45, %v4015_v51 }
 0x66d   :  { %3107 = vmatprep.mubr.msk.f32.mxu0 %vm671_vm7, %v745_v31  ;;  %v3586_v36 = vunpack.i.h.bf16 %v3584_v34  ;;  %v3585_v14 = vunpack.i.l.bf16 %v3584_v34  ;;  %v2816_v34 = vld [vmem:[#allocation4 + $0xc0] ss:$0 sm:$0xff] }
 0x66e   :  { %v3661_v46 = vpop.eup %3660 }
 0x66f   :  { %v743_v33 = vpop.xlane.xlu0 %742  ;;  %v3371_v40 = vpack.c.bf16 %v3586_v36, %v3585_v14  ;;  %v749_v47 = vmul.f32 %v3661_v46, %v4020_v3  ;;  %v3379_v3 = vpack.c.bf16 %v945_v1, %v944_v62 }
 0x670   :  { %v3589_v2 = vpop.permute.xlu1 %3588 }
 0x671   :  { %v3591_v41 = vunpack.i.h.bf16 %v3589_v2  ;;  %v3590_v43 = vunpack.i.l.bf16 %v3589_v2 }
 0x672   :  { %v3663_v63 = vpop.eup %3662 }
 0x673   :  { %v740_v6 = vpop.xlane.xlu0 %739  ;;  %v3375_v44 = vpack.c.bf16 %v3591_v41, %v3590_v43  ;;  %v3665_v50 = vpop.eup %3664  ;;  %v751_v52 = vmul.f32 %v3663_v63, %v4024_v10 }
 0x674   :  { %3668 = vrcp.f32 %v740_v6  ;;  %v753_v54 = vmul.f32 %v3665_v50, %v4026_v13  ;;  %v1077_v50 = vld [vmem:[#allocation4 + $0xcb] sm:$0xff] }
 0x675   :  { %3670 = vrcp.f32 %v743_v33 }
 0x676   :  { %v3667_v53 = vpop.eup %3666 }
 0x677   :  { %v3579_v35 = vpop.permute.xlu0 %3578  ;;  %v755_v51 = vmul.f32 %v3667_v53, %v4032_v17  ;;  %v1078_v53 = vld [vmem:[#allocation4 + $0xd3] sm:$0xff] }
 0x678   :  { %v3581_v37 = vunpack.i.h.bf16 %v3579_v35  ;;  %v3580_v38 = vunpack.i.l.bf16 %v3579_v35 }
 0x67a   :  { %v3367_v39 = vpack.c.bf16 %v3581_v37, %v3580_v38 }
 0x67c   :  { %3368 = vmatprep.subr.bf16.mxu0 %v3367_v39 }
 0x67d   :  { %3370 = vmatpush3.bf16.msra.mxu0 %v3367_v39 }
 0x67e   :  { %3372 = vmatprep.subr.bf16.mxu0 %v3371_v40  ;;  %v3669_v56 = vpop.eup %3668 }
 0x67f   :  { %v3671_v58 = vpop.eup %3670  ;;  %v757_v59 = vmul.f32 %v3669_v56, %v3655_v22 }
 0x680   :  { %v759_v61 = vmul.f32 %v3671_v58, %v4036_v20 }
 0x681   :  { %3374 = vmatpush3.bf16.msra.mxu0 %v3371_v40 }
 0x682   :  { %3376 = vmatprep.subr.bf16.mxu0 %v3375_v44 }
 0x685   :  { %3378 = vmatpush3.bf16.msra.mxu0 %v3375_v44 }
 0x686   :  { %3380 = vmatprep.subr.bf16.mxu0 %v3379_v3 }
 0x688   :  { %3108 = vmatmul.mubr.msk.f32.vlgmr.msra.gmra.mrb[4].mxu0 %vm671_vm7, %v747_v49 }
 0x689   :  { %3110 = vmatprep.mubr.msk.f32.mxu0 %vm671_vm7, %v749_v47  ;;  %3382 = vmatpush3.bf16.msra.mxu0 %v3379_v3 }
 0x68a   :  { %3384 = vmatprep.subr.bf16.mxu0 %v3383_v7 }
 0x68c   :  { %3111 = vmatmul.mubr.msk.f32.gmra.mrb[6].mxu0 %vm671_vm7, %v751_v52 }
 0x68d   :  { %3113 = vmatprep.mubr.msk.f32.mxu0 %vm671_vm7, %v753_v54  ;;  %3386 = vmatpush3.bf16.msra.mxu0 %v3383_v7  ;;  %v1079_v54 = vld [vmem:[#allocation4 + $0xdb] sm:$0xff] }
 0x68e   :  { %v3391_v56 = vpack.c.bf16 %v1079_v54, %v1078_v53  ;;  %v2820_v7 = vld [vmem:[#allocation4 + $0xc2] ss:$0 sm:$0xff] }
 0x690   :  { %3114 = vmatmul.mubr.msk.f32.gmra.mrb[8].mxu0 %vm671_vm7, %v755_v51 }
 0x691   :  { %3116 = vmatprep.mubr.msk.f32.mxu0 %vm671_vm7, %v757_v59 }
 0x694   :  { %3117 = vmatmul.mubr.msk.f32.gmra.mrb[10].mxu0 %vm671_vm7, %v759_v61 }
 0x75b   :  { %v3109_v9 = vpop.f32.mrb[4].mxu0 }
 0x75c   :  { %v874_v10 = vpop.f32.mrb[5].mxu0 }
 0x75f   :  { %v3112_v13 = vpop.f32.mrb[6].mxu0 }
 0x760   :  { %917 = vrot.lane.b32.xlu1 %v3112_v13, %s3810_s26  ;;  %v884_v15 = vpop.f32.mrb[7].mxu0 }
 0x763   :  { %v3115_v16 = vpop.f32.mrb[8].mxu0 }
 0x764   :  { %915 = vrot.lane.b32.xlu1 %v884_v15, %s3810_s26  ;;  %925 = vrot.lane.b32.xlu0 %v3115_v16, %s3816_s22  ;;  %v894_v17 = vpop.f32.mrb[9].mxu0 }
 0x767   :  { %v3118_v18 = vpop.f32.mrb[10].mxu0 }
 0x768   :  { %923 = vrot.lane.b32.xlu1 %v894_v17, %s3816_s22  ;;  %933 = vrot.lane.b32.xlu0 %v3118_v18, %s3821_s25  ;;  %v904_v20 = vpop.f32.mrb[11].mxu0  ;;  %v1220_v18 = vld [vmem:[#allocation4 + $0xe4] sm:$0xff] }
 0x76c   :  { %931 = vrot.lane.b32.xlu1 %v904_v20, %s3821_s25  ;;  %v1221_v20 = vld [vmem:[#allocation4 + $0xec] sm:$0xff] }
 0x7d2   :  { %v918_v21 = vpop.permute.xlu1 %917 }
 0x7d3   :  { %v938_v28 = vsel %vm95_vm0, %v3109_v9, %v918_v21  ;;  %v3395_v21 = vpack.c.bf16 %v1221_v20, %v1220_v18 }
 0x7d5   :  { %3396 = vmatprep.subr.bf16.mxu1 %v3395_v21 }
 0x7d6   :  { %v916_v22 = vpop.permute.xlu1 %915  ;;  %v926_v23 = vpop.permute.xlu0 %925  ;;  %3398 = vmatpush3.bf16.msra.mxu1 %v3395_v21 }
 0x7d7   :  { %v937_v8 = vsel %vm95_vm0, %v874_v10, %v916_v22  ;;  %v940_v31 = vsel %vm370_vm3, %v938_v28, %v926_v23  ;;  %v1222_v22 = vld [vmem:[#allocation4 + $0xf4] sm:$0xff]  ;;  %v1223_v23 = vld [vmem:[#allocation4 + $0xfc] sm:$0xff] }
 0x7da   :  { %v924_v24 = vpop.permute.xlu1 %923  ;;  %v934_v27 = vpop.permute.xlu0 %933 }
 0x7db   :  { %v939_v29 = vsel %vm370_vm3, %v937_v8, %v924_v24  ;;  %v943_v33 = vsel %vm941_vm8, %v940_v31, %v934_v27  ;;  %v3399_v24 = vpack.c.bf16 %v1223_v23, %v1222_v22  ;;  %v1224_v8 = vld [vmem:[#allocation4 + $0x104] sm:$0xff]  ;;  %v1225_v27 = vld [vmem:[#allocation4 + $0x10c] sm:$0xff] }
 0x7dc   :  { %v3403_v28 = vpack.c.bf16 %v1225_v27, %v1224_v8 }
 0x7dd   :  { %3400 = vmatprep.subr.bf16.mxu1 %v3399_v24 }
 0x7de   :  { %v932_v30 = vpop.permute.xlu1 %931  ;;  %3402 = vmatpush3.bf16.msra.mxu1 %v3399_v24 }
 0x7df   :  { %v942_v32 = vsel %vm941_vm8, %v939_v29, %v932_v30  ;;  %3404 = vmatprep.subr.bf16.mxu1 %v3403_v28  ;;  %v1226_v29 = vld [vmem:[#allocation4 + $0x114] sm:$0xff]  ;;  %v1227_v30 = vld [vmem:[#allocation4 + $0x11c] sm:$0xff] }
 0x7e0   :  { %3127 = vmatprep.mubr.msk.f32.mxu0 %vm49_vm1, %v942_v32  ;;  %v3407_v31 = vpack.c.bf16 %v1227_v30, %v1226_v29  ;;  %v1228_v32 = vld [vmem:[#allocation4 + $0x124] sm:$0xff] }
 0x7e1   :  { %3128 = vmatmul.mubr.msk.f32.vlgmr.msra.gmra.mrb[12].mxu0 %vm49_vm1, %v943_v33  ;;  %v1229_v33 = vld [vmem:[#allocation4 + $0x12c] sm:$0xff] }
 0x7e2   :  { %3406 = vmatpush3.bf16.msra.mxu1 %v3403_v28 }
 0x7e3   :  { %3408 = vmatprep.subr.bf16.mxu1 %v3407_v31 }
 0x7e6   :  { %3410 = vmatpush3.bf16.msra.mxu1 %v3407_v31 }
 0x8b4   :  { %v3129_v6 = vpop.f32.mrb[12].mxu0 }
 0x8b5   :  { %v1031_v35 = vadd.f32 %v3129_v6, %v2816_v34  ;;  %v1025_v36 = vpop.f32.mrb[13].mxu0  ;;  %v1230_v6 = vld [vmem:[#allocation4 + $0x134] sm:$0xff] }
 0x8b6   :  { %v1026_v14 = vadd.f32 %v2816_v34, %v1025_v36  ;;  %v3411_v34 = vpack.c.bf16 %v1229_v33, %v1228_v32 }
 0x8b7   :  { %v1035_v37 = vadd.f32 %v1031_v35, %v3904_v57  ;;  %v1231_v35 = vld [vmem:[#allocation4 + $0x13c] sm:$0xff] }
 0x8b8   :  { %v1034_v38 = vadd.f32 %v1026_v14, %v3900_v55  ;;  %v1076_v55 = vld [vmem:[#allocation4 + $0xc3] sm:$0xff]  ;;  %3412 = vmatprep.subr.bf16.mxu1 %v3411_v34  ;;  %v3415_v36 = vpack.c.bf16 %v1231_v35, %v1230_v6  ;;  %v3822_v6 = vmov -1.0  }
 0x8b9   :  { %v1041_v2 = vsel %vm49_vm1, %v1035_v37, 0.0  ;;  %v3387_v52 = vpack.c.bf16 %v1077_v50, %v1076_v55  ;;  %3414 = vmatpush3.bf16.msra.mxu1 %v3411_v34  ;;  %v1232_v14 = vld [vmem:[#allocation4 + $0x144] sm:$0xff] }
 0x8ba   :  { %1042 = vadd.xlane.f32.xlu0 %v1041_v2  ;;  %v1038_v39 = vsel %vm49_vm1, %v1034_v38, 0.0  ;;  %3416 = vmatprep.subr.bf16.mxu1 %v3415_v36  ;;  %v1234_v2 = vld [vmem:[#allocation4 + $0x154] sm:$0xff] }
 0x8bb   :  { %1039 = vadd.xlane.f32.xlu1 %v1038_v39  ;;  %3388 = vmatprep.subr.bf16.mxu0 %v3387_v52  ;;  %v1235_v39 = vld [vmem:[#allocation4 + $0x15c] sm:$0xff] }
 0x8bc   :  { %3390 = vmatpush3.bf16.msra.mxu0 %v3387_v52 }
 0x8bd   :  { %3392 = vmatprep.subr.bf16.mxu0 %v3391_v56  ;;  %3418 = vmatpush3.bf16.msra.mxu1 %v3415_v36 }
 0x8c0   :  { %3394 = vmatpush3.bf16.msra.mxu0 %v3391_v56 }
 0x947   :  { %v1043_v40 = vpop.xlane.xlu0 %1042 }
 0x948   :  { %v1045_v41 = vmul.f32 0.03125, %v1043_v40  ;;  %v1040_v43 = vpop.xlane.xlu1 %1039  ;;  %v3423_v40 = vpack.c.bf16 %v1235_v39, %v1234_v2 }
 0x949   :  { %v1044_v44 = vmul.f32 0.03125, %v1040_v43 }
 0x94a   :  { %v1047_v45 = vsub.f32 %v1035_v37, %v1045_v41  ;;  %v1233_v37 = vld [vmem:[#allocation4 + $0x14c] sm:$0xff]  ;;  %v2821_v41 = vld [vmem:[#allocation4 + $0xe3] ss:$0 sm:$0xff] }
 0x94b   :  { %v1046_v46 = vsub.f32 %v1034_v38, %v1044_v44  ;;  %v3419_v38 = vpack.c.bf16 %v1233_v37, %v1232_v14 }
 0x94c   :  { %v1049_v47 = vmul.f32 %v1047_v45, %v1047_v45 }
 0x94d   :  { %v1048_v49 = vmul.f32 %v1046_v46, %v1046_v46  ;;  %3420 = vmatprep.subr.bf16.mxu1 %v3419_v38 }
 0x94e   :  { %v1053_v57 = vsel %vm49_vm1, %v1049_v47, 0.0  ;;  %3422 = vmatpush3.bf16.msra.mxu1 %v3419_v38 }
 0x94f   :  { %v1050_v63 = vsel %vm49_vm1, %v1048_v49, 0.0  ;;  %3424 = vmatprep.subr.bf16.mxu1 %v3423_v40 }
 0x950   :  { %1051 = vadd.xlane.f32.xlu0 %v1050_v63 }
 0x952   :  { %3426 = vmatpush3.bf16.msra.mxu1 %v3423_v40 }
 0x954   :  { %1054 = vadd.xlane.f32.xlu0 %v1053_v57 }
 0x9dd   :  { %v1052_v51 = vpop.xlane.xlu0 %1051 }
 0x9de   :  { %v1056_v58 = vmul.f32 0.03125, %v1052_v51 }
 0x9e0   :  { %v1058_v59 = vadd.f32 1e-12, %v1056_v58 }
 0x9e1   :  { %v1055_v61 = vpop.xlane.xlu0 %1054 }
 0x9e2   :  { %3672 = vrsqrt.f32 %v1058_v59  ;;  %v1057_v62 = vmul.f32 0.03125, %v1055_v61 }
 0x9e4   :  { %v1059_v1 = vadd.f32 1e-12, %v1057_v62 }
 0x9e6   :  { %3674 = vrsqrt.f32 %v1059_v1 }
 0x9ec   :  { %v3673_v3 = vpop.eup %3672 }
 0x9ed   :  { %v1062_v5 = vmul.f32 %v3673_v3, %v1046_v46 }
 0x9ef   :  { %v1068_v9 = vmul.f32 %v2819_v4, %v1062_v5 }
 0x9f0   :  { %v3675_v10 = vpop.eup %3674 }
 0x9f1   :  { %v1063_v13 = vmul.f32 %v3675_v10, %v1047_v45  ;;  %v4081_v15 = vadd.f32 %v2820_v7, %v1068_v9 }
 0x9f3   :  { %v1069_v16 = vmul.f32 %v2819_v4, %v1063_v13  ;;  %3138 = vmatprep.mubr.msk.f32.mxu0 %vm49_vm1, %v4081_v15 }
 0x9f5   :  { %v4085_v17 = vadd.f32 %v2820_v7, %v1069_v16 }
 0x9f7   :  { %3139 = vmatmul.mubr.msk.f32.vlgmr.msra.gmra.mrb[14].mxu0 %vm49_vm1, %v4085_v17 }
 0xaca   :  { %v3140_v43 = vpop.f32.mrb[14].mxu0 }
 0xacb   :  { %v1163_v44 = vadd.f32 %v3140_v43, %v2821_v41  ;;  %v1157_v45 = vpop.f32.mrb[15].mxu0 }
 0xacc   :  { %v1158_v46 = vadd.f32 %v2821_v41, %v1157_v45 }
 0xacd   :  { %v1169_v49 = vmul.f32 0.70710677, %v1163_v44  ;;  %v1167_v41 = vmul.f32 0.5, %v1163_v44 }
 0xace   :  { %v1168_v63 = vmul.f32 0.70710677, %v1158_v46  ;;  %v1166_v39 = vmul.f32 0.5, %v1158_v46 }
 0xacf   :  { %v1175_v47 = vand.u32 2147483647, %v1169_v49  ;;  %vm1171_vm9 = vcmp.ge.f32.partialorder %v1169_v49, 0.0  ;;  %v2824_v49 = vld [vmem:[#allocation4 + $0x164] ss:$0 sm:$0xff] }
 0xad0   :  { %v1174_v57 = vand.u32 2147483647, %v1168_v63  ;;  %vm1170_vm10 = vcmp.ge.f32.partialorder %v1168_v63, 0.0  ;;  %v1173_v35 = vsel %vm1171_vm9, 1.0, %v3822_v6 }
 0xad1   :  { %v1177_v55 = vmul.f32 0.3275911, %v1175_v47  ;;  %v1203_v54 = vsub.f32 0.0, %v1175_v47  ;;  %v1172_v37 = vsel %vm1170_vm10, 1.0, %v3822_v6 }
 0xad2   :  { %v1176_v50 = vmul.f32 0.3275911, %v1174_v57  ;;  %v1202_v56 = vsub.f32 0.0, %v1174_v57 }
 0xad3   :  { %v1179_v52 = vadd.f32 1.0, %v1177_v55  ;;  %v1205_v58 = vmul.f32 %v1203_v54, %v1175_v47 }
 0xad4   :  { %v1178_v53 = vadd.f32 1.0, %v1176_v50  ;;  %v1204_v62 = vmul.f32 %v1202_v56, %v1174_v57 }
 0xad5   :  { %3676 = vrcp.f32 %v1179_v52  ;;  %v1208_v4 = vmul.f32 1.442695, %v1205_v58 }
 0xad6   :  { %3678 = vrcp.f32 %v1178_v53  ;;  %v1206_v9 = vmul.f32 1.442695, %v1204_v62 }
 0xad7   :  { %3680 = vpow2.f32 %v1208_v4 }
 0xad8   :  { %3682 = vpow2.f32 %v1206_v9 }
 0xadf   :  { %v3677_v51 = vpop.eup %3676 }
 0xae0   :  { %v3679_v59 = vpop.eup %3678  ;;  %v1185_v61 = vmul.f32 1.0614054, %v3677_v51 }
 0xae1   :  { %v1184_v1 = vmul.f32 1.0614054, %v3679_v59  ;;  %v3681_v29 = vpop.eup %3680 }
 0xae2   :  { %v1187_v3 = vadd.f32 -1.4531521, %v1185_v61  ;;  %v3683_v31 = vpop.eup %3682 }
 0xae3   :  { %v1186_v5 = vadd.f32 -1.4531521, %v1184_v1 }
 0xae4   :  { %v1189_v7 = vmul.f32 %v3677_v51, %v1187_v3  ;;  %v1359_v3 = vld [vmem:[#allocation4 + $0x16f] sm:$0xff] }
 0xae5   :  { %v1188_v10 = vmul.f32 %v3679_v59, %v1186_v5  ;;  %v1360_v5 = vld [vmem:[#allocation4 + $0x177] sm:$0xff] }
 0xae6   :  { %v1191_v13 = vadd.f32 1.4214138, %v1189_v7  ;;  %v1361_v7 = vld [vmem:[#allocation4 + $0x17f] sm:$0xff] }
 0xae7   :  { %v1190_v16 = vadd.f32 1.4214138, %v1188_v10  ;;  %v3431_v9 = vpack.c.bf16 %v1361_v7, %v1360_v5 }
 0xae8   :  { %v1193_v18 = vmul.f32 %v3677_v51, %v1191_v13 }
 0xae9   :  { %v1192_v20 = vmul.f32 %v3679_v59, %v1190_v16 }
 0xaea   :  { %v1195_v21 = vadd.f32 -0.28449672, %v1193_v18 }
 0xaeb   :  { %v1194_v22 = vadd.f32 -0.28449672, %v1192_v20 }
 0xaec   :  { %v1197_v23 = vmul.f32 %v3677_v51, %v1195_v21 }
 0xaed   :  { %v1196_v24 = vmul.f32 %v3679_v59, %v1194_v22 }
 0xaee   :  { %v1199_v8 = vadd.f32 0.2548296, %v1197_v23  ;;  %v2825_v23 = vld [vmem:[#allocation4 + $0x165] ss:$0 sm:$0xff] }
 0xaef   :  { %v1198_v27 = vadd.f32 0.2548296, %v1196_v24 }
 0xaf0   :  { %v1201_v28 = vmul.f32 %v3677_v51, %v1199_v8 }
 0xaf1   :  { %v1200_v30 = vmul.f32 %v3679_v59, %v1198_v27 }
 0xaf2   :  { %v1211_v32 = vmul.f32 %v3681_v29, %v1201_v28  ;;  %v2826_v28 = vld [vmem:[#allocation4 + $0x166] ss:$0 sm:$0xff] }
 0xaf3   :  { %v1210_v33 = vmul.f32 %v3683_v31, %v1200_v30 }
 0xaf4   :  { %v1213_v34 = vsub.f32 1.0, %v1211_v32 }
 0xaf5   :  { %v1212_v36 = vsub.f32 1.0, %v1210_v33  ;;  %v2827_v33 = vld [vmem:[#allocation4 + $0x187] ss:$0 sm:$0xff] }
 0xaf6   :  { %v1215_v14 = vmul.f32 %v1213_v34, %v1173_v35 }
 0xaf7   :  { %v1214_v38 = vmul.f32 %v1212_v36, %v1172_v37 }
 0xaf8   :  { %v1217_v2 = vadd.f32 1.0, %v1215_v14 }
 0xaf9   :  { %v1216_v40 = vadd.f32 1.0, %v1214_v38 }
 0xafa   :  { %v1219_v45 = vmul.f32 %v1217_v2, %v1167_v41 }
 0xafb   :  { %v1218_v43 = vmul.f32 %v1216_v40, %v1166_v39 }
 0xafd   :  { %3173 = vmatprep.mubr.f32.mxu1 %v1218_v43 }
 0xafe   :  { %3174 = vmatmul.mubr.f32.vlgmr.msra.gmra.mrb[8].mxu1 %v1219_v45 }
 0xbd1   :  { %v3175_v63 = vpop.f32.mrb[8].mxu1 }
 0xbd2   :  { %v1313_v47 = vadd.f32 %v3175_v63, %v2824_v49  ;;  %v1307_v57 = vpop.f32.mrb[9].mxu1 }
 0xbd3   :  { %v1308_v55 = vadd.f32 %v2824_v49, %v1307_v57 }
 0xbd4   :  { %v1317_v50 = vadd.f32 %v1313_v47, %v4085_v17 }
 0xbd5   :  { %v1316_v52 = vadd.f32 %v1308_v55, %v4081_v15  ;;  %v1358_v15 = vld [vmem:[#allocation4 + $0x167] sm:$0xff] }
 0xbd6   :  { %v1323_v53 = vsel %vm49_vm1, %v1317_v50, 0.0  ;;  %v3427_v4 = vpack.c.bf16 %v1359_v3, %v1358_v15 }
 0xbd7   :  { %1324 = vadd.xlane.f32.xlu0 %v1323_v53  ;;  %v1320_v46 = vsel %vm49_vm1, %v1316_v52, 0.0 }
 0xbd8   :  { %1321 = vadd.xlane.f32.xlu1 %v1320_v46  ;;  %3428 = vmatprep.subr.bf16.mxu0 %v3427_v4 }
 0xbd9   :  { %3430 = vmatpush3.bf16.msra.mxu0 %v3427_v4 }
 0xbda   :  { %3432 = vmatprep.subr.bf16.mxu0 %v3431_v9 }
 0xbdd   :  { %3434 = vmatpush3.bf16.msra.mxu0 %v3431_v9 }
 0xc64   :  { %v1325_v44 = vpop.xlane.xlu0 %1324 }
 0xc65   :  { %v1327_v54 = vmul.f32 0.03125, %v1325_v44  ;;  %v1322_v56 = vpop.xlane.xlu1 %1321 }
 0xc66   :  { %v1326_v51 = vmul.f32 0.03125, %v1322_v56 }
 0xc67   :  { %v1329_v58 = vsub.f32 %v1317_v50, %v1327_v54 }
 0xc68   :  { %v1328_v59 = vsub.f32 %v1316_v52, %v1326_v51 }
 0xc69   :  { %v1331_v61 = vmul.f32 %v1329_v58, %v1329_v58 }
 0xc6a   :  { %v1330_v62 = vmul.f32 %v1328_v59, %v1328_v59 }
 0xc6b   :  { %v1335_v1 = vsel %vm49_vm1, %v1331_v61, 0.0 }
 0xc6c   :  { %1336 = vadd.xlane.f32.xlu0 %v1335_v1  ;;  %v1332_v17 = vsel %vm49_vm1, %v1330_v62, 0.0 }
 0xc6d   :  { %1333 = vadd.xlane.f32.xlu1 %v1332_v17 }
 0xcf9   :  { %v1337_v10 = vpop.xlane.xlu0 %1336 }
 0xcfa   :  { %v1339_v13 = vmul.f32 0.03125, %v1337_v10  ;;  %v1334_v16 = vpop.xlane.xlu1 %1333 }
 0xcfb   :  { %v1338_v18 = vmul.f32 0.03125, %v1334_v16 }
 0xcfc   :  { %v1341_v20 = vadd.f32 1e-12, %v1339_v13 }
 0xcfd   :  { %v1340_v21 = vadd.f32 1e-12, %v1338_v18 }
 0xcfe   :  { %3684 = vrsqrt.f32 %v1341_v20 }
 0xcff   :  { %3686 = vrsqrt.f32 %v1340_v21 }
 0xd08   :  { %v3685_v22 = vpop.eup %3684 }
 0xd09   :  { %v3687_v24 = vpop.eup %3686  ;;  %v1345_v8 = vmul.f32 %v3685_v22, %v1329_v58 }
 0xd0a   :  { %v1344_v27 = vmul.f32 %v3687_v24, %v1328_v59 }
 0xd0b   :  { %v1351_v29 = vmul.f32 %v2825_v23, %v1345_v8 }
 0xd0c   :  { %v1350_v30 = vmul.f32 %v2825_v23, %v1344_v27 }
 0xd0d   :  { %v4099_v32 = vadd.f32 %v2826_v28, %v1351_v29 }
 0xd0e   :  { %v4097_v31 = vadd.f32 %v2826_v28, %v1350_v30 }
 0xd10   :  { %3184 = vmatprep.mubr.msk.f32.mxu0 %vm49_vm1, %v4097_v31 }
 0xd11   :  { %3185 = vmatmul.mubr.msk.f32.vlgmr.msra.gmra.mrb[16].mxu0 %vm49_vm1, %v4099_v32 }
 0xde4   :  { %v3186_v34 = vpop.f32.mrb[16].mxu0 }
 0xde5   :  { %v1445_v35 = vadd.f32 %v3186_v34, %v2827_v33  ;;  %v1439_v36 = vpop.f32.mrb[17].mxu0 }
 0xde6   :  { %v1440_v14 = vadd.f32 %v2827_v33, %v1439_v36 }
 0xde7   :  { %1452 = vrot.lane.b32.xlu0 %v1445_v35, %s3812_s1 }
 0xde8   :  { %1450 = vrot.lane.b32.xlu1 %v1440_v14, %s3812_s1  ;;  %3203 = vmatprep.mubr.msk.f32.mxu0 %vm95_vm0, %v1440_v14  ;;  %v4112_v37 = vpack.i.bf16 %v1445_v35, %v1440_v14 }
 0xdeb   :  { %1460 = vrot.lane.b32.xlu0 %v1445_v35, %s3814_s18 }
 0xdec   :  { %1454 = vrot.lane.b32.xlu1 %v1440_v14, %s3813_s3 }
 0xdf0   :  { %1456 = vrot.lane.b32.xlu1 %v1445_v35, %s3813_s3 }
 0xdf4   :  { %1458 = vrot.lane.b32.xlu1 %v1440_v14, %s3814_s18 }
 0xdf8   :  { %3593 = vrot.lane.b32.xlu1 %v4112_v37, %s3815_s19 }
 0xe59   :  { %v1453_v38 = vpop.permute.xlu0 %1452 }
 0xe5a   :  { %v1451_v2 = vpop.permute.xlu1 %1450 }
 0xe5b   :  { %v4116_v39 = vpack.i.bf16 %v1453_v38, %v1451_v2 }
 0xe5d   :  { %3598 = vrot.lane.b32.xlu0 %v4116_v39, %s3815_s19  ;;  %v1461_v45 = vpop.permute.xlu0 %1460 }
 0xe5e   :  { %v1455_v40 = vpop.permute.xlu1 %1454 }
 0xe62   :  { %v1457_v41 = vpop.permute.xlu1 %1456 }
 0xe63   :  { %v4120_v43 = vpack.i.bf16 %v1457_v41, %v1455_v40 }
 0xe65   :  { %3603 = vrot.lane.b32.xlu1 %v4120_v43, %s3815_s19 }
 0xe66   :  { %v1459_v49 = vpop.permute.xlu1 %1458 }
 0xe67   :  { %v4124_v63 = vpack.i.bf16 %v1461_v45, %v1459_v49 }
 0xe69   :  { %3608 = vrot.lane.b32.xlu0 %v4124_v63, %s3815_s19 }
 0xe6a   :  { %v3594_v47 = vpop.permute.xlu1 %3593 }
 0xe6b   :  { %v3596_v57 = vunpack.i.h.bf16 %v3594_v47  ;;  %v3595_v55 = vunpack.i.l.bf16 %v3594_v47 }
 0xe6d   :  { %v3435_v50 = vpack.c.bf16 %v3596_v57, %v3595_v55 }
 0xe6f   :  { %3437 = vmatprep.subr.msk.bf16.mxu0 %vm3935_vm2, %v3435_v50 }
 0xe70   :  { %3440 = vmatpush3.bf16.xpose.msk.msra.mxu0 %vm3935_vm2, %v3435_v50 }
 0xecf   :  { %v3599_v52 = vpop.permute.xlu0 %3598 }
 0xed0   :  { %v3601_v53 = vunpack.i.h.bf16 %v3599_v52  ;;  %v3600_v46 = vunpack.i.l.bf16 %v3599_v52 }
 0xed2   :  { %v3441_v44 = vpack.c.bf16 %v3601_v53, %v3600_v46 }
 0xed4   :  { %3443 = vmatprep.subr.msk.bf16.mxu0 %vm3935_vm2, %v3441_v44 }
 0xed5   :  { %3446 = vmatpush3.bf16.xpose.msk.msra.mxu0 %vm3935_vm2, %v3441_v44 }
 0xed7   :  { %v3604_v54 = vpop.permute.xlu1 %3603 }
 0xed8   :  { %v3606_v56 = vunpack.i.h.bf16 %v3604_v54  ;;  %v3605_v51 = vunpack.i.l.bf16 %v3604_v54 }
 0xeda   :  { %v3447_v58 = vpack.c.bf16 %v3606_v56, %v3605_v51 }
 0xedb   :  { %v3609_v59 = vpop.permute.xlu0 %3608 }
 0xedc   :  { %v3611_v61 = vunpack.i.h.bf16 %v3609_v59  ;;  %v3610_v62 = vunpack.i.l.bf16 %v3609_v59  ;;  %3449 = vmatprep.subr.msk.bf16.mxu0 %vm3935_vm2, %v3447_v58 }
 0xedd   :  { %3452 = vmatpush3.bf16.xpose.msk.msra.mxu0 %vm3935_vm2, %v3447_v58 }
 0xede   :  { %v3453_v1 = vpack.c.bf16 %v3611_v61, %v3610_v62 }
 0xee0   :  { %3455 = vmatprep.subr.msk.bf16.mxu0 %vm3935_vm2, %v3453_v1 }
 0xee5   :  { %3458 = vmatpush3.bf16.xpose.msk.msra.mxu0 %vm3935_vm2, %v3453_v1 }
 0xeec   :  { %3204 = vmatmul.mubr.msk.f32.vlgmr.msra.gmra.mrb[18].mxu0 %vm95_vm0, %v1445_v35 }
 0xeed   :  { %3206 = vmatprep.mubr.msk.f32.mxu0 %vm95_vm0, %v1451_v2 }
 0xef0   :  { %3207 = vmatmul.mubr.msk.f32.gmra.mrb[20].mxu0 %vm95_vm0, %v1453_v38 }
 0xef1   :  { %3209 = vmatprep.mubr.msk.f32.mxu0 %vm95_vm0, %v1455_v40 }
 0xef4   :  { %3210 = vmatmul.mubr.msk.f32.gmra.mrb[22].mxu0 %vm95_vm0, %v1457_v41 }
 0xef5   :  { %3212 = vmatprep.mubr.msk.f32.mxu0 %vm95_vm0, %v1459_v49 }
 0xef8   :  { %3213 = vmatmul.mubr.msk.f32.gmra.mrb[24].mxu0 %vm95_vm0, %v1461_v45 }
 0xfbf   :  { %v3205_v17 = vpop.f32.mrb[18].mxu0 }
 0xfc0   :  { %v1616_v15 = vmul.f32 0.35355338, %v3205_v17  ;;  %v1576_v3 = vpop.f32.mrb[19].mxu0 }
 0xfc1   :  { %v1615_v4 = vmul.f32 0.35355338, %v1576_v3 }
 0xfc2   :  { %v1624_v11 = vadd.f32 %v1616_v15, %v3974_v42 }
 0xfc3   :  { %v3208_v5 = vpop.f32.mrb[20].mxu0  ;;  %v1623_v7 = vadd.f32 %v1615_v4, %v3978_v48 }
 0xfc4   :  { %v1618_v9 = vmul.f32 0.35355338, %v3208_v5  ;;  %v1586_v10 = vpop.f32.mrb[21].mxu0  ;;  %v1634_v13 = vsel %vm671_vm7, %v1624_v11, -inf }
 0xfc5   :  { %v1617_v16 = vmul.f32 0.35355338, %v1586_v10  ;;  %1635 = vmax.xlane.f32.xlu0 %v1634_v13  ;;  %v1631_v18 = vsel %vm671_vm7, %v1623_v7, -inf }
 0xfc6   :  { %1632 = vmax.xlane.f32.xlu1 %v1631_v18  ;;  %v1626_v23 = vadd.f32 %v1618_v9, %v3988_v0 }
 0xfc7   :  { %v3211_v20 = vpop.f32.mrb[22].mxu0  ;;  %v1625_v21 = vadd.f32 %v1617_v16, %v3984_v60 }
 0xfc8   :  { %v1596_v22 = vpop.f32.mrb[23].mxu0  ;;  %v1620_v24 = vmul.f32 0.35355338, %v3211_v20  ;;  %v1640_v29 = vsel %vm671_vm7, %v1626_v23, -inf }
 0xfc9   :  { %v1619_v42 = vmul.f32 0.35355338, %v1596_v22  ;;  %v1637_v8 = vsel %vm671_vm7, %v1625_v21, -inf }
 0xfca   :  { %1638 = vmax.xlane.f32.xlu0 %v1637_v8  ;;  %v1628_v60 = vadd.f32 %v1620_v24, %v3998_v19 }
 0xfcb   :  { %v3214_v48 = vpop.f32.mrb[24].mxu0  ;;  %v1627_v27 = vadd.f32 %v1619_v42, %v3993_v12 }
 0xfcc   :  { %v1606_v28 = vpop.f32.mrb[25].mxu0  ;;  %v1622_v30 = vmul.f32 0.35355338, %v3214_v48  ;;  %v1646_v35 = vsel %vm671_vm7, %v1628_v60, -inf }
 0xfcd   :  { %v1621_v33 = vmul.f32 0.35355338, %v1606_v28  ;;  %v1643_v34 = vsel %vm671_vm7, %v1627_v27, -inf }
 0xfce   :  { %1641 = vmax.xlane.f32.xlu0 %v1640_v29  ;;  %1644 = vmax.xlane.f32.xlu1 %v1643_v34  ;;  %v1630_v14 = vadd.f32 %v1622_v30, %v4007_v26 }
 0xfcf   :  { %v1629_v0 = vadd.f32 %v1621_v33, %v4003_v25 }
 0xfd0   :  { %v1652_v12 = vsel %vm671_vm7, %v1630_v14, -inf }
 0xfd1   :  { %v1649_v36 = vsel %vm671_vm7, %v1629_v0, -inf }
 0xfd2   :  { %1647 = vmax.xlane.f32.xlu0 %v1646_v35  ;;  %1650 = vmax.xlane.f32.xlu1 %v1649_v36 }
 0xfd6   :  { %1653 = vmax.xlane.f32.xlu0 %v1652_v12 }
 0xfe3   :  { %3613 = vrot.lane.b32.xlu1 %v4112_v37, %s3820_s2 }
0x1052   :  { %v1636_v38 = vpop.xlane.xlu0 %1635 }
0x1053   :  { %v1656_v19 = vsub.f32 %v1624_v11, %v1636_v38  ;;  %v1633_v2 = vpop.xlane.xlu1 %1632 }
0x1054   :  { %v1655_v40 = vsub.f32 %v1623_v7, %v1633_v2 }
0x1055   :  { %v1665_v41 = vmul.f32 1.442695, %v1656_v19 }
0x1056   :  { %v1663_v25 = vmul.f32 1.442695, %v1655_v40 }
0x1057   :  { %3688 = vpow2.f32 %v1665_v41  ;;  %v1639_v45 = vpop.xlane.xlu0 %1638 }
0x1058   :  { %3690 = vpow2.f32 %v1663_v25  ;;  %v1657_v49 = vsub.f32 %v1625_v21, %v1639_v45 }
0x105a   :  { %v1667_v47 = vmul.f32 1.442695, %v1657_v49 }
0x105b   :  { %v1642_v26 = vpop.xlane.xlu0 %1641  ;;  %v1645_v57 = vpop.xlane.xlu1 %1644 }
0x105c   :  { %3692 = vpow2.f32 %v1667_v47  ;;  %v1658_v55 = vsub.f32 %v1626_v23, %v1642_v26  ;;  %v1659_v50 = vsub.f32 %v1627_v27, %v1645_v57 }
0x105e   :  { %v1669_v52 = vmul.f32 1.442695, %v1658_v55  ;;  %v1671_v53 = vmul.f32 1.442695, %v1659_v50 }
0x105f   :  { %v1648_v46 = vpop.xlane.xlu0 %1647  ;;  %v1651_v37 = vpop.xlane.xlu1 %1650 }
0x1060   :  { %3694 = vpow2.f32 %v1669_v52  ;;  %v1660_v44 = vsub.f32 %v1628_v60, %v1648_v46  ;;  %v1661_v58 = vsub.f32 %v1629_v0, %v1651_v37 }
0x1061   :  { %v4169_v54 = vpop.eup %3688  ;;  %3696 = vpow2.f32 %v1671_v53 }
0x1062   :  { %v3691_v56 = vpop.eup %3690  ;;  %v1673_v51 = vmul.f32 1.442695, %v1660_v44  ;;  %v1682_v59 = vsel %vm671_vm7, %v4169_v54, 0.0  ;;  %v1675_v11 = vmul.f32 1.442695, %v1661_v58 }
0x1063   :  { %1683 = vadd.xlane.f32.xlu0 %v1682_v59  ;;  %v1654_v61 = vpop.xlane.xlu0 %1653  ;;  %v3614_v62 = vpop.permute.xlu1 %3613  ;;  %v1679_v1 = vsel %vm671_vm7, %v3691_v56, 0.0  ;;  %v1904_v59 = vld [vmem:[#allocation4 + $0x198] sm:$0xff] }
0x1064   :  { %3698 = vpow2.f32 %v1673_v51  ;;  %v1662_v17 = vsub.f32 %v1630_v14, %v1654_v61  ;;  %v3616_v15 = vunpack.i.h.bf16 %v3614_v62  ;;  %v3615_v3 = vunpack.i.l.bf16 %v3614_v62  ;;  %1680 = vadd.xlane.f32.xlu1 %v1679_v1  ;;  %v1903_v51 = vld [vmem:[#allocation4 + $0x190] sm:$0xff]  ;;  %v1905_v61 = vld [vmem:[#allocation4 + $0x1a0] sm:$0xff] }
0x1065   :  { %v3479_v62 = vpack.c.bf16 %v1905_v61, %v1904_v59  ;;  %v2178_v61 = vld [vmem:[#allocation4 + $0x1cc] sm:$0xff] }
0x1066   :  { %v4174_v4 = vpop.eup %3692  ;;  %v1677_v5 = vmul.f32 1.442695, %v1662_v17  ;;  %v3459_v7 = vpack.c.bf16 %v3616_v15, %v3615_v3 }
0x1067   :  { %v1685_v9 = vsel %vm671_vm7, %v4174_v4, 0.0 }
0x1068   :  { %3700 = vpow2.f32 %v1677_v5  ;;  %1686 = vadd.xlane.f32.xlu1 %v1685_v9  ;;  %3460 = vmatprep.subr.bf16.mxu1 %v3459_v7 }
0x1069   :  { %3462 = vmatpush3.bf16.msra.mxu1 %v3459_v7  ;;  %3702 = vpow2.f32 %v1675_v11 }
0x106a   :  { %v4178_v10 = vpop.eup %3694 }
0x106b   :  { %v4180_v13 = vpop.eup %3696  ;;  %v1688_v16 = vsel %vm671_vm7, %v4178_v10, 0.0 }
0x106c   :  { %1689 = vadd.xlane.f32.xlu0 %v1688_v16  ;;  %v1691_v18 = vsel %vm671_vm7, %v4180_v13, 0.0 }
0x106d   :  { %1692 = vadd.xlane.f32.xlu1 %v1691_v18 }
0x106e   :  { %v4186_v20 = vpop.eup %3698 }
0x106f   :  { %v1694_v21 = vsel %vm671_vm7, %v4186_v20, 0.0 }
0x1070   :  { %1695 = vadd.xlane.f32.xlu0 %v1694_v21 }
0x1072   :  { %v4190_v22 = vpop.eup %3700 }
0x1073   :  { %v1700_v23 = vsel %vm671_vm7, %v4190_v22, 0.0  ;;  %v3703_v24 = vpop.eup %3702 }
0x1074   :  { %1701 = vadd.xlane.f32.xlu0 %v1700_v23  ;;  %v1697_v42 = vsel %vm671_vm7, %v3703_v24, 0.0 }
0x1078   :  { %1698 = vadd.xlane.f32.xlu0 %v1697_v42 }
0x107e   :  { %3623 = vrot.lane.b32.xlu1 %v4120_v43, %s3820_s2 }
0x1082   :  { %3628 = vrot.lane.b32.xlu1 %v4124_v63, %s3820_s2 }
0x108e   :  { %3618 = vrot.lane.b32.xlu0 %v4116_v39, %s3820_s2 }
0x10f0   :  { %v1684_v48 = vpop.xlane.xlu0 %1683 }
0x10f1   :  { %v1681_v8 = vpop.xlane.xlu1 %1680 }
0x10f2   :  { %3704 = vrcp.f32 %v1681_v8 }
0x10f3   :  { %3706 = vrcp.f32 %v1684_v48  ;;  %v2854_v48 = vld [vmem:[#allocation4 + $0x1a8] ss:$0 sm:$0xff] }
0x10f5   :  { %v1687_v27 = vpop.xlane.xlu1 %1686 }
0x10f6   :  { %3708 = vrcp.f32 %v1687_v27 }
0x10f9   :  { %v1690_v28 = vpop.xlane.xlu0 %1689 }
0x10fa   :  { %v1693_v34 = vpop.xlane.xlu1 %1692  ;;  %3710 = vrcp.f32 %v1690_v28 }
0x10fb   :  { %3712 = vrcp.f32 %v1693_v34 }
0x10fc   :  { %v3705_v29 = vpop.eup %3704 }
0x10fd   :  { %v1696_v30 = vpop.xlane.xlu0 %1695  ;;  %v1704_v33 = vmul.f32 %v3705_v29, %v3691_v56  ;;  %v3707_v25 = vpop.eup %3706  ;;  %v1902_v56 = vld [vmem:[#allocation4 + $0x188] sm:$0xff] }
0x10fe   :  { %v3624_v0 = vpop.permute.xlu1 %3623  ;;  %3714 = vrcp.f32 %v1696_v30  ;;  %v1706_v49 = vmul.f32 %v3707_v25, %v4169_v54  ;;  %v3475_v58 = vpack.c.bf16 %v1903_v51, %v1902_v56  ;;  %v2037_v25 = vld [vmem:[#allocation4 + $0x1c3] sm:$0xff] }
0x10ff   :  { %3231 = vmatprep.mubr.msk.f32.mxu1 %vm671_vm7, %v1704_v33  ;;  %v3626_v36 = vunpack.i.h.bf16 %v3624_v0  ;;  %v3625_v63 = vunpack.i.l.bf16 %v3624_v0 }
0x1100   :  { %v3709_v45 = vpop.eup %3708 }
0x1101   :  { %v1702_v60 = vpop.xlane.xlu0 %1701  ;;  %v3467_v19 = vpack.c.bf16 %v3626_v36, %v3625_v63  ;;  %v1708_v26 = vmul.f32 %v3709_v45, %v4174_v4 }
0x1102   :  { %v3629_v39 = vpop.permute.xlu1 %3628 }
0x1103   :  { %v3631_v2 = vunpack.i.h.bf16 %v3629_v39  ;;  %v3630_v40 = vunpack.i.l.bf16 %v3629_v39 }
0x1104   :  { %v3711_v47 = vpop.eup %3710 }
0x1105   :  { %v1699_v43 = vpop.xlane.xlu0 %1698  ;;  %v3471_v41 = vpack.c.bf16 %v3631_v2, %v3630_v40  ;;  %v3713_v57 = vpop.eup %3712  ;;  %v1710_v55 = vmul.f32 %v3711_v47, %v4178_v10  ;;  %v2035_v2 = vld [vmem:[#allocation4 + $0x1b3] sm:$0xff] }
0x1106   :  { %3716 = vrcp.f32 %v1699_v43  ;;  %v1712_v52 = vmul.f32 %v3713_v57, %v4180_v13 }
0x1107   :  { %3718 = vrcp.f32 %v1702_v60 }
0x1108   :  { %v3715_v50 = vpop.eup %3714 }
0x1109   :  { %v3619_v35 = vpop.permute.xlu0 %3618  ;;  %v1714_v46 = vmul.f32 %v3715_v50, %v4186_v20 }
0x110a   :  { %v3621_v14 = vunpack.i.h.bf16 %v3619_v35  ;;  %v3620_v12 = vunpack.i.l.bf16 %v3619_v35 }
0x110c   :  { %v3463_v38 = vpack.c.bf16 %v3621_v14, %v3620_v12 }
0x110e   :  { %3464 = vmatprep.subr.bf16.mxu1 %v3463_v38 }
0x110f   :  { %3466 = vmatpush3.bf16.msra.mxu1 %v3463_v38 }
0x1110   :  { %3468 = vmatprep.subr.bf16.mxu1 %v3467_v19  ;;  %v3717_v53 = vpop.eup %3716 }
0x1111   :  { %v3719_v37 = vpop.eup %3718  ;;  %v1716_v44 = vmul.f32 %v3717_v53, %v3703_v24  ;;  %v2857_v53 = vld [vmem:[#allocation4 + $0x1a9] ss:$0 sm:$0xff] }
0x1112   :  { %v1718_v54 = vmul.f32 %v3719_v37, %v4190_v22  ;;  %v2858_v37 = vld [vmem:[#allocation4 + $0x1aa] ss:$0 sm:$0xff] }
0x1113   :  { %3470 = vmatpush3.bf16.msra.mxu1 %v3467_v19 }
0x1114   :  { %3472 = vmatprep.subr.bf16.mxu1 %v3471_v41 }
0x1117   :  { %3474 = vmatpush3.bf16.msra.mxu1 %v3471_v41  ;;  %v2036_v41 = vld [vmem:[#allocation4 + $0x1bb] sm:$0xff] }
0x1118   :  { %3476 = vmatprep.subr.bf16.mxu1 %v3475_v58  ;;  %v3487_v45 = vpack.c.bf16 %v2037_v25, %v2036_v41 }
0x111a   :  { %3232 = vmatmul.mubr.msk.f32.vlgmr.msra.gmra.mrb[10].mxu1 %vm671_vm7, %v1706_v49 }
0x111b   :  { %3234 = vmatprep.mubr.msk.f32.mxu1 %vm671_vm7, %v1708_v26  ;;  %3478 = vmatpush3.bf16.msra.mxu1 %v3475_v58 }
0x111c   :  { %3480 = vmatprep.subr.bf16.mxu1 %v3479_v62 }
0x111e   :  { %3235 = vmatmul.mubr.msk.f32.gmra.mrb[12].mxu1 %vm671_vm7, %v1710_v55 }
0x111f   :  { %3237 = vmatprep.mubr.msk.f32.mxu1 %vm671_vm7, %v1712_v52  ;;  %3482 = vmatpush3.bf16.msra.mxu1 %v3479_v62  ;;  %v2179_v62 = vld [vmem:[#allocation4 + $0x1d4] sm:$0xff] }
0x1122   :  { %3238 = vmatmul.mubr.msk.f32.gmra.mrb[14].mxu1 %vm671_vm7, %v1714_v46 }
0x1123   :  { %3240 = vmatprep.mubr.msk.f32.mxu1 %vm671_vm7, %v1716_v44 }
0x1126   :  { %3241 = vmatmul.mubr.msk.f32.gmra.mrb[16].mxu1 %vm671_vm7, %v1718_v54 }
0x11ed   :  { %v3233_v1 = vpop.f32.mrb[10].mxu1 }
0x11ee   :  { %v1833_v17 = vpop.f32.mrb[11].mxu1 }
0x11f1   :  { %v3236_v15 = vpop.f32.mrb[12].mxu1 }
0x11f2   :  { %1876 = vrot.lane.b32.xlu1 %v3236_v15, %s3810_s26  ;;  %v1843_v3 = vpop.f32.mrb[13].mxu1  ;;  %v2181_v15 = vld [vmem:[#allocation4 + $0x1e4] sm:$0xff] }
0x11f5   :  { %v3239_v4 = vpop.f32.mrb[14].mxu1 }
0x11f6   :  { %1874 = vrot.lane.b32.xlu1 %v1843_v3, %s3810_s26  ;;  %1884 = vrot.lane.b32.xlu0 %v3239_v4, %s3816_s22  ;;  %v1853_v11 = vpop.f32.mrb[15].mxu1  ;;  %v2182_v4 = vld [vmem:[#allocation4 + $0x1ec] sm:$0xff] }
0x11f9   :  { %v3242_v5 = vpop.f32.mrb[16].mxu1 }
0x11fa   :  { %1882 = vrot.lane.b32.xlu1 %v1853_v11, %s3816_s22  ;;  %1892 = vrot.lane.b32.xlu0 %v3242_v5, %s3821_s25  ;;  %v1863_v7 = vpop.f32.mrb[17].mxu1  ;;  %v2183_v11 = vld [vmem:[#allocation4 + $0x1f4] sm:$0xff] }
0x11fb   :  { %v3499_v5 = vpack.c.bf16 %v2183_v11, %v2182_v4 }
0x11fe   :  { %1890 = vrot.lane.b32.xlu1 %v1863_v7, %s3821_s25  ;;  %v2184_v7 = vld [vmem:[#allocation4 + $0x1fc] sm:$0xff] }
0x1264   :  { %v1877_v9 = vpop.permute.xlu1 %1876 }
0x1265   :  { %v1897_v21 = vsel %vm95_vm0, %v3233_v1, %v1877_v9  ;;  %v3491_v1 = vpack.c.bf16 %v2179_v62, %v2178_v61  ;;  %v2185_v9 = vld [vmem:[#allocation4 + $0x204] sm:$0xff] }
0x1267   :  { %3492 = vmatprep.subr.bf16.mxu1 %v3491_v1 }
0x1268   :  { %v1875_v10 = vpop.permute.xlu1 %1874  ;;  %v1885_v13 = vpop.permute.xlu0 %1884 }
0x1269   :  { %v1896_v18 = vsel %vm95_vm0, %v1833_v17, %v1875_v10  ;;  %v1899_v24 = vsel %vm370_vm3, %v1897_v21, %v1885_v13  ;;  %v2180_v17 = vld [vmem:[#allocation4 + $0x1dc] sm:$0xff]  ;;  %v3503_v10 = vpack.c.bf16 %v2185_v9, %v2184_v7  ;;  %v2186_v13 = vld [vmem:[#allocation4 + $0x20c] sm:$0xff]  ;;  %v2189_v21 = vld [vmem:[#allocation4 + $0x224] sm:$0xff] }
0x126a   :  { %v3495_v3 = vpack.c.bf16 %v2181_v15, %v2180_v17 }
0x126c   :  { %v1883_v16 = vpop.permute.xlu1 %1882  ;;  %v1893_v20 = vpop.permute.xlu0 %1892 }
0x126d   :  { %v1898_v22 = vsel %vm370_vm3, %v1896_v18, %v1883_v16  ;;  %v1901_v8 = vsel %vm941_vm8, %v1899_v24, %v1893_v20  ;;  %v2187_v16 = vld [vmem:[#allocation4 + $0x214] sm:$0xff]  ;;  %v2188_v20 = vld [vmem:[#allocation4 + $0x21c] sm:$0xff] }
0x126e   :  { %v3507_v18 = vpack.c.bf16 %v2187_v16, %v2186_v13  ;;  %v2191_v24 = vld [vmem:[#allocation4 + $0x234] sm:$0xff] }
0x1270   :  { %v1891_v23 = vpop.permute.xlu1 %1890 }
0x1271   :  { %v1900_v42 = vsel %vm941_vm8, %v1898_v22, %v1891_v23  ;;  %v3511_v22 = vpack.c.bf16 %v2189_v21, %v2188_v20  ;;  %v2190_v23 = vld [vmem:[#allocation4 + $0x22c] sm:$0xff] }
0x1272   :  { %3251 = vmatprep.mubr.msk.f32.mxu1 %vm49_vm1, %v1900_v42  ;;  %v3515_v42 = vpack.c.bf16 %v2191_v24, %v2190_v23  ;;  %v2862_v23 = vld [vmem:[#allocation4 + $0x24c] ss:$0 sm:$0xff] }
0x1273   :  { %3252 = vmatmul.mubr.msk.f32.vlgmr.msra.gmra.mrb[18].mxu1 %vm49_vm1, %v1901_v8  ;;  %v2192_v8 = vld [vmem:[#allocation4 + $0x23c] sm:$0xff] }
0x1274   :  { %3494 = vmatpush3.bf16.msra.mxu1 %v3491_v1 }
0x1275   :  { %3496 = vmatprep.subr.bf16.mxu1 %v3495_v3 }
0x1278   :  { %3498 = vmatpush3.bf16.msra.mxu1 %v3495_v3 }
0x1279   :  { %3500 = vmatprep.subr.bf16.mxu1 %v3499_v5 }
0x127c   :  { %3502 = vmatpush3.bf16.msra.mxu1 %v3499_v5 }
0x127d   :  { %3504 = vmatprep.subr.bf16.mxu1 %v3503_v10 }
0x1280   :  { %3506 = vmatpush3.bf16.msra.mxu1 %v3503_v10 }
0x1281   :  { %3508 = vmatprep.subr.bf16.mxu1 %v3507_v18 }
0x1284   :  { %3510 = vmatpush3.bf16.msra.mxu1 %v3507_v18 }
0x1285   :  { %3512 = vmatprep.subr.bf16.mxu1 %v3511_v22 }
0x1288   :  { %3514 = vmatpush3.bf16.msra.mxu1 %v3511_v22 }
0x1289   :  { %3516 = vmatprep.subr.bf16.mxu1 %v3515_v42 }
0x128c   :  { %3518 = vmatpush3.bf16.msra.mxu1 %v3515_v42 }
0x1346   :  { %v3253_v27 = vpop.f32.mrb[18].mxu1 }
0x1347   :  { %v1989_v28 = vadd.f32 %v3253_v27, %v2854_v48  ;;  %v1983_v29 = vpop.f32.mrb[19].mxu1 }
0x1348   :  { %v1984_v30 = vadd.f32 %v2854_v48, %v1983_v29  ;;  %v2193_v48 = vld [vmem:[#allocation4 + $0x244] sm:$0xff] }
0x1349   :  { %v1993_v33 = vadd.f32 %v1989_v28, %v4099_v32  ;;  %v3519_v27 = vpack.c.bf16 %v2193_v48, %v2192_v8  ;;  %v2859_v28 = vld [vmem:[#allocation4 + $0x1cb] ss:$0 sm:$0xff] }
0x134a   :  { %v1992_v34 = vadd.f32 %v1984_v30, %v4097_v31  ;;  %v2034_v31 = vld [vmem:[#allocation4 + $0x1ab] sm:$0xff] }
0x134b   :  { %v1999_v60 = vsel %vm49_vm1, %v1993_v33, 0.0  ;;  %v3483_v40 = vpack.c.bf16 %v2035_v2, %v2034_v31  ;;  %3520 = vmatprep.subr.bf16.mxu1 %v3519_v27 }
0x134c   :  { %2000 = vadd.xlane.f32.xlu0 %v1999_v60  ;;  %v1996_v0 = vsel %vm49_vm1, %v1992_v34, 0.0  ;;  %3522 = vmatpush3.bf16.msra.mxu1 %v3519_v27 }
0x134d   :  { %1997 = vadd.xlane.f32.xlu1 %v1996_v0  ;;  %3484 = vmatprep.subr.bf16.mxu0 %v3483_v40 }
0x134e   :  { %3486 = vmatpush3.bf16.msra.mxu0 %v3483_v40 }
0x134f   :  { %3488 = vmatprep.subr.bf16.mxu0 %v3487_v45 }
0x1352   :  { %3490 = vmatpush3.bf16.msra.mxu0 %v3487_v45 }
0x13d9   :  { %v2001_v43 = vpop.xlane.xlu0 %2000 }
0x13da   :  { %v2003_v35 = vmul.f32 0.03125, %v2001_v43  ;;  %v1998_v36 = vpop.xlane.xlu1 %1997 }
0x13db   :  { %v2002_v63 = vmul.f32 0.03125, %v1998_v36 }
0x13dc   :  { %v2005_v14 = vsub.f32 %v1993_v33, %v2003_v35 }
0x13dd   :  { %v2004_v12 = vsub.f32 %v1992_v34, %v2002_v63 }
0x13de   :  { %v2007_v19 = vmul.f32 %v2005_v14, %v2005_v14 }
0x13df   :  { %v2006_v39 = vmul.f32 %v2004_v12, %v2004_v12 }
0x13e0   :  { %v2011_v32 = vsel %vm49_vm1, %v2007_v19, 0.0 }
0x13e1   :  { %v2008_v38 = vsel %vm49_vm1, %v2006_v39, 0.0 }
0x13e2   :  { %2009 = vadd.xlane.f32.xlu0 %v2008_v38 }
0x13e6   :  { %2012 = vadd.xlane.f32.xlu0 %v2011_v32 }
0x146f   :  { %v2010_v49 = vpop.xlane.xlu0 %2009 }
0x1470   :  { %v2014_v47 = vmul.f32 0.03125, %v2010_v49 }
0x1472   :  { %v2016_v26 = vadd.f32 1e-12, %v2014_v47 }
0x1473   :  { %v2013_v57 = vpop.xlane.xlu0 %2012 }
0x1474   :  { %3720 = vrsqrt.f32 %v2016_v26  ;;  %v2015_v55 = vmul.f32 0.03125, %v2013_v57 }
0x1476   :  { %v2017_v50 = vadd.f32 1e-12, %v2015_v55 }
0x1478   :  { %3722 = vrsqrt.f32 %v2017_v50 }
0x147e   :  { %v3721_v52 = vpop.eup %3720 }
0x147f   :  { %v2020_v46 = vmul.f32 %v3721_v52, %v2004_v12 }
0x1481   :  { %v2026_v44 = vmul.f32 %v2857_v53, %v2020_v46 }
0x1482   :  { %v3723_v54 = vpop.eup %3722 }
0x1483   :  { %v2021_v56 = vmul.f32 %v3723_v54, %v2005_v14  ;;  %v4235_v51 = vadd.f32 %v2858_v37, %v2026_v44 }
0x1485   :  { %v2027_v58 = vmul.f32 %v2857_v53, %v2021_v56  ;;  %3262 = vmatprep.mubr.msk.f32.mxu0 %vm49_vm1, %v4235_v51 }
0x1487   :  { %v4239_v59 = vadd.f32 %v2858_v37, %v2027_v58 }
0x1489   :  { %3263 = vmatmul.mubr.msk.f32.vlgmr.msra.gmra.mrb[26].mxu0 %vm49_vm1, %v4239_v59 }
0x155c   :  { %v3264_v29 = vpop.f32.mrb[26].mxu0 }
0x155d   :  { %v2121_v30 = vadd.f32 %v3264_v29, %v2859_v28  ;;  %v2115_v33 = vpop.f32.mrb[27].mxu0 }
0x155e   :  { %v2116_v34 = vadd.f32 %v2859_v28, %v2115_v33 }
0x155f   :  { %v2127_v60 = vmul.f32 0.70710677, %v2121_v30  ;;  %v2125_v20 = vmul.f32 0.5, %v2121_v30 }
0x1560   :  { %v2126_v0 = vmul.f32 0.70710677, %v2116_v34  ;;  %v2124_v16 = vmul.f32 0.5, %v2116_v34 }
0x1561   :  { %v2133_v43 = vand.u32 2147483647, %v2127_v60  ;;  %vm2129_vm11 = vcmp.ge.f32.partialorder %v2127_v60, 0.0 }
0x1562   :  { %v2132_v35 = vand.u32 2147483647, %v2126_v0  ;;  %vm2128_vm12 = vcmp.ge.f32.partialorder %v2126_v0, 0.0  ;;  %v2131_v11 = vsel %vm2129_vm11, 1.0, %v3822_v6 }
0x1563   :  { %v2135_v36 = vmul.f32 0.3275911, %v2133_v43  ;;  %v2161_v39 = vsub.f32 0.0, %v2133_v43  ;;  %v2130_v9 = vsel %vm2128_vm12, 1.0, %v3822_v6 }
0x1564   :  { %v2134_v63 = vmul.f32 0.3275911, %v2132_v35  ;;  %v2160_v38 = vsub.f32 0.0, %v2132_v35 }
0x1565   :  { %v2137_v14 = vadd.f32 1.0, %v2135_v36  ;;  %v2163_v32 = vmul.f32 %v2161_v39, %v2133_v43 }
0x1566   :  { %v2136_v12 = vadd.f32 1.0, %v2134_v63  ;;  %v2162_v40 = vmul.f32 %v2160_v38, %v2132_v35  ;;  %v2318_v38 = vld [vmem:[#allocation4 + $0x25f] sm:$0xff] }
0x1567   :  { %3724 = vrcp.f32 %v2137_v14  ;;  %v2166_v45 = vmul.f32 1.442695, %v2163_v32 }
0x1568   :  { %3726 = vrcp.f32 %v2136_v12  ;;  %v2164_v26 = vmul.f32 1.442695, %v2162_v40  ;;  %v2317_v12 = vld [vmem:[#allocation4 + $0x257] sm:$0xff] }
0x1569   :  { %3728 = vpow2.f32 %v2166_v45 }
0x156a   :  { %3730 = vpow2.f32 %v2164_v26 }
0x1571   :  { %v3725_v19 = vpop.eup %3724 }
0x1572   :  { %v3727_v31 = vpop.eup %3726  ;;  %v2143_v2 = vmul.f32 1.0614054, %v3725_v19 }
0x1573   :  { %v2142_v41 = vmul.f32 1.0614054, %v3727_v31  ;;  %v3729_v62 = vpop.eup %3728 }
0x1574   :  { %v2145_v25 = vadd.f32 -1.4531521, %v2143_v2  ;;  %v3731_v17 = vpop.eup %3730 }
0x1575   :  { %v2144_v49 = vadd.f32 -1.4531521, %v2142_v41 }
0x1576   :  { %v2147_v47 = vmul.f32 %v3725_v19, %v2145_v25 }
0x1577   :  { %v2146_v57 = vmul.f32 %v3727_v31, %v2144_v49 }
0x1578   :  { %v2149_v55 = vadd.f32 1.4214138, %v2147_v47  ;;  %v2863_v47 = vld [vmem:[#allocation4 + $0x24d] ss:$0 sm:$0xff] }
0x1579   :  { %v2148_v50 = vadd.f32 1.4214138, %v2146_v57 }
0x157a   :  { %v2151_v52 = vmul.f32 %v3725_v19, %v2149_v55 }
0x157b   :  { %v2150_v53 = vmul.f32 %v3727_v31, %v2148_v50  ;;  %v2864_v50 = vld [vmem:[#allocation4 + $0x24e] ss:$0 sm:$0xff] }
0x157c   :  { %v2153_v46 = vadd.f32 -0.28449672, %v2151_v52 }
0x157d   :  { %v2152_v37 = vadd.f32 -0.28449672, %v2150_v53 }
0x157e   :  { %v2155_v44 = vmul.f32 %v3725_v19, %v2153_v46 }
0x157f   :  { %v2154_v54 = vmul.f32 %v3727_v31, %v2152_v37 }
0x1580   :  { %v2157_v56 = vadd.f32 0.2548296, %v2155_v44  ;;  %v2865_v44 = vld [vmem:[#allocation4 + $0x26f] ss:$0 sm:$0xff] }
0x1581   :  { %v2156_v58 = vadd.f32 0.2548296, %v2154_v54 }
0x1582   :  { %v2159_v61 = vmul.f32 %v3725_v19, %v2157_v56  ;;  %v2319_v19 = vld [vmem:[#allocation4 + $0x267] sm:$0xff] }
0x1583   :  { %v2158_v1 = vmul.f32 %v3727_v31, %v2156_v58  ;;  %v3527_v32 = vpack.c.bf16 %v2319_v19, %v2318_v38 }
0x1584   :  { %v2169_v15 = vmul.f32 %v3729_v62, %v2159_v61 }
0x1585   :  { %v2168_v3 = vmul.f32 %v3731_v17, %v2158_v1 }
0x1586   :  { %v2171_v4 = vsub.f32 1.0, %v2169_v15 }
0x1587   :  { %v2170_v5 = vsub.f32 1.0, %v2168_v3 }
0x1588   :  { %v2173_v7 = vmul.f32 %v2171_v4, %v2131_v11 }
0x1589   :  { %v2172_v10 = vmul.f32 %v2170_v5, %v2130_v9 }
0x158a   :  { %v2175_v13 = vadd.f32 1.0, %v2173_v7 }
0x158b   :  { %v2174_v18 = vadd.f32 1.0, %v2172_v10 }
0x158c   :  { %v2177_v22 = vmul.f32 %v2175_v13, %v2125_v20 }
0x158d   :  { %v2176_v21 = vmul.f32 %v2174_v18, %v2124_v16  ;;  %v2500_v16 = vld [vmem:[#allocation4 + $0x272] sm:$0xff]  ;;  %v2501_v18 = vld [vmem:[#allocation4 + $0x27a] sm:$0xff] }
0x158e   :  { %v3531_v20 = vpack.c.bf16 %v2501_v18, %v2500_v16 }
0x158f   :  { %3297 = vmatprep.mubr.f32.mxu1 %v2176_v21 }
0x1590   :  { %3298 = vmatmul.mubr.f32.vlgmr.msra.gmra.mrb[20].mxu1 %v2177_v22 }
0x1663   :  { %v3299_v24 = vpop.f32.mrb[20].mxu1 }
0x1664   :  { %v2271_v42 = vadd.f32 %v3299_v24, %v2862_v23  ;;  %v2265_v8 = vpop.f32.mrb[21].mxu1 }
0x1665   :  { %v2266_v48 = vadd.f32 %v2862_v23, %v2265_v8 }
0x1666   :  { %v2275_v27 = vadd.f32 %v2271_v42, %v4239_v59 }
0x1667   :  { %v2274_v28 = vadd.f32 %v2266_v48, %v4235_v51  ;;  %v2316_v51 = vld [vmem:[#allocation4 + $0x24f] sm:$0xff] }
0x1668   :  { %v2281_v29 = vsel %vm49_vm1, %v2275_v27, 0.0  ;;  %v3523_v39 = vpack.c.bf16 %v2317_v12, %v2316_v51 }
0x1669   :  { %2282 = vadd.xlane.f32.xlu0 %v2281_v29  ;;  %v2278_v33 = vsel %vm49_vm1, %v2274_v28, 0.0 }
0x166a   :  { %2279 = vadd.xlane.f32.xlu1 %v2278_v33  ;;  %3524 = vmatprep.subr.bf16.mxu0 %v3523_v39 }
0x166b   :  { %3526 = vmatpush3.bf16.msra.mxu0 %v3523_v39 }
0x166c   :  { %3528 = vmatprep.subr.bf16.mxu0 %v3527_v32 }
0x166f   :  { %3530 = vmatpush3.bf16.msra.mxu0 %v3527_v32 }
0x1670   :  { %3532 = vmatprep.subr.bf16.mxu0 %v3531_v20 }
0x16f6   :  { %v2283_v30 = vpop.xlane.xlu0 %2282 }
0x16f7   :  { %v2285_v34 = vmul.f32 0.03125, %v2283_v30  ;;  %v2280_v60 = vpop.xlane.xlu1 %2279  ;;  %v2869_v30 = vld [vmem:[#allocation4 + $0x271] ss:$0 sm:$0xff] }
0x16f8   :  { %v2284_v0 = vmul.f32 0.03125, %v2280_v60 }
0x16f9   :  { %v2287_v43 = vsub.f32 %v2275_v27, %v2285_v34  ;;  %v2868_v27 = vld [vmem:[#allocation4 + $0x270] ss:$0 sm:$0xff] }
0x16fa   :  { %v2286_v35 = vsub.f32 %v2274_v28, %v2284_v0 }
0x16fb   :  { %v2289_v36 = vmul.f32 %v2287_v43, %v2287_v43 }
0x16fc   :  { %v2288_v63 = vmul.f32 %v2286_v35, %v2286_v35 }
0x16fd   :  { %v2293_v14 = vsel %vm49_vm1, %v2289_v36, 0.0 }
0x16fe   :  { %2294 = vadd.xlane.f32.xlu0 %v2293_v14  ;;  %v2290_v59 = vsel %vm49_vm1, %v2288_v63, 0.0 }
0x16ff   :  { %2291 = vadd.xlane.f32.xlu1 %v2290_v59 }
0x178b   :  { %v2295_v31 = vpop.xlane.xlu0 %2294 }
0x178c   :  { %v2297_v2 = vmul.f32 0.03125, %v2295_v31  ;;  %v2292_v40 = vpop.xlane.xlu1 %2291 }
0x178d   :  { %v2296_v41 = vmul.f32 0.03125, %v2292_v40 }
0x178e   :  { %v2299_v25 = vadd.f32 1e-12, %v2297_v2 }
0x178f   :  { %v2298_v45 = vadd.f32 1e-12, %v2296_v41 }
0x1790   :  { %3732 = vrsqrt.f32 %v2299_v25 }
0x1791   :  { %3734 = vrsqrt.f32 %v2298_v45 }
0x179a   :  { %v3733_v49 = vpop.eup %3732 }
0x179b   :  { %v3735_v26 = vpop.eup %3734  ;;  %v2303_v57 = vmul.f32 %v3733_v49, %v2287_v43 }
0x179c   :  { %v2302_v55 = vmul.f32 %v3735_v26, %v2286_v35 }
0x179d   :  { %v2309_v52 = vmul.f32 %v2863_v47, %v2303_v57 }
0x179e   :  { %v2308_v53 = vmul.f32 %v2863_v47, %v2302_v55 }
0x179f   :  { %v2315_v37 = vadd.f32 %v2864_v50, %v2309_v52 }
0x17a0   :  { %v2314_v46 = vadd.f32 %v2864_v50, %v2308_v53 }
0x17a2   :  { %3308 = vmatprep.mubr.msk.f32.mxu0 %vm49_vm1, %v2314_v46 }
0x17a3   :  { %3309 = vmatmul.mubr.msk.f32.vlgmr.msra.gmra.mrb[28].mxu0 %vm49_vm1, %v2315_v37 }
0x17a4   :  { %3534 = vmatpush3.bf16.msra.mxu0 %v3531_v20 }
0x1876   :  { %v3310_v54 = vpop.f32.mrb[28].mxu0 }
0x1877   :  { %v2403_v56 = vadd.f32 %v3310_v54, %v2865_v44  ;;  %v2397_v58 = vpop.f32.mrb[29].mxu0 }
0x1878   :  { %v2398_v61 = vadd.f32 %v2865_v44, %v2397_v58 }
0x1879   :  { %v2411_v62 = vsel %vm370_vm3, %v2403_v56, 0.0 }
0x187a   :  { %2412 = vadd.xlane.f32.xlu0 %v2411_v62  ;;  %v2408_v1 = vsel %vm370_vm3, %v2398_v61, 0.0 }
0x187b   :  { %2409 = vadd.xlane.f32.xlu1 %v2408_v1 }
0x1907   :  { %v2413_v17 = vpop.xlane.xlu0 %2412 }
0x1908   :  { %v2415_v15 = vmul.f32 0.0625, %v2413_v17  ;;  %v2410_v3 = vpop.xlane.xlu1 %2409 }
0x1909   :  { %v2414_v4 = vmul.f32 0.0625, %v2410_v3 }
0x190a   :  { %v2417_v11 = vsub.f32 %v2403_v56, %v2415_v15 }
0x190b   :  { %v2416_v5 = vsub.f32 %v2398_v61, %v2414_v4 }
0x190c   :  { %v2419_v7 = vmul.f32 %v2417_v11, %v2417_v11 }
0x190d   :  { %v2418_v9 = vmul.f32 %v2416_v5, %v2416_v5 }
0x190e   :  { %v2423_v10 = vsel %vm370_vm3, %v2419_v7, 0.0 }
0x190f   :  { %2424 = vadd.xlane.f32.xlu0 %v2423_v10  ;;  %v2420_v13 = vsel %vm370_vm3, %v2418_v9, 0.0 }
0x1910   :  { %2421 = vadd.xlane.f32.xlu1 %v2420_v13 }
0x199c   :  { %v2425_v21 = vpop.xlane.xlu0 %2424 }
0x199d   :  { %v2427_v22 = vmul.f32 0.0625, %v2425_v21  ;;  %v2422_v23 = vpop.xlane.xlu1 %2421 }
0x199e   :  { %v2426_v24 = vmul.f32 0.0625, %v2422_v23 }
0x199f   :  { %v2429_v42 = vadd.f32 1e-05, %v2427_v22 }
0x19a0   :  { %v2428_v8 = vadd.f32 1e-05, %v2426_v24  ;;  %v2870_v24 = vld [vmem:[#allocation4 + $0x282] ss:$0 sm:$0xff] }
0x19a1   :  { %3736 = vrsqrt.f32 %v2429_v42 }
0x19a2   :  { %3738 = vrsqrt.f32 %v2428_v8 }
0x19ab   :  { %v3737_v48 = vpop.eup %3736 }
0x19ac   :  { %v3739_v28 = vpop.eup %3738  ;;  %v2433_v29 = vmul.f32 %v3737_v48, %v2417_v11 }
0x19ad   :  { %v2432_v33 = vmul.f32 %v3739_v28, %v2416_v5 }
0x19ae   :  { %v2439_v34 = vmul.f32 %v2868_v27, %v2433_v29 }
0x19af   :  { %v2438_v60 = vmul.f32 %v2868_v27, %v2432_v33 }
0x19b0   :  { %v2445_v0 = vadd.f32 %v2869_v30, %v2439_v34 }
0x19b1   :  { %v2444_v43 = vadd.f32 %v2869_v30, %v2438_v60 }
0x19b2   :  { %v2449_v35 = vmul.f32 0.70710677, %v2445_v0  ;;  %v2447_v21 = vmul.f32 0.5, %v2445_v0 }
0x19b3   :  { %v2448_v36 = vmul.f32 0.70710677, %v2444_v43  ;;  %v2446_v18 = vmul.f32 0.5, %v2444_v43 }
0x19b4   :  { %v2455_v63 = vand.u32 2147483647, %v2449_v35  ;;  %vm2451_vm13 = vcmp.ge.f32.partialorder %v2449_v35, 0.0 }
0x19b5   :  { %v2454_v14 = vand.u32 2147483647, %v2448_v36  ;;  %vm2450_vm14 = vcmp.ge.f32.partialorder %v2448_v36, 0.0  ;;  %v2453_v7 = vsel %vm2451_vm13, 1.0, %v3822_v6 }
0x19b6   :  { %v2457_v59 = vmul.f32 0.3275911, %v2455_v63  ;;  %v2483_v38 = vsub.f32 0.0, %v2455_v63  ;;  %v2452_v9 = vsel %vm2450_vm14, 1.0, %v3822_v6 }
0x19b7   :  { %v2456_v51 = vmul.f32 0.3275911, %v2454_v14  ;;  %v2482_v19 = vsub.f32 0.0, %v2454_v14 }
0x19b8   :  { %v2459_v12 = vadd.f32 1.0, %v2457_v59  ;;  %v2485_v31 = vmul.f32 %v2483_v38, %v2455_v63  ;;  %v2683_v59 = vld [vmem:[#allocation4 + $0x285] sm:$0xff] }
0x19b9   :  { %v2458_v39 = vadd.f32 1.0, %v2456_v51  ;;  %v2484_v40 = vmul.f32 %v2482_v19, %v2454_v14  ;;  %3318 = vmatprep.subr.mxu0 %v2683_v59 }
0x19ba   :  { %3740 = vrcp.f32 %v2459_v12  ;;  %v2488_v47 = vmul.f32 1.442695, %v2485_v31 }
0x19bb   :  { %3742 = vrcp.f32 %v2458_v39  ;;  %v2486_v26 = vmul.f32 1.442695, %v2484_v40 }
0x19bc   :  { %3744 = vpow2.f32 %v2488_v47 }
0x19bd   :  { %3746 = vpow2.f32 %v2486_v26 }
0x19c4   :  { %v3741_v32 = vpop.eup %3740 }
0x19c5   :  { %v3743_v2 = vpop.eup %3742  ;;  %v2465_v41 = vmul.f32 1.0614054, %v3741_v32 }
0x19c6   :  { %v2464_v25 = vmul.f32 1.0614054, %v3743_v2  ;;  %v3745_v1 = vpop.eup %3744 }
0x19c7   :  { %v2467_v45 = vadd.f32 -1.4531521, %v2465_v41  ;;  %v3747_v15 = vpop.eup %3746 }
0x19c8   :  { %v2466_v49 = vadd.f32 -1.4531521, %v2464_v25 }
0x19c9   :  { %v2469_v57 = vmul.f32 %v3741_v32, %v2467_v45  ;;  %v2874_v45 = vld [vmem:[#allocation4 + $0x284] ss:$0 sm:$0xff] }
0x19ca   :  { %v2468_v55 = vmul.f32 %v3743_v2, %v2466_v49 }
0x19cb   :  { %v2471_v50 = vadd.f32 1.4214138, %v2469_v57 }
0x19cc   :  { %v2470_v52 = vadd.f32 1.4214138, %v2468_v55 }
0x19cd   :  { %v2473_v53 = vmul.f32 %v3741_v32, %v2471_v50 }
0x19ce   :  { %v2472_v46 = vmul.f32 %v3743_v2, %v2470_v52 }
0x19cf   :  { %v2475_v37 = vadd.f32 -0.28449672, %v2473_v53 }
0x19d0   :  { %v2474_v44 = vadd.f32 -0.28449672, %v2472_v46 }
0x19d1   :  { %v2477_v54 = vmul.f32 %v3741_v32, %v2475_v37 }
0x19d2   :  { %v2476_v56 = vmul.f32 %v3743_v2, %v2474_v44 }
0x19d3   :  { %v2479_v58 = vadd.f32 0.2548296, %v2477_v54 }
0x19d4   :  { %v2478_v61 = vadd.f32 0.2548296, %v2476_v56 }
0x19d5   :  { %v2481_v62 = vmul.f32 %v3741_v32, %v2479_v58 }
0x19d6   :  { %v2480_v17 = vmul.f32 %v3743_v2, %v2478_v61  ;;  %v2873_v2 = vld [vmem:[#allocation4 + $0x283] ss:$0 sm:$0xff] }
0x19d7   :  { %v2491_v3 = vmul.f32 %v3745_v1, %v2481_v62 }
0x19d8   :  { %v2490_v4 = vmul.f32 %v3747_v15, %v2480_v17 }
0x19d9   :  { %v2493_v11 = vsub.f32 1.0, %v2491_v3 }
0x19da   :  { %v2492_v5 = vsub.f32 1.0, %v2490_v4 }
0x19db   :  { %v2495_v10 = vmul.f32 %v2493_v11, %v2453_v7 }
0x19dc   :  { %v2494_v13 = vmul.f32 %v2492_v5, %v2452_v9 }
0x19dd   :  { %v2497_v16 = vadd.f32 1.0, %v2495_v10 }
0x19de   :  { %v2496_v20 = vadd.f32 1.0, %v2494_v13 }
0x19df   :  { %v2499_v23 = vmul.f32 %v2497_v16, %v2447_v21 }
0x19e0   :  { %v2498_v22 = vmul.f32 %v2496_v20, %v2446_v18 }
0x19e2   :  { %3315 = vmatprep.mubr.msk.f32.mxu0 %vm370_vm3, %v2498_v22 }
0x19e3   :  { %3316 = vmatmul.mubr.msk.f32.vlgmr.msra.gmra.mrb[30].mxu0 %vm370_vm3, %v2499_v23 }
0x19e4   :  { %3319 = vmatpush3.msra.mxu0 %v2683_v59 }
0x1ab6   :  { %v3317_v42 = vpop.f32.mrb[30].mxu0 }
0x1ab7   :  { %v2585_v8 = vadd.f32 %v3317_v42, %v2870_v24  ;;  %v2579_v48 = vpop.f32.mrb[31].mxu0 }
0x1ab8   :  { %v2580_v27 = vadd.f32 %v2870_v24, %v2579_v48 }
0x1ab9   :  { %v2593_v28 = vsel %vm95_vm0, %v2585_v8, 0.0 }
0x1aba   :  { %2594 = vadd.xlane.f32.xlu0 %v2593_v28  ;;  %v2590_v29 = vsel %vm95_vm0, %v2580_v27, 0.0 }
0x1abb   :  { %2591 = vadd.xlane.f32.xlu1 %v2590_v29 }
0x1b47   :  { %v2595_v33 = vpop.xlane.xlu0 %2594 }
0x1b48   :  { %v2598_v30 = vmul.f32 0.125, %v2595_v33  ;;  %v2592_v34 = vpop.xlane.xlu1 %2591 }
0x1b49   :  { %v2597_v60 = vmul.f32 0.125, %v2592_v34 }
0x1b4a   :  { %v2600_v0 = vsub.f32 %v2585_v8, %v2598_v30 }
0x1b4b   :  { %v2599_v43 = vsub.f32 %v2580_v27, %v2597_v60 }
0x1b4c   :  { %v2602_v35 = vmul.f32 %v2600_v0, %v2600_v0 }
0x1b4d   :  { %v2601_v36 = vmul.f32 %v2599_v43, %v2599_v43 }
0x1b4e   :  { %v2606_v63 = vsel %vm95_vm0, %v2602_v35, 0.0 }
0x1b4f   :  { %2607 = vadd.xlane.f32.xlu0 %v2606_v63  ;;  %v2603_v14 = vsel %vm95_vm0, %v2601_v36, 0.0 }
0x1b50   :  { %2604 = vadd.xlane.f32.xlu1 %v2603_v14 }
0x1bdc   :  { %v2608_v51 = vpop.xlane.xlu0 %2607 }
0x1bdd   :  { %v2610_v12 = vmul.f32 0.125, %v2608_v51  ;;  %v2605_v39 = vpop.xlane.xlu1 %2604 }
0x1bde   :  { %v2609_v38 = vmul.f32 0.125, %v2605_v39 }
0x1bdf   :  { %v2612_v19 = vadd.f32 1e-05, %v2610_v12 }
0x1be0   :  { %v2611_v32 = vadd.f32 1e-05, %v2609_v38  ;;  %v2875_v38 = vld [vmem:[#allocation4 + $0x28d] ss:$0 sm:$0xff] }
0x1be1   :  { %3748 = vrsqrt.f32 %v2612_v19 }
0x1be2   :  { %3750 = vrsqrt.f32 %v2611_v32 }
0x1beb   :  { %v3749_v31 = vpop.eup %3748 }
0x1bec   :  { %v3751_v40 = vpop.eup %3750  ;;  %v2616_v41 = vmul.f32 %v3749_v31, %v2600_v0 }
0x1bed   :  { %v2615_v25 = vmul.f32 %v3751_v40, %v2599_v43 }
0x1bee   :  { %v2622_v49 = vmul.f32 %v2873_v2, %v2616_v41 }
0x1bef   :  { %v2621_v47 = vmul.f32 %v2873_v2, %v2615_v25 }
0x1bf0   :  { %v2628_v26 = vadd.f32 %v2874_v45, %v2622_v49 }
0x1bf1   :  { %v2627_v57 = vadd.f32 %v2874_v45, %v2621_v47 }
0x1bf2   :  { %v2632_v55 = vmul.f32 0.70710677, %v2628_v26  ;;  %v2630_v51 = vmul.f32 0.5, %v2628_v26 }
0x1bf3   :  { %v2631_v50 = vmul.f32 0.70710677, %v2627_v57  ;;  %v2629_v14 = vmul.f32 0.5, %v2627_v57 }
0x1bf4   :  { %v2638_v52 = vand.u32 2147483647, %v2632_v55  ;;  %vm2634_vm15 = vcmp.ge.f32.partialorder %v2632_v55, 0.0 }
0x1bf5   :  { %v2637_v53 = vand.u32 2147483647, %v2631_v50  ;;  %vm2633_vm1 = vcmp.ge.f32.partialorder %v2631_v50, 0.0  ;;  %v2636_v0 = vsel %vm2634_vm15, 1.0, %v3822_v6 }
0x1bf6   :  { %v2640_v46 = vmul.f32 0.3275911, %v2638_v52  ;;  %v2666_v56 = vsub.f32 0.0, %v2638_v52  ;;  %v2635_v43 = vsel %vm2633_vm1, 1.0, %v3822_v6 }
0x1bf7   :  { %v2639_v37 = vmul.f32 0.3275911, %v2637_v53  ;;  %v2665_v58 = vsub.f32 0.0, %v2637_v53 }
0x1bf8   :  { %v2642_v44 = vadd.f32 1.0, %v2640_v46  ;;  %v2668_v62 = vmul.f32 %v2666_v56, %v2638_v52 }
0x1bf9   :  { %v2641_v54 = vadd.f32 1.0, %v2639_v37  ;;  %v2667_v17 = vmul.f32 %v2665_v58, %v2637_v53 }
0x1bfa   :  { %3752 = vrcp.f32 %v2642_v44  ;;  %v2671_v5 = vmul.f32 1.442695, %v2668_v62 }
0x1bfb   :  { %3754 = vrcp.f32 %v2641_v54  ;;  %v2669_v7 = vmul.f32 1.442695, %v2667_v17 }
0x1bfc   :  { %3756 = vpow2.f32 %v2671_v5 }
0x1bfd   :  { %3758 = vpow2.f32 %v2669_v7 }
0x1c04   :  { %v3753_v61 = vpop.eup %3752 }
0x1c05   :  { %v3755_v1 = vpop.eup %3754  ;;  %v2648_v15 = vmul.f32 1.0614054, %v3753_v61 }
0x1c06   :  { %v2647_v3 = vmul.f32 1.0614054, %v3755_v1  ;;  %v3757_v27 = vpop.eup %3756 }
0x1c07   :  { %v2650_v4 = vadd.f32 -1.4531521, %v2648_v15  ;;  %v3759_v29 = vpop.eup %3758 }
0x1c08   :  { %v2649_v11 = vadd.f32 -1.4531521, %v2647_v3 }
0x1c09   :  { %v2652_v9 = vmul.f32 %v3753_v61, %v2650_v4 }
0x1c0a   :  { %v2651_v10 = vmul.f32 %v3755_v1, %v2649_v11 }
0x1c0b   :  { %v2654_v13 = vadd.f32 1.4214138, %v2652_v9 }
0x1c0c   :  { %v2653_v16 = vadd.f32 1.4214138, %v2651_v10 }
0x1c0d   :  { %v2656_v18 = vmul.f32 %v3753_v61, %v2654_v13 }
0x1c0e   :  { %v2655_v20 = vmul.f32 %v3755_v1, %v2653_v16 }
0x1c0f   :  { %v2658_v21 = vadd.f32 -0.28449672, %v2656_v18 }
0x1c10   :  { %v2657_v22 = vadd.f32 -0.28449672, %v2655_v20 }
0x1c11   :  { %v2660_v23 = vmul.f32 %v3753_v61, %v2658_v21 }
0x1c12   :  { %v2659_v24 = vmul.f32 %v3755_v1, %v2657_v22 }
0x1c13   :  { %v2662_v42 = vadd.f32 0.2548296, %v2660_v23 }
0x1c14   :  { %v2661_v8 = vadd.f32 0.2548296, %v2659_v24 }
0x1c15   :  { %v2664_v48 = vmul.f32 %v3753_v61, %v2662_v42 }
0x1c16   :  { %v2663_v28 = vmul.f32 %v3755_v1, %v2661_v8 }
0x1c17   :  { %v2674_v33 = vmul.f32 %v3757_v27, %v2664_v48 }
0x1c18   :  { %v2673_v30 = vmul.f32 %v3759_v29, %v2663_v28 }
0x1c19   :  { %v2676_v34 = vsub.f32 1.0, %v2674_v33 }
0x1c1a   :  { %v2675_v60 = vsub.f32 1.0, %v2673_v30 }
0x1c1b   :  { %v2678_v35 = vmul.f32 %v2676_v34, %v2636_v0 }
0x1c1c   :  { %v2677_v36 = vmul.f32 %v2675_v60, %v2635_v43 }
0x1c1d   :  { %v2680_v63 = vadd.f32 1.0, %v2678_v35 }
0x1c1e   :  { %v2679_v59 = vadd.f32 1.0, %v2677_v36 }
0x1c1f   :  { %v2682_v39 = vmul.f32 %v2680_v63, %v2630_v51 }
0x1c20   :  { %v2681_v12 = vmul.f32 %v2679_v59, %v2629_v14 }
0x1c22   :  { %3320 = vmatprep.mubr.msk.f32.mxu0 %vm95_vm0, %v2681_v12 }
0x1c23   :  { %3321 = vmatmul.mubr.msk.f32.vlgmr.msra.gmra.mrb[32].mxu0 %vm95_vm0, %v2682_v39 }
0x1cf6   :  { %v3322_v19 = vpop.f32.mrb[32].mxu0 }
0x1cf7   :  { %v2767_v32 = vadd.f32 %v3322_v19, %v2875_v38  ;;  %v2761_v31 = vpop.f32.mrb[33].mxu0 }
0x1cf8   :  { %v2762_v2 = vadd.f32 %v2875_v38, %v2761_v31 }
0x1cf9   :  { %2771 = vst [vmem:[%s4279_s4 + $0x8] sm:$0xff] %v2767_v32 }
0x1cfa   :  { %2770 = vst [vmem:[%s4279_s4] sm:$0xff] %v2762_v2 }
0x1cfb   :  { %2776 = vsyncpa [#allocation3], 1 }
0x1cfc   :  { %2777 = vsyncpa [#allocation5], 1 }

</bundles_post_ra>
